<compile_context>
chip_gen: v6e
topology: v6e:2x2x1
jax: 0.10.0
libtpu: 0.0.40
codegen_flags: <defaults>
</compile_context>

<pallas_src>
import functools

import jax
import jax.numpy as jnp
from jax.experimental import pallas as pl
from jax.experimental.pallas import tpu as pltpu


def _bilstm_attn_kernel(emb_ref,                                   # (T*Bp, E) time-major, flat
                        w0f_ref, b0f_ref, w0b_ref, b0b_ref,        # layer 0: (E+H,4H), (1,4H)
                        w1f_ref, b1f_ref, w1b_ref, b1b_ref,        # layer 1: (3H,4H), (1,4H)
                        w2f_ref, b2f_ref, w2b_ref, b2b_ref,        # layer 2: (3H,4H), (1,4H)
                        watt_ref, batt_ref,                        # (1,2H), (1,1)
                        wfc1_ref, bfc1_ref,                        # (2H,H), (1,H)
                        bns_ref, bnb_ref,                          # (1,H), (1,H)  BN eval scale/shift
                        wfc2_ref, bfc2_ref,                        # (H,Cp), (1,Cp)  lane-padded
                        out_ref,                                   # (Bp, Cp)
                        *, T, Bp, E, H):
    f32 = jnp.float32

    def run_direction(xg, whh, reverse):
        """xg: (T*Bp, 4H) precomputed x @ W_ih^T + (b_ih + b_hh).

        Only the small h @ W_hh^T matmul sits on the serial recurrence chain.
        Fully unrolled over static T. Gate order matches PyTorch: [i, f, g, o].
        """
        h = jnp.zeros((Bp, H), f32)
        c = jnp.zeros((Bp, H), f32)
        outs = [None] * T
        ts = range(T - 1, -1, -1) if reverse else range(T)
        for t in ts:
            gates = xg[t * Bp:(t + 1) * Bp, :] + jnp.dot(
                h, whh, preferred_element_type=f32)                # (Bp, 4H)
            sig = jax.nn.sigmoid(gates)                            # full 128-lane EUP pass
            th = jnp.tanh(gates)                                   # full 128-lane EUP pass
            c = sig[:, H:2 * H] * c + sig[:, 0:H] * th[:, 2 * H:3 * H]
            h = sig[:, 3 * H:4 * H] * jnp.tanh(c)
            outs[t] = h
        return jnp.concatenate(outs, axis=0)                       # (T*Bp, H)

    # ---------------- layer 0: input is the embedded sequence --------------------
    emb = emb_ref[...]                                             # (T*Bp, E)
    w0f = w0f_ref[...]
    w0b = w0b_ref[...]
    xgf = jnp.dot(emb, w0f[0:E], preferred_element_type=f32) + b0f_ref[...]
    xgb = jnp.dot(emb, w0b[0:E], preferred_element_type=f32) + b0b_ref[...]
    fh = run_direction(xgf, w0f[E:], reverse=False)                # (T*Bp, H)
    bh = run_direction(xgb, w0b[E:], reverse=True)                 # (T*Bp, H)

    # ------------- layers 1..2: input = [fwd, bwd] of previous layer (kept split) -
    for wfr, bfr, wbr, bbr in ((w1f_ref, b1f_ref, w1b_ref, b1b_ref),
                               (w2f_ref, b2f_ref, w2b_ref, b2b_ref)):
        wf = wfr[...]                                              # (3H, 4H)
        wb = wbr[...]
        xgf = (jnp.dot(fh, wf[0:H], preferred_element_type=f32)
               + jnp.dot(bh, wf[H:2 * H], preferred_element_type=f32)
               + bfr[...])
        xgb = (jnp.dot(fh, wb[0:H], preferred_element_type=f32)
               + jnp.dot(bh, wb[H:2 * H], preferred_element_type=f32)
               + bbr[...])
        # NOTE: inter-layer LSTM dropout is identity at inference.
        fh, bh = (run_direction(xgf, wf[2 * H:], reverse=False),
                  run_direction(xgb, wb[2 * H:], reverse=True))

    # ---------------- attention over time -----------------------------------------
    watt = watt_ref[...]                                           # (1, 2H)
    scores = jnp.tanh(
        jnp.sum(fh * watt[:, 0:H], axis=-1, keepdims=True)
        + jnp.sum(bh * watt[:, H:2 * H], axis=-1, keepdims=True)
        + batt_ref[...])                                           # (T*Bp, 1)

    s = [scores[t * Bp:(t + 1) * Bp, :] for t in range(T)]         # T x (Bp, 1)
    m = s[0]
    for t in range(1, T):
        m = jnp.maximum(m, s[t])
    e = [jnp.exp(s[t] - m) for t in range(T)]
    denom = e[0]
    for t in range(1, T):
        denom = denom + e[t]

    att_f = e[0] * fh[0:Bp, :]
    att_b = e[0] * bh[0:Bp, :]
    for t in range(1, T):
        att_f = att_f + e[t] * fh[t * Bp:(t + 1) * Bp, :]
        att_b = att_b + e[t] * bh[t * Bp:(t + 1) * Bp, :]
    inv = 1.0 / denom
    att_f = att_f * inv                                            # attended fwd half  (Bp, H)
    att_b = att_b * inv                                            # attended bwd half  (Bp, H)

    # ---------------- fc1 + relu + BatchNorm(eval) + fc2 (lane-padded) -------------
    # dropout1 / dropout2 are identity at inference.
    wfc1 = wfc1_ref[...]                                           # (2H, H)
    h1 = (jnp.dot(att_f, wfc1[0:H], preferred_element_type=f32)
          + jnp.dot(att_b, wfc1[H:2 * H], preferred_element_type=f32)
          + bfc1_ref[...])
    h1 = jnp.maximum(h1, 0.0)
    h1 = h1 * bns_ref[...] + bnb_ref[...]                          # eval-mode BN folded
    out_ref[...] = (jnp.dot(h1, wfc2_ref[...], preferred_element_type=f32)
                    + bfc2_ref[...])                               # (Bp, Cp) lane-dense store


def init_params(key, vocab_size, embedding_dim, hidden_dim, num_layers, num_classes):
    """PyTorch-style deterministic init (uniform +-1/sqrt(fan))."""
    E, H, C = embedding_dim, hidden_dim, num_classes
    keys = iter(jax.random.split(key, 64))

    def u(shape, lim):
        return jax.random.uniform(next(keys), shape, jnp.float32, -lim, lim)

    emb = jax.random.normal(next(keys), (vocab_size, E), jnp.float32)
    emb = emb.at[0].set(0.0)                          # padding_idx=0 -> zero row
    params = {"embedding": emb}

    k_lstm = 1.0 / float(H) ** 0.5
    for l in range(num_layers):
        din = E if l == 0 else 2 * H
        for rev in (False, True):
            suf = f"_l{l}" + ("_reverse" if rev else "")
            params["w_ih" + suf] = u((4 * H, din), k_lstm)
            params["w_hh" + suf] = u((4 * H, H), k_lstm)
            params["b_ih" + suf] = u((4 * H,), k_lstm)
            params["b_hh" + suf] = u((4 * H,), k_lstm)

    k2 = 1.0 / float(2 * H) ** 0.5
    k1 = 1.0 / float(H) ** 0.5
    params["w_att"] = u((1, 2 * H), k2)
    params["b_att"] = u((1,), k2)
    params["w_fc1"] = u((H, 2 * H), k2)
    params["b_fc1"] = u((H,), k2)
    params["w_fc2"] = u((C, H), k1)
    params["b_fc2"] = u((C,), k1)
    # BatchNorm1d(H) affine params + eval-mode running statistics.
    params["bn_gamma"] = 1.0 + 0.1 * jax.random.normal(next(keys), (H,), jnp.float32)
    params["bn_beta"] = 0.1 * jax.random.normal(next(keys), (H,), jnp.float32)
    params["bn_mean"] = 0.1 * jax.random.normal(next(keys), (H,), jnp.float32)
    params["bn_var"] = 1.0 + 0.1 * jnp.abs(jax.random.normal(next(keys), (H,), jnp.float32))
    return params


def improved_lstm_forward(x_ids, params):
    """x_ids: (B, T) int32 token ids. Returns (B, num_classes) float32 logits."""
    B, T = x_ids.shape
    emb_table = params["embedding"]                    # (V, E)
    E = emb_table.shape[1]
    H = params["w_hh_l0"].shape[1]
    C = params["w_fc2"].shape[0]

    Bp = max(8, ((B + 7) // 8) * 8)                    # pad batch to sublane multiple
    Cp = 128                                           # lane-dense classifier output

    # ---- glue: embedding gather, time-major layout, batch padding ----------------
    # TODO(synk): embedding rows could be gathered inside the pipeline via scalar
    # prefetch to avoid materializing (B,T,E) in HBM; at these tiny shapes the
    # plain-JAX gather is negligible.
    embedded = jnp.take(emb_table, x_ids, axis=0)      # (B, T, E)
    emb_tm = jnp.transpose(embedded, (1, 0, 2))        # (T, B, E)
    emb_tm = jnp.pad(emb_tm, ((0, 0), (0, Bp - B), (0, 0)))
    emb_flat = emb_tm.reshape(T * Bp, E)               # (T*Bp, E)

    # ---- pre-transpose / pre-combine weights (glue) -------------------------------
    def comb(l, rev):
        suf = f"_l{l}" + ("_reverse" if rev else "")
        w = jnp.concatenate([params["w_ih" + suf].T, params["w_hh" + suf].T], axis=0)
        b = (params["b_ih" + suf] + params["b_hh" + suf]).reshape(1, 4 * H)
        return w, b

    w0f, b0f = comb(0, False); w0b, b0b = comb(0, True)
    w1f, b1f = comb(1, False); w1b, b1b = comb(1, True)
    w2f, b2f = comb(2, False); w2b, b2b = comb(2, True)

    watt = params["w_att"].reshape(1, 2 * H)
    batt = params["b_att"].reshape(1, 1)
    wfc1 = params["w_fc1"].T                           # (2H, H)
    bfc1 = params["b_fc1"].reshape(1, H)

    # BatchNorm1d in eval mode, folded into scale/shift. The PyTorch forward only
    # applies BN when the batch has more than one row.
    if B > 1:
        eps = 1e-5
        bn_scale = (params["bn_gamma"] / jnp.sqrt(params["bn_var"] + eps)).reshape(1, H)
        bn_shift = (params["bn_beta"] - params["bn_mean"] * bn_scale[0]).reshape(1, H)
    else:
        bn_scale = jnp.ones((1, H), jnp.float32)
        bn_shift = jnp.zeros((1, H), jnp.float32)

    wfc2 = jnp.zeros((H, Cp), jnp.float32).at[:, :C].set(params["w_fc2"].T)
    bfc2 = jnp.zeros((1, Cp), jnp.float32).at[0, :C].set(params["b_fc2"])

    vmem = pl.BlockSpec(memory_space=pltpu.MemorySpace.VMEM)
    kernel = functools.partial(_bilstm_attn_kernel, T=T, Bp=Bp, E=E, H=H)
    out = pl.pallas_call(
        kernel,
        out_shape=jax.ShapeDtypeStruct((Bp, Cp), jnp.float32),
        in_specs=[vmem] * 21,
        out_specs=vmem,
    )(emb_flat,
      w0f, b0f, w0b, b0b,
      w1f, b1f, w1b, b1b,
      w2f, b2f, w2b, b2b,
      watt, batt, wfc1, bfc1, bn_scale, bn_shift, wfc2, bfc2)
    return out[:B, :C]


def _reference_forward(x_ids, params, num_layers=3):
    """Pure-JAX reference of the same (eval-mode) forward pass."""
    emb = jnp.take(params["embedding"], x_ids, axis=0)  # (B, T, E)
    B, T, _ = emb.shape
    H = params["w_hh_l0"].shape[1]

    def cell(x_t, h, c, wih, whh, bih, bhh):
        gates = x_t @ wih.T + bih + h @ whh.T + bhh
        i = jax.nn.sigmoid(gates[:, :H])
        f = jax.nn.sigmoid(gates[:, H:2 * H])
        g = jnp.tanh(gates[:, 2 * H:3 * H])
        o = jax.nn.sigmoid(gates[:, 3 * H:])
        c = f * c + i * g
        h = o * jnp.tanh(c)
        return h, c

    layer_in = emb
    for l in range(num_layers):
        outs_f, outs_b = [], [None] * T
        h = c = jnp.zeros((B, H), jnp.float32)
        for t in range(T):
            h, c = cell(layer_in[:, t], h, c,
                        params[f"w_ih_l{l}"], params[f"w_hh_l{l}"],
                        params[f"b_ih_l{l}"], params[f"b_hh_l{l}"])
            outs_f.append(h)
        h = c = jnp.zeros((B, H), jnp.float32)
        for t in range(T - 1, -1, -1):
            h, c = cell(layer_in[:, t], h, c,
                        params[f"w_ih_l{l}_reverse"], params[f"w_hh_l{l}_reverse"],
                        params[f"b_ih_l{l}_reverse"], params[f"b_hh_l{l}_reverse"])
            outs_b[t] = h
        layer_in = jnp.stack(
            [jnp.concatenate([outs_f[t], outs_b[t]], axis=-1) for t in range(T)], axis=1)

    lstm_out = layer_in                                             # (B, T, 2H)
    attn = jnp.tanh(lstm_out @ params["w_att"].T + params["b_att"])  # (B, T, 1)
    attn = jax.nn.softmax(attn, axis=1)
    attended = jnp.sum(lstm_out * attn, axis=1)                     # (B, 2H)
    h1 = jax.nn.relu(attended @ params["w_fc1"].T + params["b_fc1"])
    if B > 1:  # eval-mode BatchNorm1d with running statistics
        h1 = ((h1 - params["bn_mean"]) / jnp.sqrt(params["bn_var"] + 1e-5)
              * params["bn_gamma"] + params["bn_beta"])
    return h1 @ params["w_fc2"].T + params["b_fc2"]


if __name__ == "__main__":
    VOCAB = 50
    EMB_DIM = 32
    HIDDEN = 32
    NUM_LAYERS = 3
    NUM_CLASSES = 3
    B, T = 2, 8

    key = jax.random.PRNGKey(0)
    k_params, k_ids = jax.random.split(key)
    params = init_params(k_params, VOCAB, EMB_DIM, HIDDEN, NUM_LAYERS, NUM_CLASSES)
    x_ids = jax.random.randint(k_ids, (B, T), 0, VOCAB, dtype=jnp.int32)

    logits = improved_lstm_forward(x_ids, params)
    logits = jax.block_until_ready(logits)

    ref = _reference_forward(x_ids, params, num_layers=NUM_LAYERS)
    assert logits.shape == (B, NUM_CLASSES)
    assert jnp.allclose(logits, ref, atol=2e-4, rtol=2e-4), (
        float(jnp.max(jnp.abs(logits - ref))))

    print("KERNEL_OK")
</pallas_src>

<mosaic_0001>
module attributes {stable_mosaic.version = 11 : i64} {
  func.func @_bilstm_attn_kernel(%arg0: memref<64x32xf32, #tpu.memory_space<vmem>>, %arg1: memref<64x128xf32, #tpu.memory_space<vmem>>, %arg2: memref<1x128xf32, #tpu.memory_space<vmem>>, %arg3: memref<64x128xf32, #tpu.memory_space<vmem>>, %arg4: memref<1x128xf32, #tpu.memory_space<vmem>>, %arg5: memref<96x128xf32, #tpu.memory_space<vmem>>, %arg6: memref<1x128xf32, #tpu.memory_space<vmem>>, %arg7: memref<96x128xf32, #tpu.memory_space<vmem>>, %arg8: memref<1x128xf32, #tpu.memory_space<vmem>>, %arg9: memref<96x128xf32, #tpu.memory_space<vmem>>, %arg10: memref<1x128xf32, #tpu.memory_space<vmem>>, %arg11: memref<96x128xf32, #tpu.memory_space<vmem>>, %arg12: memref<1x128xf32, #tpu.memory_space<vmem>>, %arg13: memref<1x64xf32, #tpu.memory_space<vmem>>, %arg14: memref<1x1xf32, #tpu.memory_space<vmem>>, %arg15: memref<64x32xf32, #tpu.memory_space<vmem>>, %arg16: memref<1x32xf32, #tpu.memory_space<vmem>>, %arg17: memref<1x32xf32, #tpu.memory_space<vmem>>, %arg18: memref<1x32xf32, #tpu.memory_space<vmem>>, %arg19: memref<32x128xf32, #tpu.memory_space<vmem>>, %arg20: memref<1x128xf32, #tpu.memory_space<vmem>>, %arg21: memref<8x128xf32, #tpu.memory_space<vmem>>) attributes {dimension_semantics = [], scalar_prefetch = 0 : i64, scratch_operands = 0 : i64, tpu.core_type = #tpu.core_type<tc>} {
    %c0 = arith.constant 0 : index
    %c0_0 = arith.constant 0 : index
    %0 = vector.load %arg0[%c0, %c0_0] : memref<64x32xf32, #tpu.memory_space<vmem>>, vector<64x32xf32>
    %c0_1 = arith.constant 0 : index
    %c0_2 = arith.constant 0 : index
    %1 = vector.load %arg1[%c0_1, %c0_2] : memref<64x128xf32, #tpu.memory_space<vmem>>, vector<64x128xf32>
    %c0_3 = arith.constant 0 : index
    %c0_4 = arith.constant 0 : index
    %2 = vector.load %arg3[%c0_3, %c0_4] : memref<64x128xf32, #tpu.memory_space<vmem>>, vector<64x128xf32>
    %3 = vector.extract_strided_slice %1 {offsets = [0, 0], sizes = [32, 128], strides = [1, 1]} : vector<64x128xf32> to vector<32x128xf32>
    %cst = arith.constant dense<0.000000e+00> : vector<64x128xf32>
    %4 = tpu.matmul %0, %3, %cst {dimension_numbers = #tpu.dot_dimension_numbers<[1], [0], [0], [1], [0, 0, 1, 1], [], []>} : vector<64x32xf32>, vector<32x128xf32>, vector<64x128xf32> -> vector<64x128xf32>
    %c0_5 = arith.constant 0 : index
    %c0_6 = arith.constant 0 : index
    %5 = vector.load %arg2[%c0_5, %c0_6] : memref<1x128xf32, #tpu.memory_space<vmem>>, vector<1x128xf32>
    %6 = vector.broadcast %5 : vector<1x128xf32> to vector<64x128xf32>
    %7 = arith.addf %4, %6 : vector<64x128xf32>
    %8 = vector.extract_strided_slice %2 {offsets = [0, 0], sizes = [32, 128], strides = [1, 1]} : vector<64x128xf32> to vector<32x128xf32>
    %cst_7 = arith.constant dense<0.000000e+00> : vector<64x128xf32>
    %9 = tpu.matmul %0, %8, %cst_7 {dimension_numbers = #tpu.dot_dimension_numbers<[1], [0], [0], [1], [0, 0, 1, 1], [], []>} : vector<64x32xf32>, vector<32x128xf32>, vector<64x128xf32> -> vector<64x128xf32>
    %c0_8 = arith.constant 0 : index
    %c0_9 = arith.constant 0 : index
    %10 = vector.load %arg4[%c0_8, %c0_9] : memref<1x128xf32, #tpu.memory_space<vmem>>, vector<1x128xf32>
    %11 = vector.broadcast %10 : vector<1x128xf32> to vector<64x128xf32>
    %12 = arith.addf %9, %11 : vector<64x128xf32>
    %13 = vector.extract_strided_slice %1 {offsets = [32, 0], sizes = [32, 128], strides = [1, 1]} : vector<64x128xf32> to vector<32x128xf32>
    %cst_10 = arith.constant 0.000000e+00 : f32
    %14 = vector.broadcast %cst_10 : f32 to vector<8x32xf32>
    %cst_11 = arith.constant 0.000000e+00 : f32
    %15 = vector.broadcast %cst_11 : f32 to vector<8x32xf32>
    %16 = vector.extract_strided_slice %7 {offsets = [0, 0], sizes = [8, 128], strides = [1, 1]} : vector<64x128xf32> to vector<8x128xf32>
    %cst_12 = arith.constant dense<0.000000e+00> : vector<8x128xf32>
    %17 = tpu.matmul %14, %13, %cst_12 {dimension_numbers = #tpu.dot_dimension_numbers<[1], [0], [0], [1], [0, 0, 1, 1], [], []>} : vector<8x32xf32>, vector<32x128xf32>, vector<8x128xf32> -> vector<8x128xf32>
    %18 = arith.addf %16, %17 : vector<8x128xf32>
    %19 = arith.negf %18 : vector<8x128xf32>
    %20 = math.exp %19 : vector<8x128xf32>
    %cst_13 = arith.constant 1.000000e+00 : f32
    %21 = vector.broadcast %cst_13 : f32 to vector<8x128xf32>
    %22 = arith.addf %21, %20 : vector<8x128xf32>
    %23 = arith.divf %21, %22 : vector<8x128xf32>
    %24 = math.tanh %18 : vector<8x128xf32>
    %25 = vector.extract_strided_slice %23 {offsets = [0, 32], sizes = [8, 32], strides = [1, 1]} : vector<8x128xf32> to vector<8x32xf32>
    %26 = arith.mulf %25, %15 : vector<8x32xf32>
    %27 = vector.extract_strided_slice %23 {offsets = [0, 0], sizes = [8, 32], strides = [1, 1]} : vector<8x128xf32> to vector<8x32xf32>
    %28 = vector.extract_strided_slice %24 {offsets = [0, 64], sizes = [8, 32], strides = [1, 1]} : vector<8x128xf32> to vector<8x32xf32>
    %29 = arith.mulf %27, %28 : vector<8x32xf32>
    %30 = arith.addf %26, %29 : vector<8x32xf32>
    %31 = vector.extract_strided_slice %23 {offsets = [0, 96], sizes = [8, 32], strides = [1, 1]} : vector<8x128xf32> to vector<8x32xf32>
    %32 = math.tanh %30 : vector<8x32xf32>
    %33 = arith.mulf %31, %32 : vector<8x32xf32>
    %34 = vector.extract_strided_slice %7 {offsets = [8, 0], sizes = [8, 128], strides = [1, 1]} : vector<64x128xf32> to vector<8x128xf32>
    %cst_14 = arith.constant dense<0.000000e+00> : vector<8x128xf32>
    %35 = tpu.matmul %33, %13, %cst_14 {dimension_numbers = #tpu.dot_dimension_numbers<[1], [0], [0], [1], [0, 0, 1, 1], [], []>} : vector<8x32xf32>, vector<32x128xf32>, vector<8x128xf32> -> vector<8x128xf32>
    %36 = arith.addf %34, %35 : vector<8x128xf32>
    %37 = arith.negf %36 : vector<8x128xf32>
    %38 = math.exp %37 : vector<8x128xf32>
    %cst_15 = arith.constant 1.000000e+00 : f32
    %39 = vector.broadcast %cst_15 : f32 to vector<8x128xf32>
    %40 = arith.addf %39, %38 : vector<8x128xf32>
    %41 = arith.divf %39, %40 : vector<8x128xf32>
    %42 = math.tanh %36 : vector<8x128xf32>
    %43 = vector.extract_strided_slice %41 {offsets = [0, 32], sizes = [8, 32], strides = [1, 1]} : vector<8x128xf32> to vector<8x32xf32>
    %44 = arith.mulf %43, %30 : vector<8x32xf32>
    %45 = vector.extract_strided_slice %41 {offsets = [0, 0], sizes = [8, 32], strides = [1, 1]} : vector<8x128xf32> to vector<8x32xf32>
    %46 = vector.extract_strided_slice %42 {offsets = [0, 64], sizes = [8, 32], strides = [1, 1]} : vector<8x128xf32> to vector<8x32xf32>
    %47 = arith.mulf %45, %46 : vector<8x32xf32>
    %48 = arith.addf %44, %47 : vector<8x32xf32>
    %49 = vector.extract_strided_slice %41 {offsets = [0, 96], sizes = [8, 32], strides = [1, 1]} : vector<8x128xf32> to vector<8x32xf32>
    %50 = math.tanh %48 : vector<8x32xf32>
    %51 = arith.mulf %49, %50 : vector<8x32xf32>
    %52 = vector.extract_strided_slice %7 {offsets = [16, 0], sizes = [8, 128], strides = [1, 1]} : vector<64x128xf32> to vector<8x128xf32>
    %cst_16 = arith.constant dense<0.000000e+00> : vector<8x128xf32>
    %53 = tpu.matmul %51, %13, %cst_16 {dimension_numbers = #tpu.dot_dimension_numbers<[1], [0], [0], [1], [0, 0, 1, 1], [], []>} : vector<8x32xf32>, vector<32x128xf32>, vector<8x128xf32> -> vector<8x128xf32>
    %54 = arith.addf %52, %53 : vector<8x128xf32>
    %55 = arith.negf %54 : vector<8x128xf32>
    %56 = math.exp %55 : vector<8x128xf32>
    %cst_17 = arith.constant 1.000000e+00 : f32
    %57 = vector.broadcast %cst_17 : f32 to vector<8x128xf32>
    %58 = arith.addf %57, %56 : vector<8x128xf32>
    %59 = arith.divf %57, %58 : vector<8x128xf32>
    %60 = math.tanh %54 : vector<8x128xf32>
    %61 = vector.extract_strided_slice %59 {offsets = [0, 32], sizes = [8, 32], strides = [1, 1]} : vector<8x128xf32> to vector<8x32xf32>
    %62 = arith.mulf %61, %48 : vector<8x32xf32>
    %63 = vector.extract_strided_slice %59 {offsets = [0, 0], sizes = [8, 32], strides = [1, 1]} : vector<8x128xf32> to vector<8x32xf32>
    %64 = vector.extract_strided_slice %60 {offsets = [0, 64], sizes = [8, 32], strides = [1, 1]} : vector<8x128xf32> to vector<8x32xf32>
    %65 = arith.mulf %63, %64 : vector<8x32xf32>
    %66 = arith.addf %62, %65 : vector<8x32xf32>
    %67 = vector.extract_strided_slice %59 {offsets = [0, 96], sizes = [8, 32], strides = [1, 1]} : vector<8x128xf32> to vector<8x32xf32>
    %68 = math.tanh %66 : vector<8x32xf32>
    %69 = arith.mulf %67, %68 : vector<8x32xf32>
    %70 = vector.extract_strided_slice %7 {offsets = [24, 0], sizes = [8, 128], strides = [1, 1]} : vector<64x128xf32> to vector<8x128xf32>
    %cst_18 = arith.constant dense<0.000000e+00> : vector<8x128xf32>
    %71 = tpu.matmul %69, %13, %cst_18 {dimension_numbers = #tpu.dot_dimension_numbers<[1], [0], [0], [1], [0, 0, 1, 1], [], []>} : vector<8x32xf32>, vector<32x128xf32>, vector<8x128xf32> -> vector<8x128xf32>
    %72 = arith.addf %70, %71 : vector<8x128xf32>
    %73 = arith.negf %72 : vector<8x128xf32>
    %74 = math.exp %73 : vector<8x128xf32>
    %cst_19 = arith.constant 1.000000e+00 : f32
    %75 = vector.broadcast %cst_19 : f32 to vector<8x128xf32>
    %76 = arith.addf %75, %74 : vector<8x128xf32>
    %77 = arith.divf %75, %76 : vector<8x128xf32>
    %78 = math.tanh %72 : vector<8x128xf32>
    %79 = vector.extract_strided_slice %77 {offsets = [0, 32], sizes = [8, 32], strides = [1, 1]} : vector<8x128xf32> to vector<8x32xf32>
    %80 = arith.mulf %79, %66 : vector<8x32xf32>
    %81 = vector.extract_strided_slice %77 {offsets = [0, 0], sizes = [8, 32], strides = [1, 1]} : vector<8x128xf32> to vector<8x32xf32>
    %82 = vector.extract_strided_slice %78 {offsets = [0, 64], sizes = [8, 32], strides = [1, 1]} : vector<8x128xf32> to vector<8x32xf32>
    %83 = arith.mulf %81, %82 : vector<8x32xf32>
    %84 = arith.addf %80, %83 : vector<8x32xf32>
    %85 = vector.extract_strided_slice %77 {offsets = [0, 96], sizes = [8, 32], strides = [1, 1]} : vector<8x128xf32> to vector<8x32xf32>
    %86 = math.tanh %84 : vector<8x32xf32>
    %87 = arith.mulf %85, %86 : vector<8x32xf32>
    %88 = vector.extract_strided_slice %7 {offsets = [32, 0], sizes = [8, 128], strides = [1, 1]} : vector<64x128xf32> to vector<8x128xf32>
    %cst_20 = arith.constant dense<0.000000e+00> : vector<8x128xf32>
    %89 = tpu.matmul %87, %13, %cst_20 {dimension_numbers = #tpu.dot_dimension_numbers<[1], [0], [0], [1], [0, 0, 1, 1], [], []>} : vector<8x32xf32>, vector<32x128xf32>, vector<8x128xf32> -> vector<8x128xf32>
    %90 = arith.addf %88, %89 : vector<8x128xf32>
    %91 = arith.negf %90 : vector<8x128xf32>
    %92 = math.exp %91 : vector<8x128xf32>
    %cst_21 = arith.constant 1.000000e+00 : f32
    %93 = vector.broadcast %cst_21 : f32 to vector<8x128xf32>
    %94 = arith.addf %93, %92 : vector<8x128xf32>
    %95 = arith.divf %93, %94 : vector<8x128xf32>
    %96 = math.tanh %90 : vector<8x128xf32>
    %97 = vector.extract_strided_slice %95 {offsets = [0, 32], sizes = [8, 32], strides = [1, 1]} : vector<8x128xf32> to vector<8x32xf32>
    %98 = arith.mulf %97, %84 : vector<8x32xf32>
    %99 = vector.extract_strided_slice %95 {offsets = [0, 0], sizes = [8, 32], strides = [1, 1]} : vector<8x128xf32> to vector<8x32xf32>
    %100 = vector.extract_strided_slice %96 {offsets = [0, 64], sizes = [8, 32], strides = [1, 1]} : vector<8x128xf32> to vector<8x32xf32>
    %101 = arith.mulf %99, %100 : vector<8x32xf32>
    %102 = arith.addf %98, %101 : vector<8x32xf32>
    %103 = vector.extract_strided_slice %95 {offsets = [0, 96], sizes = [8, 32], strides = [1, 1]} : vector<8x128xf32> to vector<8x32xf32>
    %104 = math.tanh %102 : vector<8x32xf32>
    %105 = arith.mulf %103, %104 : vector<8x32xf32>
    %106 = vector.extract_strided_slice %7 {offsets = [40, 0], sizes = [8, 128], strides = [1, 1]} : vector<64x128xf32> to vector<8x128xf32>
    %cst_22 = arith.constant dense<0.000000e+00> : vector<8x128xf32>
    %107 = tpu.matmul %105, %13, %cst_22 {dimension_numbers = #tpu.dot_dimension_numbers<[1], [0], [0], [1], [0, 0, 1, 1], [], []>} : vector<8x32xf32>, vector<32x128xf32>, vector<8x128xf32> -> vector<8x128xf32>
    %108 = arith.addf %106, %107 : vector<8x128xf32>
    %109 = arith.negf %108 : vector<8x128xf32>
    %110 = math.exp %109 : vector<8x128xf32>
    %cst_23 = arith.constant 1.000000e+00 : f32
    %111 = vector.broadcast %cst_23 : f32 to vector<8x128xf32>
    %112 = arith.addf %111, %110 : vector<8x128xf32>
    %113 = arith.divf %111, %112 : vector<8x128xf32>
    %114 = math.tanh %108 : vector<8x128xf32>
    %115 = vector.extract_strided_slice %113 {offsets = [0, 32], sizes = [8, 32], strides = [1, 1]} : vector<8x128xf32> to vector<8x32xf32>
    %116 = arith.mulf %115, %102 : vector<8x32xf32>
    %117 = vector.extract_strided_slice %113 {offsets = [0, 0], sizes = [8, 32], strides = [1, 1]} : vector<8x128xf32> to vector<8x32xf32>
    %118 = vector.extract_strided_slice %114 {offsets = [0, 64], sizes = [8, 32], strides = [1, 1]} : vector<8x128xf32> to vector<8x32xf32>
    %119 = arith.mulf %117, %118 : vector<8x32xf32>
    %120 = arith.addf %116, %119 : vector<8x32xf32>
    %121 = vector.extract_strided_slice %113 {offsets = [0, 96], sizes = [8, 32], strides = [1, 1]} : vector<8x128xf32> to vector<8x32xf32>
    %122 = math.tanh %120 : vector<8x32xf32>
    %123 = arith.mulf %121, %122 : vector<8x32xf32>
    %124 = vector.extract_strided_slice %7 {offsets = [48, 0], sizes = [8, 128], strides = [1, 1]} : vector<64x128xf32> to vector<8x128xf32>
    %cst_24 = arith.constant dense<0.000000e+00> : vector<8x128xf32>
    %125 = tpu.matmul %123, %13, %cst_24 {dimension_numbers = #tpu.dot_dimension_numbers<[1], [0], [0], [1], [0, 0, 1, 1], [], []>} : vector<8x32xf32>, vector<32x128xf32>, vector<8x128xf32> -> vector<8x128xf32>
    %126 = arith.addf %124, %125 : vector<8x128xf32>
    %127 = arith.negf %126 : vector<8x128xf32>
    %128 = math.exp %127 : vector<8x128xf32>
    %cst_25 = arith.constant 1.000000e+00 : f32
    %129 = vector.broadcast %cst_25 : f32 to vector<8x128xf32>
    %130 = arith.addf %129, %128 : vector<8x128xf32>
    %131 = arith.divf %129, %130 : vector<8x128xf32>
    %132 = math.tanh %126 : vector<8x128xf32>
    %133 = vector.extract_strided_slice %131 {offsets = [0, 32], sizes = [8, 32], strides = [1, 1]} : vector<8x128xf32> to vector<8x32xf32>
    %134 = arith.mulf %133, %120 : vector<8x32xf32>
    %135 = vector.extract_strided_slice %131 {offsets = [0, 0], sizes = [8, 32], strides = [1, 1]} : vector<8x128xf32> to vector<8x32xf32>
    %136 = vector.extract_strided_slice %132 {offsets = [0, 64], sizes = [8, 32], strides = [1, 1]} : vector<8x128xf32> to vector<8x32xf32>
    %137 = arith.mulf %135, %136 : vector<8x32xf32>
    %138 = arith.addf %134, %137 : vector<8x32xf32>
    %139 = vector.extract_strided_slice %131 {offsets = [0, 96], sizes = [8, 32], strides = [1, 1]} : vector<8x128xf32> to vector<8x32xf32>
    %140 = math.tanh %138 : vector<8x32xf32>
    %141 = arith.mulf %139, %140 : vector<8x32xf32>
    %142 = vector.extract_strided_slice %7 {offsets = [56, 0], sizes = [8, 128], strides = [1, 1]} : vector<64x128xf32> to vector<8x128xf32>
    %cst_26 = arith.constant dense<0.000000e+00> : vector<8x128xf32>
    %143 = tpu.matmul %141, %13, %cst_26 {dimension_numbers = #tpu.dot_dimension_numbers<[1], [0], [0], [1], [0, 0, 1, 1], [], []>} : vector<8x32xf32>, vector<32x128xf32>, vector<8x128xf32> -> vector<8x128xf32>
    %144 = arith.addf %142, %143 : vector<8x128xf32>
    %145 = arith.negf %144 : vector<8x128xf32>
    %146 = math.exp %145 : vector<8x128xf32>
    %cst_27 = arith.constant 1.000000e+00 : f32
    %147 = vector.broadcast %cst_27 : f32 to vector<8x128xf32>
    %148 = arith.addf %147, %146 : vector<8x128xf32>
    %149 = arith.divf %147, %148 : vector<8x128xf32>
    %150 = math.tanh %144 : vector<8x128xf32>
    %151 = vector.extract_strided_slice %149 {offsets = [0, 32], sizes = [8, 32], strides = [1, 1]} : vector<8x128xf32> to vector<8x32xf32>
    %152 = arith.mulf %151, %138 : vector<8x32xf32>
    %153 = vector.extract_strided_slice %149 {offsets = [0, 0], sizes = [8, 32], strides = [1, 1]} : vector<8x128xf32> to vector<8x32xf32>
    %154 = vector.extract_strided_slice %150 {offsets = [0, 64], sizes = [8, 32], strides = [1, 1]} : vector<8x128xf32> to vector<8x32xf32>
    %155 = arith.mulf %153, %154 : vector<8x32xf32>
    %156 = arith.addf %152, %155 : vector<8x32xf32>
    %157 = vector.extract_strided_slice %149 {offsets = [0, 96], sizes = [8, 32], strides = [1, 1]} : vector<8x128xf32> to vector<8x32xf32>
    %158 = math.tanh %156 : vector<8x32xf32>
    %159 = arith.mulf %157, %158 : vector<8x32xf32>
    %160 = tpu.concatenate %33, %51, %69, %87, %105, %123, %141, %159 in 0 : vector<8x32xf32>, vector<8x32xf32>, vector<8x32xf32>, vector<8x32xf32>, vector<8x32xf32>, vector<8x32xf32>, vector<8x32xf32>, vector<8x32xf32> -> vector<64x32xf32>
    %161 = vector.extract_strided_slice %2 {offsets = [32, 0], sizes = [32, 128], strides = [1, 1]} : vector<64x128xf32> to vector<32x128xf32>
    %cst_28 = arith.constant 0.000000e+00 : f32
    %162 = vector.broadcast %cst_28 : f32 to vector<8x32xf32>
    %cst_29 = arith.constant 0.000000e+00 : f32
    %163 = vector.broadcast %cst_29 : f32 to vector<8x32xf32>
    %164 = vector.extract_strided_slice %12 {offsets = [56, 0], sizes = [8, 128], strides = [1, 1]} : vector<64x128xf32> to vector<8x128xf32>
    %cst_30 = arith.constant dense<0.000000e+00> : vector<8x128xf32>
    %165 = tpu.matmul %162, %161, %cst_30 {dimension_numbers = #tpu.dot_dimension_numbers<[1], [0], [0], [1], [0, 0, 1, 1], [], []>} : vector<8x32xf32>, vector<32x128xf32>, vector<8x128xf32> -> vector<8x128xf32>
    %166 = arith.addf %164, %165 : vector<8x128xf32>
    %167 = arith.negf %166 : vector<8x128xf32>
    %168 = math.exp %167 : vector<8x128xf32>
    %cst_31 = arith.constant 1.000000e+00 : f32
    %169 = vector.broadcast %cst_31 : f32 to vector<8x128xf32>
    %170 = arith.addf %169, %168 : vector<8x128xf32>
    %171 = arith.divf %169, %170 : vector<8x128xf32>
    %172 = math.tanh %166 : vector<8x128xf32>
    %173 = vector.extract_strided_slice %171 {offsets = [0, 32], sizes = [8, 32], strides = [1, 1]} : vector<8x128xf32> to vector<8x32xf32>
    %174 = arith.mulf %173, %163 : vector<8x32xf32>
    %175 = vector.extract_strided_slice %171 {offsets = [0, 0], sizes = [8, 32], strides = [1, 1]} : vector<8x128xf32> to vector<8x32xf32>
    %176 = vector.extract_strided_slice %172 {offsets = [0, 64], sizes = [8, 32], strides = [1, 1]} : vector<8x128xf32> to vector<8x32xf32>
    %177 = arith.mulf %175, %176 : vector<8x32xf32>
    %178 = arith.addf %174, %177 : vector<8x32xf32>
    %179 = vector.extract_strided_slice %171 {offsets = [0, 96], sizes = [8, 32], strides = [1, 1]} : vector<8x128xf32> to vector<8x32xf32>
    %180 = math.tanh %178 : vector<8x32xf32>
    %181 = arith.mulf %179, %180 : vector<8x32xf32>
    %182 = vector.extract_strided_slice %12 {offsets = [48, 0], sizes = [8, 128], strides = [1, 1]} : vector<64x128xf32> to vector<8x128xf32>
    %cst_32 = arith.constant dense<0.000000e+00> : vector<8x128xf32>
    %183 = tpu.matmul %181, %161, %cst_32 {dimension_numbers = #tpu.dot_dimension_numbers<[1], [0], [0], [1], [0, 0, 1, 1], [], []>} : vector<8x32xf32>, vector<32x128xf32>, vector<8x128xf32> -> vector<8x128xf32>
    %184 = arith.addf %182, %183 : vector<8x128xf32>
    %185 = arith.negf %184 : vector<8x128xf32>
    %186 = math.exp %185 : vector<8x128xf32>
    %cst_33 = arith.constant 1.000000e+00 : f32
    %187 = vector.broadcast %cst_33 : f32 to vector<8x128xf32>
    %188 = arith.addf %187, %186 : vector<8x128xf32>
    %189 = arith.divf %187, %188 : vector<8x128xf32>
    %190 = math.tanh %184 : vector<8x128xf32>
    %191 = vector.extract_strided_slice %189 {offsets = [0, 32], sizes = [8, 32], strides = [1, 1]} : vector<8x128xf32> to vector<8x32xf32>
    %192 = arith.mulf %191, %178 : vector<8x32xf32>
    %193 = vector.extract_strided_slice %189 {offsets = [0, 0], sizes = [8, 32], strides = [1, 1]} : vector<8x128xf32> to vector<8x32xf32>
    %194 = vector.extract_strided_slice %190 {offsets = [0, 64], sizes = [8, 32], strides = [1, 1]} : vector<8x128xf32> to vector<8x32xf32>
    %195 = arith.mulf %193, %194 : vector<8x32xf32>
    %196 = arith.addf %192, %195 : vector<8x32xf32>
    %197 = vector.extract_strided_slice %189 {offsets = [0, 96], sizes = [8, 32], strides = [1, 1]} : vector<8x128xf32> to vector<8x32xf32>
    %198 = math.tanh %196 : vector<8x32xf32>
    %199 = arith.mulf %197, %198 : vector<8x32xf32>
    %200 = vector.extract_strided_slice %12 {offsets = [40, 0], sizes = [8, 128], strides = [1, 1]} : vector<64x128xf32> to vector<8x128xf32>
    %cst_34 = arith.constant dense<0.000000e+00> : vector<8x128xf32>
    %201 = tpu.matmul %199, %161, %cst_34 {dimension_numbers = #tpu.dot_dimension_numbers<[1], [0], [0], [1], [0, 0, 1, 1], [], []>} : vector<8x32xf32>, vector<32x128xf32>, vector<8x128xf32> -> vector<8x128xf32>
    %202 = arith.addf %200, %201 : vector<8x128xf32>
    %203 = arith.negf %202 : vector<8x128xf32>
    %204 = math.exp %203 : vector<8x128xf32>
    %cst_35 = arith.constant 1.000000e+00 : f32
    %205 = vector.broadcast %cst_35 : f32 to vector<8x128xf32>
    %206 = arith.addf %205, %204 : vector<8x128xf32>
    %207 = arith.divf %205, %206 : vector<8x128xf32>
    %208 = math.tanh %202 : vector<8x128xf32>
    %209 = vector.extract_strided_slice %207 {offsets = [0, 32], sizes = [8, 32], strides = [1, 1]} : vector<8x128xf32> to vector<8x32xf32>
    %210 = arith.mulf %209, %196 : vector<8x32xf32>
    %211 = vector.extract_strided_slice %207 {offsets = [0, 0], sizes = [8, 32], strides = [1, 1]} : vector<8x128xf32> to vector<8x32xf32>
    %212 = vector.extract_strided_slice %208 {offsets = [0, 64], sizes = [8, 32], strides = [1, 1]} : vector<8x128xf32> to vector<8x32xf32>
    %213 = arith.mulf %211, %212 : vector<8x32xf32>
    %214 = arith.addf %210, %213 : vector<8x32xf32>
    %215 = vector.extract_strided_slice %207 {offsets = [0, 96], sizes = [8, 32], strides = [1, 1]} : vector<8x128xf32> to vector<8x32xf32>
    %216 = math.tanh %214 : vector<8x32xf32>
    %217 = arith.mulf %215, %216 : vector<8x32xf32>
    %218 = vector.extract_strided_slice %12 {offsets = [32, 0], sizes = [8, 128], strides = [1, 1]} : vector<64x128xf32> to vector<8x128xf32>
    %cst_36 = arith.constant dense<0.000000e+00> : vector<8x128xf32>
    %219 = tpu.matmul %217, %161, %cst_36 {dimension_numbers = #tpu.dot_dimension_numbers<[1], [0], [0], [1], [0, 0, 1, 1], [], []>} : vector<8x32xf32>, vector<32x128xf32>, vector<8x128xf32> -> vector<8x128xf32>
    %220 = arith.addf %218, %219 : vector<8x128xf32>
    %221 = arith.negf %220 : vector<8x128xf32>
    %222 = math.exp %221 : vector<8x128xf32>
    %cst_37 = arith.constant 1.000000e+00 : f32
    %223 = vector.broadcast %cst_37 : f32 to vector<8x128xf32>
    %224 = arith.addf %223, %222 : vector<8x128xf32>
    %225 = arith.divf %223, %224 : vector<8x128xf32>
    %226 = math.tanh %220 : vector<8x128xf32>
    %227 = vector.extract_strided_slice %225 {offsets = [0, 32], sizes = [8, 32], strides = [1, 1]} : vector<8x128xf32> to vector<8x32xf32>
    %228 = arith.mulf %227, %214 : vector<8x32xf32>
    %229 = vector.extract_strided_slice %225 {offsets = [0, 0], sizes = [8, 32], strides = [1, 1]} : vector<8x128xf32> to vector<8x32xf32>
    %230 = vector.extract_strided_slice %226 {offsets = [0, 64], sizes = [8, 32], strides = [1, 1]} : vector<8x128xf32> to vector<8x32xf32>
    %231 = arith.mulf %229, %230 : vector<8x32xf32>
    %232 = arith.addf %228, %231 : vector<8x32xf32>
    %233 = vector.extract_strided_slice %225 {offsets = [0, 96], sizes = [8, 32], strides = [1, 1]} : vector<8x128xf32> to vector<8x32xf32>
    %234 = math.tanh %232 : vector<8x32xf32>
    %235 = arith.mulf %233, %234 : vector<8x32xf32>
    %236 = vector.extract_strided_slice %12 {offsets = [24, 0], sizes = [8, 128], strides = [1, 1]} : vector<64x128xf32> to vector<8x128xf32>
    %cst_38 = arith.constant dense<0.000000e+00> : vector<8x128xf32>
    %237 = tpu.matmul %235, %161, %cst_38 {dimension_numbers = #tpu.dot_dimension_numbers<[1], [0], [0], [1], [0, 0, 1, 1], [], []>} : vector<8x32xf32>, vector<32x128xf32>, vector<8x128xf32> -> vector<8x128xf32>
    %238 = arith.addf %236, %237 : vector<8x128xf32>
    %239 = arith.negf %238 : vector<8x128xf32>
    %240 = math.exp %239 : vector<8x128xf32>
    %cst_39 = arith.constant 1.000000e+00 : f32
    %241 = vector.broadcast %cst_39 : f32 to vector<8x128xf32>
    %242 = arith.addf %241, %240 : vector<8x128xf32>
    %243 = arith.divf %241, %242 : vector<8x128xf32>
    %244 = math.tanh %238 : vector<8x128xf32>
    %245 = vector.extract_strided_slice %243 {offsets = [0, 32], sizes = [8, 32], strides = [1, 1]} : vector<8x128xf32> to vector<8x32xf32>
    %246 = arith.mulf %245, %232 : vector<8x32xf32>
    %247 = vector.extract_strided_slice %243 {offsets = [0, 0], sizes = [8, 32], strides = [1, 1]} : vector<8x128xf32> to vector<8x32xf32>
    %248 = vector.extract_strided_slice %244 {offsets = [0, 64], sizes = [8, 32], strides = [1, 1]} : vector<8x128xf32> to vector<8x32xf32>
    %249 = arith.mulf %247, %248 : vector<8x32xf32>
    %250 = arith.addf %246, %249 : vector<8x32xf32>
    %251 = vector.extract_strided_slice %243 {offsets = [0, 96], sizes = [8, 32], strides = [1, 1]} : vector<8x128xf32> to vector<8x32xf32>
    %252 = math.tanh %250 : vector<8x32xf32>
    %253 = arith.mulf %251, %252 : vector<8x32xf32>
    %254 = vector.extract_strided_slice %12 {offsets = [16, 0], sizes = [8, 128], strides = [1, 1]} : vector<64x128xf32> to vector<8x128xf32>
    %cst_40 = arith.constant dense<0.000000e+00> : vector<8x128xf32>
    %255 = tpu.matmul %253, %161, %cst_40 {dimension_numbers = #tpu.dot_dimension_numbers<[1], [0], [0], [1], [0, 0, 1, 1], [], []>} : vector<8x32xf32>, vector<32x128xf32>, vector<8x128xf32> -> vector<8x128xf32>
    %256 = arith.addf %254, %255 : vector<8x128xf32>
    %257 = arith.negf %256 : vector<8x128xf32>
    %258 = math.exp %257 : vector<8x128xf32>
    %cst_41 = arith.constant 1.000000e+00 : f32
    %259 = vector.broadcast %cst_41 : f32 to vector<8x128xf32>
    %260 = arith.addf %259, %258 : vector<8x128xf32>
    %261 = arith.divf %259, %260 : vector<8x128xf32>
    %262 = math.tanh %256 : vector<8x128xf32>
    %263 = vector.extract_strided_slice %261 {offsets = [0, 32], sizes = [8, 32], strides = [1, 1]} : vector<8x128xf32> to vector<8x32xf32>
    %264 = arith.mulf %263, %250 : vector<8x32xf32>
    %265 = vector.extract_strided_slice %261 {offsets = [0, 0], sizes = [8, 32], strides = [1, 1]} : vector<8x128xf32> to vector<8x32xf32>
    %266 = vector.extract_strided_slice %262 {offsets = [0, 64], sizes = [8, 32], strides = [1, 1]} : vector<8x128xf32> to vector<8x32xf32>
    %267 = arith.mulf %265, %266 : vector<8x32xf32>
    %268 = arith.addf %264, %267 : vector<8x32xf32>
    %269 = vector.extract_strided_slice %261 {offsets = [0, 96], sizes = [8, 32], strides = [1, 1]} : vector<8x128xf32> to vector<8x32xf32>
    %270 = math.tanh %268 : vector<8x32xf32>
    %271 = arith.mulf %269, %270 : vector<8x32xf32>
    %272 = vector.extract_strided_slice %12 {offsets = [8, 0], sizes = [8, 128], strides = [1, 1]} : vector<64x128xf32> to vector<8x128xf32>
    %cst_42 = arith.constant dense<0.000000e+00> : vector<8x128xf32>
    %273 = tpu.matmul %271, %161, %cst_42 {dimension_numbers = #tpu.dot_dimension_numbers<[1], [0], [0], [1], [0, 0, 1, 1], [], []>} : vector<8x32xf32>, vector<32x128xf32>, vector<8x128xf32> -> vector<8x128xf32>
    %274 = arith.addf %272, %273 : vector<8x128xf32>
    %275 = arith.negf %274 : vector<8x128xf32>
    %276 = math.exp %275 : vector<8x128xf32>
    %cst_43 = arith.constant 1.000000e+00 : f32
    %277 = vector.broadcast %cst_43 : f32 to vector<8x128xf32>
    %278 = arith.addf %277, %276 : vector<8x128xf32>
    %279 = arith.divf %277, %278 : vector<8x128xf32>
    %280 = math.tanh %274 : vector<8x128xf32>
    %281 = vector.extract_strided_slice %279 {offsets = [0, 32], sizes = [8, 32], strides = [1, 1]} : vector<8x128xf32> to vector<8x32xf32>
    %282 = arith.mulf %281, %268 : vector<8x32xf32>
    %283 = vector.extract_strided_slice %279 {offsets = [0, 0], sizes = [8, 32], strides = [1, 1]} : vector<8x128xf32> to vector<8x32xf32>
    %284 = vector.extract_strided_slice %280 {offsets = [0, 64], sizes = [8, 32], strides = [1, 1]} : vector<8x128xf32> to vector<8x32xf32>
    %285 = arith.mulf %283, %284 : vector<8x32xf32>
    %286 = arith.addf %282, %285 : vector<8x32xf32>
    %287 = vector.extract_strided_slice %279 {offsets = [0, 96], sizes = [8, 32], strides = [1, 1]} : vector<8x128xf32> to vector<8x32xf32>
    %288 = math.tanh %286 : vector<8x32xf32>
    %289 = arith.mulf %287, %288 : vector<8x32xf32>
    %290 = vector.extract_strided_slice %12 {offsets = [0, 0], sizes = [8, 128], strides = [1, 1]} : vector<64x128xf32> to vector<8x128xf32>
    %cst_44 = arith.constant dense<0.000000e+00> : vector<8x128xf32>
    %291 = tpu.matmul %289, %161, %cst_44 {dimension_numbers = #tpu.dot_dimension_numbers<[1], [0], [0], [1], [0, 0, 1, 1], [], []>} : vector<8x32xf32>, vector<32x128xf32>, vector<8x128xf32> -> vector<8x128xf32>
    %292 = arith.addf %290, %291 : vector<8x128xf32>
    %293 = arith.negf %292 : vector<8x128xf32>
    %294 = math.exp %293 : vector<8x128xf32>
    %cst_45 = arith.constant 1.000000e+00 : f32
    %295 = vector.broadcast %cst_45 : f32 to vector<8x128xf32>
    %296 = arith.addf %295, %294 : vector<8x128xf32>
    %297 = arith.divf %295, %296 : vector<8x128xf32>
    %298 = math.tanh %292 : vector<8x128xf32>
    %299 = vector.extract_strided_slice %297 {offsets = [0, 32], sizes = [8, 32], strides = [1, 1]} : vector<8x128xf32> to vector<8x32xf32>
    %300 = arith.mulf %299, %286 : vector<8x32xf32>
    %301 = vector.extract_strided_slice %297 {offsets = [0, 0], sizes = [8, 32], strides = [1, 1]} : vector<8x128xf32> to vector<8x32xf32>
    %302 = vector.extract_strided_slice %298 {offsets = [0, 64], sizes = [8, 32], strides = [1, 1]} : vector<8x128xf32> to vector<8x32xf32>
    %303 = arith.mulf %301, %302 : vector<8x32xf32>
    %304 = arith.addf %300, %303 : vector<8x32xf32>
    %305 = vector.extract_strided_slice %297 {offsets = [0, 96], sizes = [8, 32], strides = [1, 1]} : vector<8x128xf32> to vector<8x32xf32>
    %306 = math.tanh %304 : vector<8x32xf32>
    %307 = arith.mulf %305, %306 : vector<8x32xf32>
    %308 = tpu.concatenate %307, %289, %271, %253, %235, %217, %199, %181 in 0 : vector<8x32xf32>, vector<8x32xf32>, vector<8x32xf32>, vector<8x32xf32>, vector<8x32xf32>, vector<8x32xf32>, vector<8x32xf32>, vector<8x32xf32> -> vector<64x32xf32>
    %c0_46 = arith.constant 0 : index
    %c0_47 = arith.constant 0 : index
    %309 = vector.load %arg5[%c0_46, %c0_47] : memref<96x128xf32, #tpu.memory_space<vmem>>, vector<96x128xf32>
    %c0_48 = arith.constant 0 : index
    %c0_49 = arith.constant 0 : index
    %310 = vector.load %arg7[%c0_48, %c0_49] : memref<96x128xf32, #tpu.memory_space<vmem>>, vector<96x128xf32>
    %311 = vector.extract_strided_slice %309 {offsets = [0, 0], sizes = [32, 128], strides = [1, 1]} : vector<96x128xf32> to vector<32x128xf32>
    %cst_50 = arith.constant dense<0.000000e+00> : vector<64x128xf32>
    %312 = tpu.matmul %160, %311, %cst_50 {dimension_numbers = #tpu.dot_dimension_numbers<[1], [0], [0], [1], [0, 0, 1, 1], [], []>} : vector<64x32xf32>, vector<32x128xf32>, vector<64x128xf32> -> vector<64x128xf32>
    %313 = vector.extract_strided_slice %309 {offsets = [32, 0], sizes = [32, 128], strides = [1, 1]} : vector<96x128xf32> to vector<32x128xf32>
    %cst_51 = arith.constant dense<0.000000e+00> : vector<64x128xf32>
    %314 = tpu.matmul %308, %313, %cst_51 {dimension_numbers = #tpu.dot_dimension_numbers<[1], [0], [0], [1], [0, 0, 1, 1], [], []>} : vector<64x32xf32>, vector<32x128xf32>, vector<64x128xf32> -> vector<64x128xf32>
    %315 = arith.addf %312, %314 : vector<64x128xf32>
    %c0_52 = arith.constant 0 : index
    %c0_53 = arith.constant 0 : index
    %316 = vector.load %arg6[%c0_52, %c0_53] : memref<1x128xf32, #tpu.memory_space<vmem>>, vector<1x128xf32>
    %317 = vector.broadcast %316 : vector<1x128xf32> to vector<64x128xf32>
    %318 = arith.addf %315, %317 : vector<64x128xf32>
    %319 = vector.extract_strided_slice %310 {offsets = [0, 0], sizes = [32, 128], strides = [1, 1]} : vector<96x128xf32> to vector<32x128xf32>
    %cst_54 = arith.constant dense<0.000000e+00> : vector<64x128xf32>
    %320 = tpu.matmul %160, %319, %cst_54 {dimension_numbers = #tpu.dot_dimension_numbers<[1], [0], [0], [1], [0, 0, 1, 1], [], []>} : vector<64x32xf32>, vector<32x128xf32>, vector<64x128xf32> -> vector<64x128xf32>
    %321 = vector.extract_strided_slice %310 {offsets = [32, 0], sizes = [32, 128], strides = [1, 1]} : vector<96x128xf32> to vector<32x128xf32>
    %cst_55 = arith.constant dense<0.000000e+00> : vector<64x128xf32>
    %322 = tpu.matmul %308, %321, %cst_55 {dimension_numbers = #tpu.dot_dimension_numbers<[1], [0], [0], [1], [0, 0, 1, 1], [], []>} : vector<64x32xf32>, vector<32x128xf32>, vector<64x128xf32> -> vector<64x128xf32>
    %323 = arith.addf %320, %322 : vector<64x128xf32>
    %c0_56 = arith.constant 0 : index
    %c0_57 = arith.constant 0 : index
    %324 = vector.load %arg8[%c0_56, %c0_57] : memref<1x128xf32, #tpu.memory_space<vmem>>, vector<1x128xf32>
    %325 = vector.broadcast %324 : vector<1x128xf32> to vector<64x128xf32>
    %326 = arith.addf %323, %325 : vector<64x128xf32>
    %327 = vector.extract_strided_slice %309 {offsets = [64, 0], sizes = [32, 128], strides = [1, 1]} : vector<96x128xf32> to vector<32x128xf32>
    %cst_58 = arith.constant 0.000000e+00 : f32
    %328 = vector.broadcast %cst_58 : f32 to vector<8x32xf32>
    %cst_59 = arith.constant 0.000000e+00 : f32
    %329 = vector.broadcast %cst_59 : f32 to vector<8x32xf32>
    %330 = vector.extract_strided_slice %318 {offsets = [0, 0], sizes = [8, 128], strides = [1, 1]} : vector<64x128xf32> to vector<8x128xf32>
    %cst_60 = arith.constant dense<0.000000e+00> : vector<8x128xf32>
    %331 = tpu.matmul %328, %327, %cst_60 {dimension_numbers = #tpu.dot_dimension_numbers<[1], [0], [0], [1], [0, 0, 1, 1], [], []>} : vector<8x32xf32>, vector<32x128xf32>, vector<8x128xf32> -> vector<8x128xf32>
    %332 = arith.addf %330, %331 : vector<8x128xf32>
    %333 = arith.negf %332 : vector<8x128xf32>
    %334 = math.exp %333 : vector<8x128xf32>
    %cst_61 = arith.constant 1.000000e+00 : f32
    %335 = vector.broadcast %cst_61 : f32 to vector<8x128xf32>
    %336 = arith.addf %335, %334 : vector<8x128xf32>
    %337 = arith.divf %335, %336 : vector<8x128xf32>
    %338 = math.tanh %332 : vector<8x128xf32>
    %339 = vector.extract_strided_slice %337 {offsets = [0, 32], sizes = [8, 32], strides = [1, 1]} : vector<8x128xf32> to vector<8x32xf32>
    %340 = arith.mulf %339, %329 : vector<8x32xf32>
    %341 = vector.extract_strided_slice %337 {offsets = [0, 0], sizes = [8, 32], strides = [1, 1]} : vector<8x128xf32> to vector<8x32xf32>
    %342 = vector.extract_strided_slice %338 {offsets = [0, 64], sizes = [8, 32], strides = [1, 1]} : vector<8x128xf32> to vector<8x32xf32>
    %343 = arith.mulf %341, %342 : vector<8x32xf32>
    %344 = arith.addf %340, %343 : vector<8x32xf32>
    %345 = vector.extract_strided_slice %337 {offsets = [0, 96], sizes = [8, 32], strides = [1, 1]} : vector<8x128xf32> to vector<8x32xf32>
    %346 = math.tanh %344 : vector<8x32xf32>
    %347 = arith.mulf %345, %346 : vector<8x32xf32>
    %348 = vector.extract_strided_slice %318 {offsets = [8, 0], sizes = [8, 128], strides = [1, 1]} : vector<64x128xf32> to vector<8x128xf32>
    %cst_62 = arith.constant dense<0.000000e+00> : vector<8x128xf32>
    %349 = tpu.matmul %347, %327, %cst_62 {dimension_numbers = #tpu.dot_dimension_numbers<[1], [0], [0], [1], [0, 0, 1, 1], [], []>} : vector<8x32xf32>, vector<32x128xf32>, vector<8x128xf32> -> vector<8x128xf32>
    %350 = arith.addf %348, %349 : vector<8x128xf32>
    %351 = arith.negf %350 : vector<8x128xf32>
    %352 = math.exp %351 : vector<8x128xf32>
    %cst_63 = arith.constant 1.000000e+00 : f32
    %353 = vector.broadcast %cst_63 : f32 to vector<8x128xf32>
    %354 = arith.addf %353, %352 : vector<8x128xf32>
    %355 = arith.divf %353, %354 : vector<8x128xf32>
    %356 = math.tanh %350 : vector<8x128xf32>
    %357 = vector.extract_strided_slice %355 {offsets = [0, 32], sizes = [8, 32], strides = [1, 1]} : vector<8x128xf32> to vector<8x32xf32>
    %358 = arith.mulf %357, %344 : vector<8x32xf32>
    %359 = vector.extract_strided_slice %355 {offsets = [0, 0], sizes = [8, 32], strides = [1, 1]} : vector<8x128xf32> to vector<8x32xf32>
    %360 = vector.extract_strided_slice %356 {offsets = [0, 64], sizes = [8, 32], strides = [1, 1]} : vector<8x128xf32> to vector<8x32xf32>
    %361 = arith.mulf %359, %360 : vector<8x32xf32>
    %362 = arith.addf %358, %361 : vector<8x32xf32>
    %363 = vector.extract_strided_slice %355 {offsets = [0, 96], sizes = [8, 32], strides = [1, 1]} : vector<8x128xf32> to vector<8x32xf32>
    %364 = math.tanh %362 : vector<8x32xf32>
    %365 = arith.mulf %363, %364 : vector<8x32xf32>
    %366 = vector.extract_strided_slice %318 {offsets = [16, 0], sizes = [8, 128], strides = [1, 1]} : vector<64x128xf32> to vector<8x128xf32>
    %cst_64 = arith.constant dense<0.000000e+00> : vector<8x128xf32>
    %367 = tpu.matmul %365, %327, %cst_64 {dimension_numbers = #tpu.dot_dimension_numbers<[1], [0], [0], [1], [0, 0, 1, 1], [], []>} : vector<8x32xf32>, vector<32x128xf32>, vector<8x128xf32> -> vector<8x128xf32>
    %368 = arith.addf %366, %367 : vector<8x128xf32>
    %369 = arith.negf %368 : vector<8x128xf32>
    %370 = math.exp %369 : vector<8x128xf32>
    %cst_65 = arith.constant 1.000000e+00 : f32
    %371 = vector.broadcast %cst_65 : f32 to vector<8x128xf32>
    %372 = arith.addf %371, %370 : vector<8x128xf32>
    %373 = arith.divf %371, %372 : vector<8x128xf32>
    %374 = math.tanh %368 : vector<8x128xf32>
    %375 = vector.extract_strided_slice %373 {offsets = [0, 32], sizes = [8, 32], strides = [1, 1]} : vector<8x128xf32> to vector<8x32xf32>
    %376 = arith.mulf %375, %362 : vector<8x32xf32>
    %377 = vector.extract_strided_slice %373 {offsets = [0, 0], sizes = [8, 32], strides = [1, 1]} : vector<8x128xf32> to vector<8x32xf32>
    %378 = vector.extract_strided_slice %374 {offsets = [0, 64], sizes = [8, 32], strides = [1, 1]} : vector<8x128xf32> to vector<8x32xf32>
    %379 = arith.mulf %377, %378 : vector<8x32xf32>
    %380 = arith.addf %376, %379 : vector<8x32xf32>
    %381 = vector.extract_strided_slice %373 {offsets = [0, 96], sizes = [8, 32], strides = [1, 1]} : vector<8x128xf32> to vector<8x32xf32>
    %382 = math.tanh %380 : vector<8x32xf32>
    %383 = arith.mulf %381, %382 : vector<8x32xf32>
    %384 = vector.extract_strided_slice %318 {offsets = [24, 0], sizes = [8, 128], strides = [1, 1]} : vector<64x128xf32> to vector<8x128xf32>
    %cst_66 = arith.constant dense<0.000000e+00> : vector<8x128xf32>
    %385 = tpu.matmul %383, %327, %cst_66 {dimension_numbers = #tpu.dot_dimension_numbers<[1], [0], [0], [1], [0, 0, 1, 1], [], []>} : vector<8x32xf32>, vector<32x128xf32>, vector<8x128xf32> -> vector<8x128xf32>
    %386 = arith.addf %384, %385 : vector<8x128xf32>
    %387 = arith.negf %386 : vector<8x128xf32>
    %388 = math.exp %387 : vector<8x128xf32>
    %cst_67 = arith.constant 1.000000e+00 : f32
    %389 = vector.broadcast %cst_67 : f32 to vector<8x128xf32>
    %390 = arith.addf %389, %388 : vector<8x128xf32>
    %391 = arith.divf %389, %390 : vector<8x128xf32>
    %392 = math.tanh %386 : vector<8x128xf32>
    %393 = vector.extract_strided_slice %391 {offsets = [0, 32], sizes = [8, 32], strides = [1, 1]} : vector<8x128xf32> to vector<8x32xf32>
    %394 = arith.mulf %393, %380 : vector<8x32xf32>
    %395 = vector.extract_strided_slice %391 {offsets = [0, 0], sizes = [8, 32], strides = [1, 1]} : vector<8x128xf32> to vector<8x32xf32>
    %396 = vector.extract_strided_slice %392 {offsets = [0, 64], sizes = [8, 32], strides = [1, 1]} : vector<8x128xf32> to vector<8x32xf32>
    %397 = arith.mulf %395, %396 : vector<8x32xf32>
    %398 = arith.addf %394, %397 : vector<8x32xf32>
    %399 = vector.extract_strided_slice %391 {offsets = [0, 96], sizes = [8, 32], strides = [1, 1]} : vector<8x128xf32> to vector<8x32xf32>
    %400 = math.tanh %398 : vector<8x32xf32>
    %401 = arith.mulf %399, %400 : vector<8x32xf32>
    %402 = vector.extract_strided_slice %318 {offsets = [32, 0], sizes = [8, 128], strides = [1, 1]} : vector<64x128xf32> to vector<8x128xf32>
    %cst_68 = arith.constant dense<0.000000e+00> : vector<8x128xf32>
    %403 = tpu.matmul %401, %327, %cst_68 {dimension_numbers = #tpu.dot_dimension_numbers<[1], [0], [0], [1], [0, 0, 1, 1], [], []>} : vector<8x32xf32>, vector<32x128xf32>, vector<8x128xf32> -> vector<8x128xf32>
    %404 = arith.addf %402, %403 : vector<8x128xf32>
    %405 = arith.negf %404 : vector<8x128xf32>
    %406 = math.exp %405 : vector<8x128xf32>
    %cst_69 = arith.constant 1.000000e+00 : f32
    %407 = vector.broadcast %cst_69 : f32 to vector<8x128xf32>
    %408 = arith.addf %407, %406 : vector<8x128xf32>
    %409 = arith.divf %407, %408 : vector<8x128xf32>
    %410 = math.tanh %404 : vector<8x128xf32>
    %411 = vector.extract_strided_slice %409 {offsets = [0, 32], sizes = [8, 32], strides = [1, 1]} : vector<8x128xf32> to vector<8x32xf32>
    %412 = arith.mulf %411, %398 : vector<8x32xf32>
    %413 = vector.extract_strided_slice %409 {offsets = [0, 0], sizes = [8, 32], strides = [1, 1]} : vector<8x128xf32> to vector<8x32xf32>
    %414 = vector.extract_strided_slice %410 {offsets = [0, 64], sizes = [8, 32], strides = [1, 1]} : vector<8x128xf32> to vector<8x32xf32>
    %415 = arith.mulf %413, %414 : vector<8x32xf32>
    %416 = arith.addf %412, %415 : vector<8x32xf32>
    %417 = vector.extract_strided_slice %409 {offsets = [0, 96], sizes = [8, 32], strides = [1, 1]} : vector<8x128xf32> to vector<8x32xf32>
    %418 = math.tanh %416 : vector<8x32xf32>
    %419 = arith.mulf %417, %418 : vector<8x32xf32>
    %420 = vector.extract_strided_slice %318 {offsets = [40, 0], sizes = [8, 128], strides = [1, 1]} : vector<64x128xf32> to vector<8x128xf32>
    %cst_70 = arith.constant dense<0.000000e+00> : vector<8x128xf32>
    %421 = tpu.matmul %419, %327, %cst_70 {dimension_numbers = #tpu.dot_dimension_numbers<[1], [0], [0], [1], [0, 0, 1, 1], [], []>} : vector<8x32xf32>, vector<32x128xf32>, vector<8x128xf32> -> vector<8x128xf32>
    %422 = arith.addf %420, %421 : vector<8x128xf32>
    %423 = arith.negf %422 : vector<8x128xf32>
    %424 = math.exp %423 : vector<8x128xf32>
    %cst_71 = arith.constant 1.000000e+00 : f32
    %425 = vector.broadcast %cst_71 : f32 to vector<8x128xf32>
    %426 = arith.addf %425, %424 : vector<8x128xf32>
    %427 = arith.divf %425, %426 : vector<8x128xf32>
    %428 = math.tanh %422 : vector<8x128xf32>
    %429 = vector.extract_strided_slice %427 {offsets = [0, 32], sizes = [8, 32], strides = [1, 1]} : vector<8x128xf32> to vector<8x32xf32>
    %430 = arith.mulf %429, %416 : vector<8x32xf32>
    %431 = vector.extract_strided_slice %427 {offsets = [0, 0], sizes = [8, 32], strides = [1, 1]} : vector<8x128xf32> to vector<8x32xf32>
    %432 = vector.extract_strided_slice %428 {offsets = [0, 64], sizes = [8, 32], strides = [1, 1]} : vector<8x128xf32> to vector<8x32xf32>
    %433 = arith.mulf %431, %432 : vector<8x32xf32>
    %434 = arith.addf %430, %433 : vector<8x32xf32>
    %435 = vector.extract_strided_slice %427 {offsets = [0, 96], sizes = [8, 32], strides = [1, 1]} : vector<8x128xf32> to vector<8x32xf32>
    %436 = math.tanh %434 : vector<8x32xf32>
    %437 = arith.mulf %435, %436 : vector<8x32xf32>
    %438 = vector.extract_strided_slice %318 {offsets = [48, 0], sizes = [8, 128], strides = [1, 1]} : vector<64x128xf32> to vector<8x128xf32>
    %cst_72 = arith.constant dense<0.000000e+00> : vector<8x128xf32>
    %439 = tpu.matmul %437, %327, %cst_72 {dimension_numbers = #tpu.dot_dimension_numbers<[1], [0], [0], [1], [0, 0, 1, 1], [], []>} : vector<8x32xf32>, vector<32x128xf32>, vector<8x128xf32> -> vector<8x128xf32>
    %440 = arith.addf %438, %439 : vector<8x128xf32>
    %441 = arith.negf %440 : vector<8x128xf32>
    %442 = math.exp %441 : vector<8x128xf32>
    %cst_73 = arith.constant 1.000000e+00 : f32
    %443 = vector.broadcast %cst_73 : f32 to vector<8x128xf32>
    %444 = arith.addf %443, %442 : vector<8x128xf32>
    %445 = arith.divf %443, %444 : vector<8x128xf32>
    %446 = math.tanh %440 : vector<8x128xf32>
    %447 = vector.extract_strided_slice %445 {offsets = [0, 32], sizes = [8, 32], strides = [1, 1]} : vector<8x128xf32> to vector<8x32xf32>
    %448 = arith.mulf %447, %434 : vector<8x32xf32>
    %449 = vector.extract_strided_slice %445 {offsets = [0, 0], sizes = [8, 32], strides = [1, 1]} : vector<8x128xf32> to vector<8x32xf32>
    %450 = vector.extract_strided_slice %446 {offsets = [0, 64], sizes = [8, 32], strides = [1, 1]} : vector<8x128xf32> to vector<8x32xf32>
    %451 = arith.mulf %449, %450 : vector<8x32xf32>
    %452 = arith.addf %448, %451 : vector<8x32xf32>
    %453 = vector.extract_strided_slice %445 {offsets = [0, 96], sizes = [8, 32], strides = [1, 1]} : vector<8x128xf32> to vector<8x32xf32>
    %454 = math.tanh %452 : vector<8x32xf32>
    %455 = arith.mulf %453, %454 : vector<8x32xf32>
    %456 = vector.extract_strided_slice %318 {offsets = [56, 0], sizes = [8, 128], strides = [1, 1]} : vector<64x128xf32> to vector<8x128xf32>
    %cst_74 = arith.constant dense<0.000000e+00> : vector<8x128xf32>
    %457 = tpu.matmul %455, %327, %cst_74 {dimension_numbers = #tpu.dot_dimension_numbers<[1], [0], [0], [1], [0, 0, 1, 1], [], []>} : vector<8x32xf32>, vector<32x128xf32>, vector<8x128xf32> -> vector<8x128xf32>
    %458 = arith.addf %456, %457 : vector<8x128xf32>
    %459 = arith.negf %458 : vector<8x128xf32>
    %460 = math.exp %459 : vector<8x128xf32>
    %cst_75 = arith.constant 1.000000e+00 : f32
    %461 = vector.broadcast %cst_75 : f32 to vector<8x128xf32>
    %462 = arith.addf %461, %460 : vector<8x128xf32>
    %463 = arith.divf %461, %462 : vector<8x128xf32>
    %464 = math.tanh %458 : vector<8x128xf32>
    %465 = vector.extract_strided_slice %463 {offsets = [0, 32], sizes = [8, 32], strides = [1, 1]} : vector<8x128xf32> to vector<8x32xf32>
    %466 = arith.mulf %465, %452 : vector<8x32xf32>
    %467 = vector.extract_strided_slice %463 {offsets = [0, 0], sizes = [8, 32], strides = [1, 1]} : vector<8x128xf32> to vector<8x32xf32>
    %468 = vector.extract_strided_slice %464 {offsets = [0, 64], sizes = [8, 32], strides = [1, 1]} : vector<8x128xf32> to vector<8x32xf32>
    %469 = arith.mulf %467, %468 : vector<8x32xf32>
    %470 = arith.addf %466, %469 : vector<8x32xf32>
    %471 = vector.extract_strided_slice %463 {offsets = [0, 96], sizes = [8, 32], strides = [1, 1]} : vector<8x128xf32> to vector<8x32xf32>
    %472 = math.tanh %470 : vector<8x32xf32>
    %473 = arith.mulf %471, %472 : vector<8x32xf32>
    %474 = tpu.concatenate %347, %365, %383, %401, %419, %437, %455, %473 in 0 : vector<8x32xf32>, vector<8x32xf32>, vector<8x32xf32>, vector<8x32xf32>, vector<8x32xf32>, vector<8x32xf32>, vector<8x32xf32>, vector<8x32xf32> -> vector<64x32xf32>
    %475 = vector.extract_strided_slice %310 {offsets = [64, 0], sizes = [32, 128], strides = [1, 1]} : vector<96x128xf32> to vector<32x128xf32>
    %cst_76 = arith.constant 0.000000e+00 : f32
    %476 = vector.broadcast %cst_76 : f32 to vector<8x32xf32>
    %cst_77 = arith.constant 0.000000e+00 : f32
    %477 = vector.broadcast %cst_77 : f32 to vector<8x32xf32>
    %478 = vector.extract_strided_slice %326 {offsets = [56, 0], sizes = [8, 128], strides = [1, 1]} : vector<64x128xf32> to vector<8x128xf32>
    %cst_78 = arith.constant dense<0.000000e+00> : vector<8x128xf32>
    %479 = tpu.matmul %476, %475, %cst_78 {dimension_numbers = #tpu.dot_dimension_numbers<[1], [0], [0], [1], [0, 0, 1, 1], [], []>} : vector<8x32xf32>, vector<32x128xf32>, vector<8x128xf32> -> vector<8x128xf32>
    %480 = arith.addf %478, %479 : vector<8x128xf32>
    %481 = arith.negf %480 : vector<8x128xf32>
    %482 = math.exp %481 : vector<8x128xf32>
    %cst_79 = arith.constant 1.000000e+00 : f32
    %483 = vector.broadcast %cst_79 : f32 to vector<8x128xf32>
    %484 = arith.addf %483, %482 : vector<8x128xf32>
    %485 = arith.divf %483, %484 : vector<8x128xf32>
    %486 = math.tanh %480 : vector<8x128xf32>
    %487 = vector.extract_strided_slice %485 {offsets = [0, 32], sizes = [8, 32], strides = [1, 1]} : vector<8x128xf32> to vector<8x32xf32>
    %488 = arith.mulf %487, %477 : vector<8x32xf32>
    %489 = vector.extract_strided_slice %485 {offsets = [0, 0], sizes = [8, 32], strides = [1, 1]} : vector<8x128xf32> to vector<8x32xf32>
    %490 = vector.extract_strided_slice %486 {offsets = [0, 64], sizes = [8, 32], strides = [1, 1]} : vector<8x128xf32> to vector<8x32xf32>
    %491 = arith.mulf %489, %490 : vector<8x32xf32>
    %492 = arith.addf %488, %491 : vector<8x32xf32>
    %493 = vector.extract_strided_slice %485 {offsets = [0, 96], sizes = [8, 32], strides = [1, 1]} : vector<8x128xf32> to vector<8x32xf32>
    %494 = math.tanh %492 : vector<8x32xf32>
    %495 = arith.mulf %493, %494 : vector<8x32xf32>
    %496 = vector.extract_strided_slice %326 {offsets = [48, 0], sizes = [8, 128], strides = [1, 1]} : vector<64x128xf32> to vector<8x128xf32>
    %cst_80 = arith.constant dense<0.000000e+00> : vector<8x128xf32>
    %497 = tpu.matmul %495, %475, %cst_80 {dimension_numbers = #tpu.dot_dimension_numbers<[1], [0], [0], [1], [0, 0, 1, 1], [], []>} : vector<8x32xf32>, vector<32x128xf32>, vector<8x128xf32> -> vector<8x128xf32>
    %498 = arith.addf %496, %497 : vector<8x128xf32>
    %499 = arith.negf %498 : vector<8x128xf32>
    %500 = math.exp %499 : vector<8x128xf32>
    %cst_81 = arith.constant 1.000000e+00 : f32
    %501 = vector.broadcast %cst_81 : f32 to vector<8x128xf32>
    %502 = arith.addf %501, %500 : vector<8x128xf32>
    %503 = arith.divf %501, %502 : vector<8x128xf32>
    %504 = math.tanh %498 : vector<8x128xf32>
    %505 = vector.extract_strided_slice %503 {offsets = [0, 32], sizes = [8, 32], strides = [1, 1]} : vector<8x128xf32> to vector<8x32xf32>
    %506 = arith.mulf %505, %492 : vector<8x32xf32>
    %507 = vector.extract_strided_slice %503 {offsets = [0, 0], sizes = [8, 32], strides = [1, 1]} : vector<8x128xf32> to vector<8x32xf32>
    %508 = vector.extract_strided_slice %504 {offsets = [0, 64], sizes = [8, 32], strides = [1, 1]} : vector<8x128xf32> to vector<8x32xf32>
    %509 = arith.mulf %507, %508 : vector<8x32xf32>
    %510 = arith.addf %506, %509 : vector<8x32xf32>
    %511 = vector.extract_strided_slice %503 {offsets = [0, 96], sizes = [8, 32], strides = [1, 1]} : vector<8x128xf32> to vector<8x32xf32>
    %512 = math.tanh %510 : vector<8x32xf32>
    %513 = arith.mulf %511, %512 : vector<8x32xf32>
    %514 = vector.extract_strided_slice %326 {offsets = [40, 0], sizes = [8, 128], strides = [1, 1]} : vector<64x128xf32> to vector<8x128xf32>
    %cst_82 = arith.constant dense<0.000000e+00> : vector<8x128xf32>
    %515 = tpu.matmul %513, %475, %cst_82 {dimension_numbers = #tpu.dot_dimension_numbers<[1], [0], [0], [1], [0, 0, 1, 1], [], []>} : vector<8x32xf32>, vector<32x128xf32>, vector<8x128xf32> -> vector<8x128xf32>
    %516 = arith.addf %514, %515 : vector<8x128xf32>
    %517 = arith.negf %516 : vector<8x128xf32>
    %518 = math.exp %517 : vector<8x128xf32>
    %cst_83 = arith.constant 1.000000e+00 : f32
    %519 = vector.broadcast %cst_83 : f32 to vector<8x128xf32>
    %520 = arith.addf %519, %518 : vector<8x128xf32>
    %521 = arith.divf %519, %520 : vector<8x128xf32>
    %522 = math.tanh %516 : vector<8x128xf32>
    %523 = vector.extract_strided_slice %521 {offsets = [0, 32], sizes = [8, 32], strides = [1, 1]} : vector<8x128xf32> to vector<8x32xf32>
    %524 = arith.mulf %523, %510 : vector<8x32xf32>
    %525 = vector.extract_strided_slice %521 {offsets = [0, 0], sizes = [8, 32], strides = [1, 1]} : vector<8x128xf32> to vector<8x32xf32>
    %526 = vector.extract_strided_slice %522 {offsets = [0, 64], sizes = [8, 32], strides = [1, 1]} : vector<8x128xf32> to vector<8x32xf32>
    %527 = arith.mulf %525, %526 : vector<8x32xf32>
    %528 = arith.addf %524, %527 : vector<8x32xf32>
    %529 = vector.extract_strided_slice %521 {offsets = [0, 96], sizes = [8, 32], strides = [1, 1]} : vector<8x128xf32> to vector<8x32xf32>
    %530 = math.tanh %528 : vector<8x32xf32>
    %531 = arith.mulf %529, %530 : vector<8x32xf32>
    %532 = vector.extract_strided_slice %326 {offsets = [32, 0], sizes = [8, 128], strides = [1, 1]} : vector<64x128xf32> to vector<8x128xf32>
    %cst_84 = arith.constant dense<0.000000e+00> : vector<8x128xf32>
    %533 = tpu.matmul %531, %475, %cst_84 {dimension_numbers = #tpu.dot_dimension_numbers<[1], [0], [0], [1], [0, 0, 1, 1], [], []>} : vector<8x32xf32>, vector<32x128xf32>, vector<8x128xf32> -> vector<8x128xf32>
    %534 = arith.addf %532, %533 : vector<8x128xf32>
    %535 = arith.negf %534 : vector<8x128xf32>
    %536 = math.exp %535 : vector<8x128xf32>
    %cst_85 = arith.constant 1.000000e+00 : f32
    %537 = vector.broadcast %cst_85 : f32 to vector<8x128xf32>
    %538 = arith.addf %537, %536 : vector<8x128xf32>
    %539 = arith.divf %537, %538 : vector<8x128xf32>
    %540 = math.tanh %534 : vector<8x128xf32>
    %541 = vector.extract_strided_slice %539 {offsets = [0, 32], sizes = [8, 32], strides = [1, 1]} : vector<8x128xf32> to vector<8x32xf32>
    %542 = arith.mulf %541, %528 : vector<8x32xf32>
    %543 = vector.extract_strided_slice %539 {offsets = [0, 0], sizes = [8, 32], strides = [1, 1]} : vector<8x128xf32> to vector<8x32xf32>
    %544 = vector.extract_strided_slice %540 {offsets = [0, 64], sizes = [8, 32], strides = [1, 1]} : vector<8x128xf32> to vector<8x32xf32>
    %545 = arith.mulf %543, %544 : vector<8x32xf32>
    %546 = arith.addf %542, %545 : vector<8x32xf32>
    %547 = vector.extract_strided_slice %539 {offsets = [0, 96], sizes = [8, 32], strides = [1, 1]} : vector<8x128xf32> to vector<8x32xf32>
    %548 = math.tanh %546 : vector<8x32xf32>
    %549 = arith.mulf %547, %548 : vector<8x32xf32>
    %550 = vector.extract_strided_slice %326 {offsets = [24, 0], sizes = [8, 128], strides = [1, 1]} : vector<64x128xf32> to vector<8x128xf32>
    %cst_86 = arith.constant dense<0.000000e+00> : vector<8x128xf32>
    %551 = tpu.matmul %549, %475, %cst_86 {dimension_numbers = #tpu.dot_dimension_numbers<[1], [0], [0], [1], [0, 0, 1, 1], [], []>} : vector<8x32xf32>, vector<32x128xf32>, vector<8x128xf32> -> vector<8x128xf32>
    %552 = arith.addf %550, %551 : vector<8x128xf32>
    %553 = arith.negf %552 : vector<8x128xf32>
    %554 = math.exp %553 : vector<8x128xf32>
    %cst_87 = arith.constant 1.000000e+00 : f32
    %555 = vector.broadcast %cst_87 : f32 to vector<8x128xf32>
    %556 = arith.addf %555, %554 : vector<8x128xf32>
    %557 = arith.divf %555, %556 : vector<8x128xf32>
    %558 = math.tanh %552 : vector<8x128xf32>
    %559 = vector.extract_strided_slice %557 {offsets = [0, 32], sizes = [8, 32], strides = [1, 1]} : vector<8x128xf32> to vector<8x32xf32>
    %560 = arith.mulf %559, %546 : vector<8x32xf32>
    %561 = vector.extract_strided_slice %557 {offsets = [0, 0], sizes = [8, 32], strides = [1, 1]} : vector<8x128xf32> to vector<8x32xf32>
    %562 = vector.extract_strided_slice %558 {offsets = [0, 64], sizes = [8, 32], strides = [1, 1]} : vector<8x128xf32> to vector<8x32xf32>
    %563 = arith.mulf %561, %562 : vector<8x32xf32>
    %564 = arith.addf %560, %563 : vector<8x32xf32>
    %565 = vector.extract_strided_slice %557 {offsets = [0, 96], sizes = [8, 32], strides = [1, 1]} : vector<8x128xf32> to vector<8x32xf32>
    %566 = math.tanh %564 : vector<8x32xf32>
    %567 = arith.mulf %565, %566 : vector<8x32xf32>
    %568 = vector.extract_strided_slice %326 {offsets = [16, 0], sizes = [8, 128], strides = [1, 1]} : vector<64x128xf32> to vector<8x128xf32>
    %cst_88 = arith.constant dense<0.000000e+00> : vector<8x128xf32>
    %569 = tpu.matmul %567, %475, %cst_88 {dimension_numbers = #tpu.dot_dimension_numbers<[1], [0], [0], [1], [0, 0, 1, 1], [], []>} : vector<8x32xf32>, vector<32x128xf32>, vector<8x128xf32> -> vector<8x128xf32>
    %570 = arith.addf %568, %569 : vector<8x128xf32>
    %571 = arith.negf %570 : vector<8x128xf32>
    %572 = math.exp %571 : vector<8x128xf32>
    %cst_89 = arith.constant 1.000000e+00 : f32
    %573 = vector.broadcast %cst_89 : f32 to vector<8x128xf32>
    %574 = arith.addf %573, %572 : vector<8x128xf32>
    %575 = arith.divf %573, %574 : vector<8x128xf32>
    %576 = math.tanh %570 : vector<8x128xf32>
    %577 = vector.extract_strided_slice %575 {offsets = [0, 32], sizes = [8, 32], strides = [1, 1]} : vector<8x128xf32> to vector<8x32xf32>
    %578 = arith.mulf %577, %564 : vector<8x32xf32>
    %579 = vector.extract_strided_slice %575 {offsets = [0, 0], sizes = [8, 32], strides = [1, 1]} : vector<8x128xf32> to vector<8x32xf32>
    %580 = vector.extract_strided_slice %576 {offsets = [0, 64], sizes = [8, 32], strides = [1, 1]} : vector<8x128xf32> to vector<8x32xf32>
    %581 = arith.mulf %579, %580 : vector<8x32xf32>
    %582 = arith.addf %578, %581 : vector<8x32xf32>
    %583 = vector.extract_strided_slice %575 {offsets = [0, 96], sizes = [8, 32], strides = [1, 1]} : vector<8x128xf32> to vector<8x32xf32>
    %584 = math.tanh %582 : vector<8x32xf32>
    %585 = arith.mulf %583, %584 : vector<8x32xf32>
    %586 = vector.extract_strided_slice %326 {offsets = [8, 0], sizes = [8, 128], strides = [1, 1]} : vector<64x128xf32> to vector<8x128xf32>
    %cst_90 = arith.constant dense<0.000000e+00> : vector<8x128xf32>
    %587 = tpu.matmul %585, %475, %cst_90 {dimension_numbers = #tpu.dot_dimension_numbers<[1], [0], [0], [1], [0, 0, 1, 1], [], []>} : vector<8x32xf32>, vector<32x128xf32>, vector<8x128xf32> -> vector<8x128xf32>
    %588 = arith.addf %586, %587 : vector<8x128xf32>
    %589 = arith.negf %588 : vector<8x128xf32>
    %590 = math.exp %589 : vector<8x128xf32>
    %cst_91 = arith.constant 1.000000e+00 : f32
    %591 = vector.broadcast %cst_91 : f32 to vector<8x128xf32>
    %592 = arith.addf %591, %590 : vector<8x128xf32>
    %593 = arith.divf %591, %592 : vector<8x128xf32>
    %594 = math.tanh %588 : vector<8x128xf32>
    %595 = vector.extract_strided_slice %593 {offsets = [0, 32], sizes = [8, 32], strides = [1, 1]} : vector<8x128xf32> to vector<8x32xf32>
    %596 = arith.mulf %595, %582 : vector<8x32xf32>
    %597 = vector.extract_strided_slice %593 {offsets = [0, 0], sizes = [8, 32], strides = [1, 1]} : vector<8x128xf32> to vector<8x32xf32>
    %598 = vector.extract_strided_slice %594 {offsets = [0, 64], sizes = [8, 32], strides = [1, 1]} : vector<8x128xf32> to vector<8x32xf32>
    %599 = arith.mulf %597, %598 : vector<8x32xf32>
    %600 = arith.addf %596, %599 : vector<8x32xf32>
    %601 = vector.extract_strided_slice %593 {offsets = [0, 96], sizes = [8, 32], strides = [1, 1]} : vector<8x128xf32> to vector<8x32xf32>
    %602 = math.tanh %600 : vector<8x32xf32>
    %603 = arith.mulf %601, %602 : vector<8x32xf32>
    %604 = vector.extract_strided_slice %326 {offsets = [0, 0], sizes = [8, 128], strides = [1, 1]} : vector<64x128xf32> to vector<8x128xf32>
    %cst_92 = arith.constant dense<0.000000e+00> : vector<8x128xf32>
    %605 = tpu.matmul %603, %475, %cst_92 {dimension_numbers = #tpu.dot_dimension_numbers<[1], [0], [0], [1], [0, 0, 1, 1], [], []>} : vector<8x32xf32>, vector<32x128xf32>, vector<8x128xf32> -> vector<8x128xf32>
    %606 = arith.addf %604, %605 : vector<8x128xf32>
    %607 = arith.negf %606 : vector<8x128xf32>
    %608 = math.exp %607 : vector<8x128xf32>
    %cst_93 = arith.constant 1.000000e+00 : f32
    %609 = vector.broadcast %cst_93 : f32 to vector<8x128xf32>
    %610 = arith.addf %609, %608 : vector<8x128xf32>
    %611 = arith.divf %609, %610 : vector<8x128xf32>
    %612 = math.tanh %606 : vector<8x128xf32>
    %613 = vector.extract_strided_slice %611 {offsets = [0, 32], sizes = [8, 32], strides = [1, 1]} : vector<8x128xf32> to vector<8x32xf32>
    %614 = arith.mulf %613, %600 : vector<8x32xf32>
    %615 = vector.extract_strided_slice %611 {offsets = [0, 0], sizes = [8, 32], strides = [1, 1]} : vector<8x128xf32> to vector<8x32xf32>
    %616 = vector.extract_strided_slice %612 {offsets = [0, 64], sizes = [8, 32], strides = [1, 1]} : vector<8x128xf32> to vector<8x32xf32>
    %617 = arith.mulf %615, %616 : vector<8x32xf32>
    %618 = arith.addf %614, %617 : vector<8x32xf32>
    %619 = vector.extract_strided_slice %611 {offsets = [0, 96], sizes = [8, 32], strides = [1, 1]} : vector<8x128xf32> to vector<8x32xf32>
    %620 = math.tanh %618 : vector<8x32xf32>
    %621 = arith.mulf %619, %620 : vector<8x32xf32>
    %622 = tpu.concatenate %621, %603, %585, %567, %549, %531, %513, %495 in 0 : vector<8x32xf32>, vector<8x32xf32>, vector<8x32xf32>, vector<8x32xf32>, vector<8x32xf32>, vector<8x32xf32>, vector<8x32xf32>, vector<8x32xf32> -> vector<64x32xf32>
    %c0_94 = arith.constant 0 : index
    %c0_95 = arith.constant 0 : index
    %623 = vector.load %arg9[%c0_94, %c0_95] : memref<96x128xf32, #tpu.memory_space<vmem>>, vector<96x128xf32>
    %c0_96 = arith.constant 0 : index
    %c0_97 = arith.constant 0 : index
    %624 = vector.load %arg11[%c0_96, %c0_97] : memref<96x128xf32, #tpu.memory_space<vmem>>, vector<96x128xf32>
    %625 = vector.extract_strided_slice %623 {offsets = [0, 0], sizes = [32, 128], strides = [1, 1]} : vector<96x128xf32> to vector<32x128xf32>
    %cst_98 = arith.constant dense<0.000000e+00> : vector<64x128xf32>
    %626 = tpu.matmul %474, %625, %cst_98 {dimension_numbers = #tpu.dot_dimension_numbers<[1], [0], [0], [1], [0, 0, 1, 1], [], []>} : vector<64x32xf32>, vector<32x128xf32>, vector<64x128xf32> -> vector<64x128xf32>
    %627 = vector.extract_strided_slice %623 {offsets = [32, 0], sizes = [32, 128], strides = [1, 1]} : vector<96x128xf32> to vector<32x128xf32>
    %cst_99 = arith.constant dense<0.000000e+00> : vector<64x128xf32>
    %628 = tpu.matmul %622, %627, %cst_99 {dimension_numbers = #tpu.dot_dimension_numbers<[1], [0], [0], [1], [0, 0, 1, 1], [], []>} : vector<64x32xf32>, vector<32x128xf32>, vector<64x128xf32> -> vector<64x128xf32>
    %629 = arith.addf %626, %628 : vector<64x128xf32>
    %c0_100 = arith.constant 0 : index
    %c0_101 = arith.constant 0 : index
    %630 = vector.load %arg10[%c0_100, %c0_101] : memref<1x128xf32, #tpu.memory_space<vmem>>, vector<1x128xf32>
    %631 = vector.broadcast %630 : vector<1x128xf32> to vector<64x128xf32>
    %632 = arith.addf %629, %631 : vector<64x128xf32>
    %633 = vector.extract_strided_slice %624 {offsets = [0, 0], sizes = [32, 128], strides = [1, 1]} : vector<96x128xf32> to vector<32x128xf32>
    %cst_102 = arith.constant dense<0.000000e+00> : vector<64x128xf32>
    %634 = tpu.matmul %474, %633, %cst_102 {dimension_numbers = #tpu.dot_dimension_numbers<[1], [0], [0], [1], [0, 0, 1, 1], [], []>} : vector<64x32xf32>, vector<32x128xf32>, vector<64x128xf32> -> vector<64x128xf32>
    %635 = vector.extract_strided_slice %624 {offsets = [32, 0], sizes = [32, 128], strides = [1, 1]} : vector<96x128xf32> to vector<32x128xf32>
    %cst_103 = arith.constant dense<0.000000e+00> : vector<64x128xf32>
    %636 = tpu.matmul %622, %635, %cst_103 {dimension_numbers = #tpu.dot_dimension_numbers<[1], [0], [0], [1], [0, 0, 1, 1], [], []>} : vector<64x32xf32>, vector<32x128xf32>, vector<64x128xf32> -> vector<64x128xf32>
    %637 = arith.addf %634, %636 : vector<64x128xf32>
    %c0_104 = arith.constant 0 : index
    %c0_105 = arith.constant 0 : index
    %638 = vector.load %arg12[%c0_104, %c0_105] : memref<1x128xf32, #tpu.memory_space<vmem>>, vector<1x128xf32>
    %639 = vector.broadcast %638 : vector<1x128xf32> to vector<64x128xf32>
    %640 = arith.addf %637, %639 : vector<64x128xf32>
    %641 = vector.extract_strided_slice %623 {offsets = [64, 0], sizes = [32, 128], strides = [1, 1]} : vector<96x128xf32> to vector<32x128xf32>
    %cst_106 = arith.constant 0.000000e+00 : f32
    %642 = vector.broadcast %cst_106 : f32 to vector<8x32xf32>
    %cst_107 = arith.constant 0.000000e+00 : f32
    %643 = vector.broadcast %cst_107 : f32 to vector<8x32xf32>
    %644 = vector.extract_strided_slice %632 {offsets = [0, 0], sizes = [8, 128], strides = [1, 1]} : vector<64x128xf32> to vector<8x128xf32>
    %cst_108 = arith.constant dense<0.000000e+00> : vector<8x128xf32>
    %645 = tpu.matmul %642, %641, %cst_108 {dimension_numbers = #tpu.dot_dimension_numbers<[1], [0], [0], [1], [0, 0, 1, 1], [], []>} : vector<8x32xf32>, vector<32x128xf32>, vector<8x128xf32> -> vector<8x128xf32>
    %646 = arith.addf %644, %645 : vector<8x128xf32>
    %647 = arith.negf %646 : vector<8x128xf32>
    %648 = math.exp %647 : vector<8x128xf32>
    %cst_109 = arith.constant 1.000000e+00 : f32
    %649 = vector.broadcast %cst_109 : f32 to vector<8x128xf32>
    %650 = arith.addf %649, %648 : vector<8x128xf32>
    %651 = arith.divf %649, %650 : vector<8x128xf32>
    %652 = math.tanh %646 : vector<8x128xf32>
    %653 = vector.extract_strided_slice %651 {offsets = [0, 32], sizes = [8, 32], strides = [1, 1]} : vector<8x128xf32> to vector<8x32xf32>
    %654 = arith.mulf %653, %643 : vector<8x32xf32>
    %655 = vector.extract_strided_slice %651 {offsets = [0, 0], sizes = [8, 32], strides = [1, 1]} : vector<8x128xf32> to vector<8x32xf32>
    %656 = vector.extract_strided_slice %652 {offsets = [0, 64], sizes = [8, 32], strides = [1, 1]} : vector<8x128xf32> to vector<8x32xf32>
    %657 = arith.mulf %655, %656 : vector<8x32xf32>
    %658 = arith.addf %654, %657 : vector<8x32xf32>
    %659 = vector.extract_strided_slice %651 {offsets = [0, 96], sizes = [8, 32], strides = [1, 1]} : vector<8x128xf32> to vector<8x32xf32>
    %660 = math.tanh %658 : vector<8x32xf32>
    %661 = arith.mulf %659, %660 : vector<8x32xf32>
    %662 = vector.extract_strided_slice %632 {offsets = [8, 0], sizes = [8, 128], strides = [1, 1]} : vector<64x128xf32> to vector<8x128xf32>
    %cst_110 = arith.constant dense<0.000000e+00> : vector<8x128xf32>
    %663 = tpu.matmul %661, %641, %cst_110 {dimension_numbers = #tpu.dot_dimension_numbers<[1], [0], [0], [1], [0, 0, 1, 1], [], []>} : vector<8x32xf32>, vector<32x128xf32>, vector<8x128xf32> -> vector<8x128xf32>
    %664 = arith.addf %662, %663 : vector<8x128xf32>
    %665 = arith.negf %664 : vector<8x128xf32>
    %666 = math.exp %665 : vector<8x128xf32>
    %cst_111 = arith.constant 1.000000e+00 : f32
    %667 = vector.broadcast %cst_111 : f32 to vector<8x128xf32>
    %668 = arith.addf %667, %666 : vector<8x128xf32>
    %669 = arith.divf %667, %668 : vector<8x128xf32>
    %670 = math.tanh %664 : vector<8x128xf32>
    %671 = vector.extract_strided_slice %669 {offsets = [0, 32], sizes = [8, 32], strides = [1, 1]} : vector<8x128xf32> to vector<8x32xf32>
    %672 = arith.mulf %671, %658 : vector<8x32xf32>
    %673 = vector.extract_strided_slice %669 {offsets = [0, 0], sizes = [8, 32], strides = [1, 1]} : vector<8x128xf32> to vector<8x32xf32>
    %674 = vector.extract_strided_slice %670 {offsets = [0, 64], sizes = [8, 32], strides = [1, 1]} : vector<8x128xf32> to vector<8x32xf32>
    %675 = arith.mulf %673, %674 : vector<8x32xf32>
    %676 = arith.addf %672, %675 : vector<8x32xf32>
    %677 = vector.extract_strided_slice %669 {offsets = [0, 96], sizes = [8, 32], strides = [1, 1]} : vector<8x128xf32> to vector<8x32xf32>
    %678 = math.tanh %676 : vector<8x32xf32>
    %679 = arith.mulf %677, %678 : vector<8x32xf32>
    %680 = vector.extract_strided_slice %632 {offsets = [16, 0], sizes = [8, 128], strides = [1, 1]} : vector<64x128xf32> to vector<8x128xf32>
    %cst_112 = arith.constant dense<0.000000e+00> : vector<8x128xf32>
    %681 = tpu.matmul %679, %641, %cst_112 {dimension_numbers = #tpu.dot_dimension_numbers<[1], [0], [0], [1], [0, 0, 1, 1], [], []>} : vector<8x32xf32>, vector<32x128xf32>, vector<8x128xf32> -> vector<8x128xf32>
    %682 = arith.addf %680, %681 : vector<8x128xf32>
    %683 = arith.negf %682 : vector<8x128xf32>
    %684 = math.exp %683 : vector<8x128xf32>
    %cst_113 = arith.constant 1.000000e+00 : f32
    %685 = vector.broadcast %cst_113 : f32 to vector<8x128xf32>
    %686 = arith.addf %685, %684 : vector<8x128xf32>
    %687 = arith.divf %685, %686 : vector<8x128xf32>
    %688 = math.tanh %682 : vector<8x128xf32>
    %689 = vector.extract_strided_slice %687 {offsets = [0, 32], sizes = [8, 32], strides = [1, 1]} : vector<8x128xf32> to vector<8x32xf32>
    %690 = arith.mulf %689, %676 : vector<8x32xf32>
    %691 = vector.extract_strided_slice %687 {offsets = [0, 0], sizes = [8, 32], strides = [1, 1]} : vector<8x128xf32> to vector<8x32xf32>
    %692 = vector.extract_strided_slice %688 {offsets = [0, 64], sizes = [8, 32], strides = [1, 1]} : vector<8x128xf32> to vector<8x32xf32>
    %693 = arith.mulf %691, %692 : vector<8x32xf32>
    %694 = arith.addf %690, %693 : vector<8x32xf32>
    %695 = vector.extract_strided_slice %687 {offsets = [0, 96], sizes = [8, 32], strides = [1, 1]} : vector<8x128xf32> to vector<8x32xf32>
    %696 = math.tanh %694 : vector<8x32xf32>
    %697 = arith.mulf %695, %696 : vector<8x32xf32>
    %698 = vector.extract_strided_slice %632 {offsets = [24, 0], sizes = [8, 128], strides = [1, 1]} : vector<64x128xf32> to vector<8x128xf32>
    %cst_114 = arith.constant dense<0.000000e+00> : vector<8x128xf32>
    %699 = tpu.matmul %697, %641, %cst_114 {dimension_numbers = #tpu.dot_dimension_numbers<[1], [0], [0], [1], [0, 0, 1, 1], [], []>} : vector<8x32xf32>, vector<32x128xf32>, vector<8x128xf32> -> vector<8x128xf32>
    %700 = arith.addf %698, %699 : vector<8x128xf32>
    %701 = arith.negf %700 : vector<8x128xf32>
    %702 = math.exp %701 : vector<8x128xf32>
    %cst_115 = arith.constant 1.000000e+00 : f32
    %703 = vector.broadcast %cst_115 : f32 to vector<8x128xf32>
    %704 = arith.addf %703, %702 : vector<8x128xf32>
    %705 = arith.divf %703, %704 : vector<8x128xf32>
    %706 = math.tanh %700 : vector<8x128xf32>
    %707 = vector.extract_strided_slice %705 {offsets = [0, 32], sizes = [8, 32], strides = [1, 1]} : vector<8x128xf32> to vector<8x32xf32>
    %708 = arith.mulf %707, %694 : vector<8x32xf32>
    %709 = vector.extract_strided_slice %705 {offsets = [0, 0], sizes = [8, 32], strides = [1, 1]} : vector<8x128xf32> to vector<8x32xf32>
    %710 = vector.extract_strided_slice %706 {offsets = [0, 64], sizes = [8, 32], strides = [1, 1]} : vector<8x128xf32> to vector<8x32xf32>
    %711 = arith.mulf %709, %710 : vector<8x32xf32>
    %712 = arith.addf %708, %711 : vector<8x32xf32>
    %713 = vector.extract_strided_slice %705 {offsets = [0, 96], sizes = [8, 32], strides = [1, 1]} : vector<8x128xf32> to vector<8x32xf32>
    %714 = math.tanh %712 : vector<8x32xf32>
    %715 = arith.mulf %713, %714 : vector<8x32xf32>
    %716 = vector.extract_strided_slice %632 {offsets = [32, 0], sizes = [8, 128], strides = [1, 1]} : vector<64x128xf32> to vector<8x128xf32>
    %cst_116 = arith.constant dense<0.000000e+00> : vector<8x128xf32>
    %717 = tpu.matmul %715, %641, %cst_116 {dimension_numbers = #tpu.dot_dimension_numbers<[1], [0], [0], [1], [0, 0, 1, 1], [], []>} : vector<8x32xf32>, vector<32x128xf32>, vector<8x128xf32> -> vector<8x128xf32>
    %718 = arith.addf %716, %717 : vector<8x128xf32>
    %719 = arith.negf %718 : vector<8x128xf32>
    %720 = math.exp %719 : vector<8x128xf32>
    %cst_117 = arith.constant 1.000000e+00 : f32
    %721 = vector.broadcast %cst_117 : f32 to vector<8x128xf32>
    %722 = arith.addf %721, %720 : vector<8x128xf32>
    %723 = arith.divf %721, %722 : vector<8x128xf32>
    %724 = math.tanh %718 : vector<8x128xf32>
    %725 = vector.extract_strided_slice %723 {offsets = [0, 32], sizes = [8, 32], strides = [1, 1]} : vector<8x128xf32> to vector<8x32xf32>
    %726 = arith.mulf %725, %712 : vector<8x32xf32>
    %727 = vector.extract_strided_slice %723 {offsets = [0, 0], sizes = [8, 32], strides = [1, 1]} : vector<8x128xf32> to vector<8x32xf32>
    %728 = vector.extract_strided_slice %724 {offsets = [0, 64], sizes = [8, 32], strides = [1, 1]} : vector<8x128xf32> to vector<8x32xf32>
    %729 = arith.mulf %727, %728 : vector<8x32xf32>
    %730 = arith.addf %726, %729 : vector<8x32xf32>
    %731 = vector.extract_strided_slice %723 {offsets = [0, 96], sizes = [8, 32], strides = [1, 1]} : vector<8x128xf32> to vector<8x32xf32>
    %732 = math.tanh %730 : vector<8x32xf32>
    %733 = arith.mulf %731, %732 : vector<8x32xf32>
    %734 = vector.extract_strided_slice %632 {offsets = [40, 0], sizes = [8, 128], strides = [1, 1]} : vector<64x128xf32> to vector<8x128xf32>
    %cst_118 = arith.constant dense<0.000000e+00> : vector<8x128xf32>
    %735 = tpu.matmul %733, %641, %cst_118 {dimension_numbers = #tpu.dot_dimension_numbers<[1], [0], [0], [1], [0, 0, 1, 1], [], []>} : vector<8x32xf32>, vector<32x128xf32>, vector<8x128xf32> -> vector<8x128xf32>
    %736 = arith.addf %734, %735 : vector<8x128xf32>
    %737 = arith.negf %736 : vector<8x128xf32>
    %738 = math.exp %737 : vector<8x128xf32>
    %cst_119 = arith.constant 1.000000e+00 : f32
    %739 = vector.broadcast %cst_119 : f32 to vector<8x128xf32>
    %740 = arith.addf %739, %738 : vector<8x128xf32>
    %741 = arith.divf %739, %740 : vector<8x128xf32>
    %742 = math.tanh %736 : vector<8x128xf32>
    %743 = vector.extract_strided_slice %741 {offsets = [0, 32], sizes = [8, 32], strides = [1, 1]} : vector<8x128xf32> to vector<8x32xf32>
    %744 = arith.mulf %743, %730 : vector<8x32xf32>
    %745 = vector.extract_strided_slice %741 {offsets = [0, 0], sizes = [8, 32], strides = [1, 1]} : vector<8x128xf32> to vector<8x32xf32>
    %746 = vector.extract_strided_slice %742 {offsets = [0, 64], sizes = [8, 32], strides = [1, 1]} : vector<8x128xf32> to vector<8x32xf32>
    %747 = arith.mulf %745, %746 : vector<8x32xf32>
    %748 = arith.addf %744, %747 : vector<8x32xf32>
    %749 = vector.extract_strided_slice %741 {offsets = [0, 96], sizes = [8, 32], strides = [1, 1]} : vector<8x128xf32> to vector<8x32xf32>
    %750 = math.tanh %748 : vector<8x32xf32>
    %751 = arith.mulf %749, %750 : vector<8x32xf32>
    %752 = vector.extract_strided_slice %632 {offsets = [48, 0], sizes = [8, 128], strides = [1, 1]} : vector<64x128xf32> to vector<8x128xf32>
    %cst_120 = arith.constant dense<0.000000e+00> : vector<8x128xf32>
    %753 = tpu.matmul %751, %641, %cst_120 {dimension_numbers = #tpu.dot_dimension_numbers<[1], [0], [0], [1], [0, 0, 1, 1], [], []>} : vector<8x32xf32>, vector<32x128xf32>, vector<8x128xf32> -> vector<8x128xf32>
    %754 = arith.addf %752, %753 : vector<8x128xf32>
    %755 = arith.negf %754 : vector<8x128xf32>
    %756 = math.exp %755 : vector<8x128xf32>
    %cst_121 = arith.constant 1.000000e+00 : f32
    %757 = vector.broadcast %cst_121 : f32 to vector<8x128xf32>
    %758 = arith.addf %757, %756 : vector<8x128xf32>
    %759 = arith.divf %757, %758 : vector<8x128xf32>
    %760 = math.tanh %754 : vector<8x128xf32>
    %761 = vector.extract_strided_slice %759 {offsets = [0, 32], sizes = [8, 32], strides = [1, 1]} : vector<8x128xf32> to vector<8x32xf32>
    %762 = arith.mulf %761, %748 : vector<8x32xf32>
    %763 = vector.extract_strided_slice %759 {offsets = [0, 0], sizes = [8, 32], strides = [1, 1]} : vector<8x128xf32> to vector<8x32xf32>
    %764 = vector.extract_strided_slice %760 {offsets = [0, 64], sizes = [8, 32], strides = [1, 1]} : vector<8x128xf32> to vector<8x32xf32>
    %765 = arith.mulf %763, %764 : vector<8x32xf32>
    %766 = arith.addf %762, %765 : vector<8x32xf32>
    %767 = vector.extract_strided_slice %759 {offsets = [0, 96], sizes = [8, 32], strides = [1, 1]} : vector<8x128xf32> to vector<8x32xf32>
    %768 = math.tanh %766 : vector<8x32xf32>
    %769 = arith.mulf %767, %768 : vector<8x32xf32>
    %770 = vector.extract_strided_slice %632 {offsets = [56, 0], sizes = [8, 128], strides = [1, 1]} : vector<64x128xf32> to vector<8x128xf32>
    %cst_122 = arith.constant dense<0.000000e+00> : vector<8x128xf32>
    %771 = tpu.matmul %769, %641, %cst_122 {dimension_numbers = #tpu.dot_dimension_numbers<[1], [0], [0], [1], [0, 0, 1, 1], [], []>} : vector<8x32xf32>, vector<32x128xf32>, vector<8x128xf32> -> vector<8x128xf32>
    %772 = arith.addf %770, %771 : vector<8x128xf32>
    %773 = arith.negf %772 : vector<8x128xf32>
    %774 = math.exp %773 : vector<8x128xf32>
    %cst_123 = arith.constant 1.000000e+00 : f32
    %775 = vector.broadcast %cst_123 : f32 to vector<8x128xf32>
    %776 = arith.addf %775, %774 : vector<8x128xf32>
    %777 = arith.divf %775, %776 : vector<8x128xf32>
    %778 = math.tanh %772 : vector<8x128xf32>
    %779 = vector.extract_strided_slice %777 {offsets = [0, 32], sizes = [8, 32], strides = [1, 1]} : vector<8x128xf32> to vector<8x32xf32>
    %780 = arith.mulf %779, %766 : vector<8x32xf32>
    %781 = vector.extract_strided_slice %777 {offsets = [0, 0], sizes = [8, 32], strides = [1, 1]} : vector<8x128xf32> to vector<8x32xf32>
    %782 = vector.extract_strided_slice %778 {offsets = [0, 64], sizes = [8, 32], strides = [1, 1]} : vector<8x128xf32> to vector<8x32xf32>
    %783 = arith.mulf %781, %782 : vector<8x32xf32>
    %784 = arith.addf %780, %783 : vector<8x32xf32>
    %785 = vector.extract_strided_slice %777 {offsets = [0, 96], sizes = [8, 32], strides = [1, 1]} : vector<8x128xf32> to vector<8x32xf32>
    %786 = math.tanh %784 : vector<8x32xf32>
    %787 = arith.mulf %785, %786 : vector<8x32xf32>
    %788 = tpu.concatenate %661, %679, %697, %715, %733, %751, %769, %787 in 0 : vector<8x32xf32>, vector<8x32xf32>, vector<8x32xf32>, vector<8x32xf32>, vector<8x32xf32>, vector<8x32xf32>, vector<8x32xf32>, vector<8x32xf32> -> vector<64x32xf32>
    %789 = vector.extract_strided_slice %624 {offsets = [64, 0], sizes = [32, 128], strides = [1, 1]} : vector<96x128xf32> to vector<32x128xf32>
    %cst_124 = arith.constant 0.000000e+00 : f32
    %790 = vector.broadcast %cst_124 : f32 to vector<8x32xf32>
    %cst_125 = arith.constant 0.000000e+00 : f32
    %791 = vector.broadcast %cst_125 : f32 to vector<8x32xf32>
    %792 = vector.extract_strided_slice %640 {offsets = [56, 0], sizes = [8, 128], strides = [1, 1]} : vector<64x128xf32> to vector<8x128xf32>
    %cst_126 = arith.constant dense<0.000000e+00> : vector<8x128xf32>
    %793 = tpu.matmul %790, %789, %cst_126 {dimension_numbers = #tpu.dot_dimension_numbers<[1], [0], [0], [1], [0, 0, 1, 1], [], []>} : vector<8x32xf32>, vector<32x128xf32>, vector<8x128xf32> -> vector<8x128xf32>
    %794 = arith.addf %792, %793 : vector<8x128xf32>
    %795 = arith.negf %794 : vector<8x128xf32>
    %796 = math.exp %795 : vector<8x128xf32>
    %cst_127 = arith.constant 1.000000e+00 : f32
    %797 = vector.broadcast %cst_127 : f32 to vector<8x128xf32>
    %798 = arith.addf %797, %796 : vector<8x128xf32>
    %799 = arith.divf %797, %798 : vector<8x128xf32>
    %800 = math.tanh %794 : vector<8x128xf32>
    %801 = vector.extract_strided_slice %799 {offsets = [0, 32], sizes = [8, 32], strides = [1, 1]} : vector<8x128xf32> to vector<8x32xf32>
    %802 = arith.mulf %801, %791 : vector<8x32xf32>
    %803 = vector.extract_strided_slice %799 {offsets = [0, 0], sizes = [8, 32], strides = [1, 1]} : vector<8x128xf32> to vector<8x32xf32>
    %804 = vector.extract_strided_slice %800 {offsets = [0, 64], sizes = [8, 32], strides = [1, 1]} : vector<8x128xf32> to vector<8x32xf32>
    %805 = arith.mulf %803, %804 : vector<8x32xf32>
    %806 = arith.addf %802, %805 : vector<8x32xf32>
    %807 = vector.extract_strided_slice %799 {offsets = [0, 96], sizes = [8, 32], strides = [1, 1]} : vector<8x128xf32> to vector<8x32xf32>
    %808 = math.tanh %806 : vector<8x32xf32>
    %809 = arith.mulf %807, %808 : vector<8x32xf32>
    %810 = vector.extract_strided_slice %640 {offsets = [48, 0], sizes = [8, 128], strides = [1, 1]} : vector<64x128xf32> to vector<8x128xf32>
    %cst_128 = arith.constant dense<0.000000e+00> : vector<8x128xf32>
    %811 = tpu.matmul %809, %789, %cst_128 {dimension_numbers = #tpu.dot_dimension_numbers<[1], [0], [0], [1], [0, 0, 1, 1], [], []>} : vector<8x32xf32>, vector<32x128xf32>, vector<8x128xf32> -> vector<8x128xf32>
    %812 = arith.addf %810, %811 : vector<8x128xf32>
    %813 = arith.negf %812 : vector<8x128xf32>
    %814 = math.exp %813 : vector<8x128xf32>
    %cst_129 = arith.constant 1.000000e+00 : f32
    %815 = vector.broadcast %cst_129 : f32 to vector<8x128xf32>
    %816 = arith.addf %815, %814 : vector<8x128xf32>
    %817 = arith.divf %815, %816 : vector<8x128xf32>
    %818 = math.tanh %812 : vector<8x128xf32>
    %819 = vector.extract_strided_slice %817 {offsets = [0, 32], sizes = [8, 32], strides = [1, 1]} : vector<8x128xf32> to vector<8x32xf32>
    %820 = arith.mulf %819, %806 : vector<8x32xf32>
    %821 = vector.extract_strided_slice %817 {offsets = [0, 0], sizes = [8, 32], strides = [1, 1]} : vector<8x128xf32> to vector<8x32xf32>
    %822 = vector.extract_strided_slice %818 {offsets = [0, 64], sizes = [8, 32], strides = [1, 1]} : vector<8x128xf32> to vector<8x32xf32>
    %823 = arith.mulf %821, %822 : vector<8x32xf32>
    %824 = arith.addf %820, %823 : vector<8x32xf32>
    %825 = vector.extract_strided_slice %817 {offsets = [0, 96], sizes = [8, 32], strides = [1, 1]} : vector<8x128xf32> to vector<8x32xf32>
    %826 = math.tanh %824 : vector<8x32xf32>
    %827 = arith.mulf %825, %826 : vector<8x32xf32>
    %828 = vector.extract_strided_slice %640 {offsets = [40, 0], sizes = [8, 128], strides = [1, 1]} : vector<64x128xf32> to vector<8x128xf32>
    %cst_130 = arith.constant dense<0.000000e+00> : vector<8x128xf32>
    %829 = tpu.matmul %827, %789, %cst_130 {dimension_numbers = #tpu.dot_dimension_numbers<[1], [0], [0], [1], [0, 0, 1, 1], [], []>} : vector<8x32xf32>, vector<32x128xf32>, vector<8x128xf32> -> vector<8x128xf32>
    %830 = arith.addf %828, %829 : vector<8x128xf32>
    %831 = arith.negf %830 : vector<8x128xf32>
    %832 = math.exp %831 : vector<8x128xf32>
    %cst_131 = arith.constant 1.000000e+00 : f32
    %833 = vector.broadcast %cst_131 : f32 to vector<8x128xf32>
    %834 = arith.addf %833, %832 : vector<8x128xf32>
    %835 = arith.divf %833, %834 : vector<8x128xf32>
    %836 = math.tanh %830 : vector<8x128xf32>
    %837 = vector.extract_strided_slice %835 {offsets = [0, 32], sizes = [8, 32], strides = [1, 1]} : vector<8x128xf32> to vector<8x32xf32>
    %838 = arith.mulf %837, %824 : vector<8x32xf32>
    %839 = vector.extract_strided_slice %835 {offsets = [0, 0], sizes = [8, 32], strides = [1, 1]} : vector<8x128xf32> to vector<8x32xf32>
    %840 = vector.extract_strided_slice %836 {offsets = [0, 64], sizes = [8, 32], strides = [1, 1]} : vector<8x128xf32> to vector<8x32xf32>
    %841 = arith.mulf %839, %840 : vector<8x32xf32>
    %842 = arith.addf %838, %841 : vector<8x32xf32>
    %843 = vector.extract_strided_slice %835 {offsets = [0, 96], sizes = [8, 32], strides = [1, 1]} : vector<8x128xf32> to vector<8x32xf32>
    %844 = math.tanh %842 : vector<8x32xf32>
    %845 = arith.mulf %843, %844 : vector<8x32xf32>
    %846 = vector.extract_strided_slice %640 {offsets = [32, 0], sizes = [8, 128], strides = [1, 1]} : vector<64x128xf32> to vector<8x128xf32>
    %cst_132 = arith.constant dense<0.000000e+00> : vector<8x128xf32>
    %847 = tpu.matmul %845, %789, %cst_132 {dimension_numbers = #tpu.dot_dimension_numbers<[1], [0], [0], [1], [0, 0, 1, 1], [], []>} : vector<8x32xf32>, vector<32x128xf32>, vector<8x128xf32> -> vector<8x128xf32>
    %848 = arith.addf %846, %847 : vector<8x128xf32>
    %849 = arith.negf %848 : vector<8x128xf32>
    %850 = math.exp %849 : vector<8x128xf32>
    %cst_133 = arith.constant 1.000000e+00 : f32
    %851 = vector.broadcast %cst_133 : f32 to vector<8x128xf32>
    %852 = arith.addf %851, %850 : vector<8x128xf32>
    %853 = arith.divf %851, %852 : vector<8x128xf32>
    %854 = math.tanh %848 : vector<8x128xf32>
    %855 = vector.extract_strided_slice %853 {offsets = [0, 32], sizes = [8, 32], strides = [1, 1]} : vector<8x128xf32> to vector<8x32xf32>
    %856 = arith.mulf %855, %842 : vector<8x32xf32>
    %857 = vector.extract_strided_slice %853 {offsets = [0, 0], sizes = [8, 32], strides = [1, 1]} : vector<8x128xf32> to vector<8x32xf32>
    %858 = vector.extract_strided_slice %854 {offsets = [0, 64], sizes = [8, 32], strides = [1, 1]} : vector<8x128xf32> to vector<8x32xf32>
    %859 = arith.mulf %857, %858 : vector<8x32xf32>
    %860 = arith.addf %856, %859 : vector<8x32xf32>
    %861 = vector.extract_strided_slice %853 {offsets = [0, 96], sizes = [8, 32], strides = [1, 1]} : vector<8x128xf32> to vector<8x32xf32>
    %862 = math.tanh %860 : vector<8x32xf32>
    %863 = arith.mulf %861, %862 : vector<8x32xf32>
    %864 = vector.extract_strided_slice %640 {offsets = [24, 0], sizes = [8, 128], strides = [1, 1]} : vector<64x128xf32> to vector<8x128xf32>
    %cst_134 = arith.constant dense<0.000000e+00> : vector<8x128xf32>
    %865 = tpu.matmul %863, %789, %cst_134 {dimension_numbers = #tpu.dot_dimension_numbers<[1], [0], [0], [1], [0, 0, 1, 1], [], []>} : vector<8x32xf32>, vector<32x128xf32>, vector<8x128xf32> -> vector<8x128xf32>
    %866 = arith.addf %864, %865 : vector<8x128xf32>
    %867 = arith.negf %866 : vector<8x128xf32>
    %868 = math.exp %867 : vector<8x128xf32>
    %cst_135 = arith.constant 1.000000e+00 : f32
    %869 = vector.broadcast %cst_135 : f32 to vector<8x128xf32>
    %870 = arith.addf %869, %868 : vector<8x128xf32>
    %871 = arith.divf %869, %870 : vector<8x128xf32>
    %872 = math.tanh %866 : vector<8x128xf32>
    %873 = vector.extract_strided_slice %871 {offsets = [0, 32], sizes = [8, 32], strides = [1, 1]} : vector<8x128xf32> to vector<8x32xf32>
    %874 = arith.mulf %873, %860 : vector<8x32xf32>
    %875 = vector.extract_strided_slice %871 {offsets = [0, 0], sizes = [8, 32], strides = [1, 1]} : vector<8x128xf32> to vector<8x32xf32>
    %876 = vector.extract_strided_slice %872 {offsets = [0, 64], sizes = [8, 32], strides = [1, 1]} : vector<8x128xf32> to vector<8x32xf32>
    %877 = arith.mulf %875, %876 : vector<8x32xf32>
    %878 = arith.addf %874, %877 : vector<8x32xf32>
    %879 = vector.extract_strided_slice %871 {offsets = [0, 96], sizes = [8, 32], strides = [1, 1]} : vector<8x128xf32> to vector<8x32xf32>
    %880 = math.tanh %878 : vector<8x32xf32>
    %881 = arith.mulf %879, %880 : vector<8x32xf32>
    %882 = vector.extract_strided_slice %640 {offsets = [16, 0], sizes = [8, 128], strides = [1, 1]} : vector<64x128xf32> to vector<8x128xf32>
    %cst_136 = arith.constant dense<0.000000e+00> : vector<8x128xf32>
    %883 = tpu.matmul %881, %789, %cst_136 {dimension_numbers = #tpu.dot_dimension_numbers<[1], [0], [0], [1], [0, 0, 1, 1], [], []>} : vector<8x32xf32>, vector<32x128xf32>, vector<8x128xf32> -> vector<8x128xf32>
    %884 = arith.addf %882, %883 : vector<8x128xf32>
    %885 = arith.negf %884 : vector<8x128xf32>
    %886 = math.exp %885 : vector<8x128xf32>
    %cst_137 = arith.constant 1.000000e+00 : f32
    %887 = vector.broadcast %cst_137 : f32 to vector<8x128xf32>
    %888 = arith.addf %887, %886 : vector<8x128xf32>
    %889 = arith.divf %887, %888 : vector<8x128xf32>
    %890 = math.tanh %884 : vector<8x128xf32>
    %891 = vector.extract_strided_slice %889 {offsets = [0, 32], sizes = [8, 32], strides = [1, 1]} : vector<8x128xf32> to vector<8x32xf32>
    %892 = arith.mulf %891, %878 : vector<8x32xf32>
    %893 = vector.extract_strided_slice %889 {offsets = [0, 0], sizes = [8, 32], strides = [1, 1]} : vector<8x128xf32> to vector<8x32xf32>
    %894 = vector.extract_strided_slice %890 {offsets = [0, 64], sizes = [8, 32], strides = [1, 1]} : vector<8x128xf32> to vector<8x32xf32>
    %895 = arith.mulf %893, %894 : vector<8x32xf32>
    %896 = arith.addf %892, %895 : vector<8x32xf32>
    %897 = vector.extract_strided_slice %889 {offsets = [0, 96], sizes = [8, 32], strides = [1, 1]} : vector<8x128xf32> to vector<8x32xf32>
    %898 = math.tanh %896 : vector<8x32xf32>
    %899 = arith.mulf %897, %898 : vector<8x32xf32>
    %900 = vector.extract_strided_slice %640 {offsets = [8, 0], sizes = [8, 128], strides = [1, 1]} : vector<64x128xf32> to vector<8x128xf32>
    %cst_138 = arith.constant dense<0.000000e+00> : vector<8x128xf32>
    %901 = tpu.matmul %899, %789, %cst_138 {dimension_numbers = #tpu.dot_dimension_numbers<[1], [0], [0], [1], [0, 0, 1, 1], [], []>} : vector<8x32xf32>, vector<32x128xf32>, vector<8x128xf32> -> vector<8x128xf32>
    %902 = arith.addf %900, %901 : vector<8x128xf32>
    %903 = arith.negf %902 : vector<8x128xf32>
    %904 = math.exp %903 : vector<8x128xf32>
    %cst_139 = arith.constant 1.000000e+00 : f32
    %905 = vector.broadcast %cst_139 : f32 to vector<8x128xf32>
    %906 = arith.addf %905, %904 : vector<8x128xf32>
    %907 = arith.divf %905, %906 : vector<8x128xf32>
    %908 = math.tanh %902 : vector<8x128xf32>
    %909 = vector.extract_strided_slice %907 {offsets = [0, 32], sizes = [8, 32], strides = [1, 1]} : vector<8x128xf32> to vector<8x32xf32>
    %910 = arith.mulf %909, %896 : vector<8x32xf32>
    %911 = vector.extract_strided_slice %907 {offsets = [0, 0], sizes = [8, 32], strides = [1, 1]} : vector<8x128xf32> to vector<8x32xf32>
    %912 = vector.extract_strided_slice %908 {offsets = [0, 64], sizes = [8, 32], strides = [1, 1]} : vector<8x128xf32> to vector<8x32xf32>
    %913 = arith.mulf %911, %912 : vector<8x32xf32>
    %914 = arith.addf %910, %913 : vector<8x32xf32>
    %915 = vector.extract_strided_slice %907 {offsets = [0, 96], sizes = [8, 32], strides = [1, 1]} : vector<8x128xf32> to vector<8x32xf32>
    %916 = math.tanh %914 : vector<8x32xf32>
    %917 = arith.mulf %915, %916 : vector<8x32xf32>
    %918 = vector.extract_strided_slice %640 {offsets = [0, 0], sizes = [8, 128], strides = [1, 1]} : vector<64x128xf32> to vector<8x128xf32>
    %cst_140 = arith.constant dense<0.000000e+00> : vector<8x128xf32>
    %919 = tpu.matmul %917, %789, %cst_140 {dimension_numbers = #tpu.dot_dimension_numbers<[1], [0], [0], [1], [0, 0, 1, 1], [], []>} : vector<8x32xf32>, vector<32x128xf32>, vector<8x128xf32> -> vector<8x128xf32>
    %920 = arith.addf %918, %919 : vector<8x128xf32>
    %921 = arith.negf %920 : vector<8x128xf32>
    %922 = math.exp %921 : vector<8x128xf32>
    %cst_141 = arith.constant 1.000000e+00 : f32
    %923 = vector.broadcast %cst_141 : f32 to vector<8x128xf32>
    %924 = arith.addf %923, %922 : vector<8x128xf32>
    %925 = arith.divf %923, %924 : vector<8x128xf32>
    %926 = math.tanh %920 : vector<8x128xf32>
    %927 = vector.extract_strided_slice %925 {offsets = [0, 32], sizes = [8, 32], strides = [1, 1]} : vector<8x128xf32> to vector<8x32xf32>
    %928 = arith.mulf %927, %914 : vector<8x32xf32>
    %929 = vector.extract_strided_slice %925 {offsets = [0, 0], sizes = [8, 32], strides = [1, 1]} : vector<8x128xf32> to vector<8x32xf32>
    %930 = vector.extract_strided_slice %926 {offsets = [0, 64], sizes = [8, 32], strides = [1, 1]} : vector<8x128xf32> to vector<8x32xf32>
    %931 = arith.mulf %929, %930 : vector<8x32xf32>
    %932 = arith.addf %928, %931 : vector<8x32xf32>
    %933 = vector.extract_strided_slice %925 {offsets = [0, 96], sizes = [8, 32], strides = [1, 1]} : vector<8x128xf32> to vector<8x32xf32>
    %934 = math.tanh %932 : vector<8x32xf32>
    %935 = arith.mulf %933, %934 : vector<8x32xf32>
    %936 = tpu.concatenate %935, %917, %899, %881, %863, %845, %827, %809 in 0 : vector<8x32xf32>, vector<8x32xf32>, vector<8x32xf32>, vector<8x32xf32>, vector<8x32xf32>, vector<8x32xf32>, vector<8x32xf32>, vector<8x32xf32> -> vector<64x32xf32>
    %c0_142 = arith.constant 0 : index
    %c0_143 = arith.constant 0 : index
    %937 = vector.load %arg13[%c0_142, %c0_143] : memref<1x64xf32, #tpu.memory_space<vmem>>, vector<1x64xf32>
    %938 = vector.extract_strided_slice %937 {offsets = [0, 0], sizes = [1, 32], strides = [1, 1]} : vector<1x64xf32> to vector<1x32xf32>
    %939 = vector.broadcast %938 : vector<1x32xf32> to vector<64x32xf32>
    %940 = arith.mulf %788, %939 : vector<64x32xf32>
    %cst_144 = arith.constant dense<0.000000e+00> : vector<64xf32>
    %941 = vector.multi_reduction <add>, %940, %cst_144 [1] : vector<64x32xf32> to vector<64xf32>
    %942 = vector.shape_cast %941 : vector<64xf32> to vector<64x1xf32>
    %943 = vector.extract_strided_slice %937 {offsets = [0, 32], sizes = [1, 32], strides = [1, 1]} : vector<1x64xf32> to vector<1x32xf32>
    %944 = vector.broadcast %943 : vector<1x32xf32> to vector<64x32xf32>
    %945 = arith.mulf %936, %944 : vector<64x32xf32>
    %cst_145 = arith.constant dense<0.000000e+00> : vector<64xf32>
    %946 = vector.multi_reduction <add>, %945, %cst_145 [1] : vector<64x32xf32> to vector<64xf32>
    %947 = vector.shape_cast %946 : vector<64xf32> to vector<64x1xf32>
    %948 = arith.addf %942, %947 : vector<64x1xf32>
    %c0_146 = arith.constant 0 : index
    %c0_147 = arith.constant 0 : index
    %949 = vector.load %arg14[%c0_146, %c0_147] : memref<1x1xf32, #tpu.memory_space<vmem>>, vector<1x1xf32>
    %950 = vector.broadcast %949 : vector<1x1xf32> to vector<64x1xf32>
    %951 = arith.addf %948, %950 : vector<64x1xf32>
    %952 = math.tanh %951 : vector<64x1xf32>
    %953 = vector.extract_strided_slice %952 {offsets = [0, 0], sizes = [8, 1], strides = [1, 1]} : vector<64x1xf32> to vector<8x1xf32>
    %954 = vector.extract_strided_slice %952 {offsets = [8, 0], sizes = [8, 1], strides = [1, 1]} : vector<64x1xf32> to vector<8x1xf32>
    %955 = vector.extract_strided_slice %952 {offsets = [16, 0], sizes = [8, 1], strides = [1, 1]} : vector<64x1xf32> to vector<8x1xf32>
    %956 = vector.extract_strided_slice %952 {offsets = [24, 0], sizes = [8, 1], strides = [1, 1]} : vector<64x1xf32> to vector<8x1xf32>
    %957 = vector.extract_strided_slice %952 {offsets = [32, 0], sizes = [8, 1], strides = [1, 1]} : vector<64x1xf32> to vector<8x1xf32>
    %958 = vector.extract_strided_slice %952 {offsets = [40, 0], sizes = [8, 1], strides = [1, 1]} : vector<64x1xf32> to vector<8x1xf32>
    %959 = vector.extract_strided_slice %952 {offsets = [48, 0], sizes = [8, 1], strides = [1, 1]} : vector<64x1xf32> to vector<8x1xf32>
    %960 = vector.extract_strided_slice %952 {offsets = [56, 0], sizes = [8, 1], strides = [1, 1]} : vector<64x1xf32> to vector<8x1xf32>
    %961 = arith.maximumf %953, %954 : vector<8x1xf32>
    %962 = arith.maximumf %961, %955 : vector<8x1xf32>
    %963 = arith.maximumf %962, %956 : vector<8x1xf32>
    %964 = arith.maximumf %963, %957 : vector<8x1xf32>
    %965 = arith.maximumf %964, %958 : vector<8x1xf32>
    %966 = arith.maximumf %965, %959 : vector<8x1xf32>
    %967 = arith.maximumf %966, %960 : vector<8x1xf32>
    %968 = arith.subf %953, %967 : vector<8x1xf32>
    %969 = math.exp %968 : vector<8x1xf32>
    %970 = arith.subf %954, %967 : vector<8x1xf32>
    %971 = math.exp %970 : vector<8x1xf32>
    %972 = arith.subf %955, %967 : vector<8x1xf32>
    %973 = math.exp %972 : vector<8x1xf32>
    %974 = arith.subf %956, %967 : vector<8x1xf32>
    %975 = math.exp %974 : vector<8x1xf32>
    %976 = arith.subf %957, %967 : vector<8x1xf32>
    %977 = math.exp %976 : vector<8x1xf32>
    %978 = arith.subf %958, %967 : vector<8x1xf32>
    %979 = math.exp %978 : vector<8x1xf32>
    %980 = arith.subf %959, %967 : vector<8x1xf32>
    %981 = math.exp %980 : vector<8x1xf32>
    %982 = arith.subf %960, %967 : vector<8x1xf32>
    %983 = math.exp %982 : vector<8x1xf32>
    %984 = arith.addf %969, %971 : vector<8x1xf32>
    %985 = arith.addf %984, %973 : vector<8x1xf32>
    %986 = arith.addf %985, %975 : vector<8x1xf32>
    %987 = arith.addf %986, %977 : vector<8x1xf32>
    %988 = arith.addf %987, %979 : vector<8x1xf32>
    %989 = arith.addf %988, %981 : vector<8x1xf32>
    %990 = arith.addf %989, %983 : vector<8x1xf32>
    %991 = vector.extract_strided_slice %788 {offsets = [0, 0], sizes = [8, 32], strides = [1, 1]} : vector<64x32xf32> to vector<8x32xf32>
    %992 = vector.broadcast %969 : vector<8x1xf32> to vector<8x32xf32>
    %993 = arith.mulf %992, %991 : vector<8x32xf32>
    %994 = vector.extract_strided_slice %936 {offsets = [0, 0], sizes = [8, 32], strides = [1, 1]} : vector<64x32xf32> to vector<8x32xf32>
    %995 = vector.broadcast %969 : vector<8x1xf32> to vector<8x32xf32>
    %996 = arith.mulf %995, %994 : vector<8x32xf32>
    %997 = vector.extract_strided_slice %788 {offsets = [8, 0], sizes = [8, 32], strides = [1, 1]} : vector<64x32xf32> to vector<8x32xf32>
    %998 = vector.broadcast %971 : vector<8x1xf32> to vector<8x32xf32>
    %999 = arith.mulf %998, %997 : vector<8x32xf32>
    %1000 = arith.addf %993, %999 : vector<8x32xf32>
    %1001 = vector.extract_strided_slice %936 {offsets = [8, 0], sizes = [8, 32], strides = [1, 1]} : vector<64x32xf32> to vector<8x32xf32>
    %1002 = vector.broadcast %971 : vector<8x1xf32> to vector<8x32xf32>
    %1003 = arith.mulf %1002, %1001 : vector<8x32xf32>
    %1004 = arith.addf %996, %1003 : vector<8x32xf32>
    %1005 = vector.extract_strided_slice %788 {offsets = [16, 0], sizes = [8, 32], strides = [1, 1]} : vector<64x32xf32> to vector<8x32xf32>
    %1006 = vector.broadcast %973 : vector<8x1xf32> to vector<8x32xf32>
    %1007 = arith.mulf %1006, %1005 : vector<8x32xf32>
    %1008 = arith.addf %1000, %1007 : vector<8x32xf32>
    %1009 = vector.extract_strided_slice %936 {offsets = [16, 0], sizes = [8, 32], strides = [1, 1]} : vector<64x32xf32> to vector<8x32xf32>
    %1010 = vector.broadcast %973 : vector<8x1xf32> to vector<8x32xf32>
    %1011 = arith.mulf %1010, %1009 : vector<8x32xf32>
    %1012 = arith.addf %1004, %1011 : vector<8x32xf32>
    %1013 = vector.extract_strided_slice %788 {offsets = [24, 0], sizes = [8, 32], strides = [1, 1]} : vector<64x32xf32> to vector<8x32xf32>
    %1014 = vector.broadcast %975 : vector<8x1xf32> to vector<8x32xf32>
    %1015 = arith.mulf %1014, %1013 : vector<8x32xf32>
    %1016 = arith.addf %1008, %1015 : vector<8x32xf32>
    %1017 = vector.extract_strided_slice %936 {offsets = [24, 0], sizes = [8, 32], strides = [1, 1]} : vector<64x32xf32> to vector<8x32xf32>
    %1018 = vector.broadcast %975 : vector<8x1xf32> to vector<8x32xf32>
    %1019 = arith.mulf %1018, %1017 : vector<8x32xf32>
    %1020 = arith.addf %1012, %1019 : vector<8x32xf32>
    %1021 = vector.extract_strided_slice %788 {offsets = [32, 0], sizes = [8, 32], strides = [1, 1]} : vector<64x32xf32> to vector<8x32xf32>
    %1022 = vector.broadcast %977 : vector<8x1xf32> to vector<8x32xf32>
    %1023 = arith.mulf %1022, %1021 : vector<8x32xf32>
    %1024 = arith.addf %1016, %1023 : vector<8x32xf32>
    %1025 = vector.extract_strided_slice %936 {offsets = [32, 0], sizes = [8, 32], strides = [1, 1]} : vector<64x32xf32> to vector<8x32xf32>
    %1026 = vector.broadcast %977 : vector<8x1xf32> to vector<8x32xf32>
    %1027 = arith.mulf %1026, %1025 : vector<8x32xf32>
    %1028 = arith.addf %1020, %1027 : vector<8x32xf32>
    %1029 = vector.extract_strided_slice %788 {offsets = [40, 0], sizes = [8, 32], strides = [1, 1]} : vector<64x32xf32> to vector<8x32xf32>
    %1030 = vector.broadcast %979 : vector<8x1xf32> to vector<8x32xf32>
    %1031 = arith.mulf %1030, %1029 : vector<8x32xf32>
    %1032 = arith.addf %1024, %1031 : vector<8x32xf32>
    %1033 = vector.extract_strided_slice %936 {offsets = [40, 0], sizes = [8, 32], strides = [1, 1]} : vector<64x32xf32> to vector<8x32xf32>
    %1034 = vector.broadcast %979 : vector<8x1xf32> to vector<8x32xf32>
    %1035 = arith.mulf %1034, %1033 : vector<8x32xf32>
    %1036 = arith.addf %1028, %1035 : vector<8x32xf32>
    %1037 = vector.extract_strided_slice %788 {offsets = [48, 0], sizes = [8, 32], strides = [1, 1]} : vector<64x32xf32> to vector<8x32xf32>
    %1038 = vector.broadcast %981 : vector<8x1xf32> to vector<8x32xf32>
    %1039 = arith.mulf %1038, %1037 : vector<8x32xf32>
    %1040 = arith.addf %1032, %1039 : vector<8x32xf32>
    %1041 = vector.extract_strided_slice %936 {offsets = [48, 0], sizes = [8, 32], strides = [1, 1]} : vector<64x32xf32> to vector<8x32xf32>
    %1042 = vector.broadcast %981 : vector<8x1xf32> to vector<8x32xf32>
    %1043 = arith.mulf %1042, %1041 : vector<8x32xf32>
    %1044 = arith.addf %1036, %1043 : vector<8x32xf32>
    %1045 = vector.extract_strided_slice %788 {offsets = [56, 0], sizes = [8, 32], strides = [1, 1]} : vector<64x32xf32> to vector<8x32xf32>
    %1046 = vector.broadcast %983 : vector<8x1xf32> to vector<8x32xf32>
    %1047 = arith.mulf %1046, %1045 : vector<8x32xf32>
    %1048 = arith.addf %1040, %1047 : vector<8x32xf32>
    %1049 = vector.extract_strided_slice %936 {offsets = [56, 0], sizes = [8, 32], strides = [1, 1]} : vector<64x32xf32> to vector<8x32xf32>
    %1050 = vector.broadcast %983 : vector<8x1xf32> to vector<8x32xf32>
    %1051 = arith.mulf %1050, %1049 : vector<8x32xf32>
    %1052 = arith.addf %1044, %1051 : vector<8x32xf32>
    %cst_148 = arith.constant 1.000000e+00 : f32
    %1053 = vector.broadcast %cst_148 : f32 to vector<8x1xf32>
    %1054 = arith.divf %1053, %990 : vector<8x1xf32>
    %1055 = vector.broadcast %1054 : vector<8x1xf32> to vector<8x32xf32>
    %1056 = arith.mulf %1048, %1055 : vector<8x32xf32>
    %1057 = vector.broadcast %1054 : vector<8x1xf32> to vector<8x32xf32>
    %1058 = arith.mulf %1052, %1057 : vector<8x32xf32>
    %c0_149 = arith.constant 0 : index
    %c0_150 = arith.constant 0 : index
    %1059 = vector.load %arg15[%c0_149, %c0_150] : memref<64x32xf32, #tpu.memory_space<vmem>>, vector<64x32xf32>
    %1060 = vector.extract_strided_slice %1059 {offsets = [0, 0], sizes = [32, 32], strides = [1, 1]} : vector<64x32xf32> to vector<32x32xf32>
    %cst_151 = arith.constant dense<0.000000e+00> : vector<8x32xf32>
    %1061 = tpu.matmul %1056, %1060, %cst_151 {dimension_numbers = #tpu.dot_dimension_numbers<[1], [0], [0], [1], [0, 0, 1, 1], [], []>} : vector<8x32xf32>, vector<32x32xf32>, vector<8x32xf32> -> vector<8x32xf32>
    %1062 = vector.extract_strided_slice %1059 {offsets = [32, 0], sizes = [32, 32], strides = [1, 1]} : vector<64x32xf32> to vector<32x32xf32>
    %cst_152 = arith.constant dense<0.000000e+00> : vector<8x32xf32>
    %1063 = tpu.matmul %1058, %1062, %cst_152 {dimension_numbers = #tpu.dot_dimension_numbers<[1], [0], [0], [1], [0, 0, 1, 1], [], []>} : vector<8x32xf32>, vector<32x32xf32>, vector<8x32xf32> -> vector<8x32xf32>
    %1064 = arith.addf %1061, %1063 : vector<8x32xf32>
    %c0_153 = arith.constant 0 : index
    %c0_154 = arith.constant 0 : index
    %1065 = vector.load %arg16[%c0_153, %c0_154] : memref<1x32xf32, #tpu.memory_space<vmem>>, vector<1x32xf32>
    %1066 = vector.broadcast %1065 : vector<1x32xf32> to vector<8x32xf32>
    %1067 = arith.addf %1064, %1066 : vector<8x32xf32>
    %cst_155 = arith.constant 0.000000e+00 : f32
    %1068 = vector.broadcast %cst_155 : f32 to vector<8x32xf32>
    %1069 = arith.maximumf %1067, %1068 : vector<8x32xf32>
    %c0_156 = arith.constant 0 : index
    %c0_157 = arith.constant 0 : index
    %1070 = vector.load %arg17[%c0_156, %c0_157] : memref<1x32xf32, #tpu.memory_space<vmem>>, vector<1x32xf32>
    %1071 = vector.broadcast %1070 : vector<1x32xf32> to vector<8x32xf32>
    %1072 = arith.mulf %1069, %1071 : vector<8x32xf32>
    %c0_158 = arith.constant 0 : index
    %c0_159 = arith.constant 0 : index
    %1073 = vector.load %arg18[%c0_158, %c0_159] : memref<1x32xf32, #tpu.memory_space<vmem>>, vector<1x32xf32>
    %1074 = vector.broadcast %1073 : vector<1x32xf32> to vector<8x32xf32>
    %1075 = arith.addf %1072, %1074 : vector<8x32xf32>
    %c0_160 = arith.constant 0 : index
    %c0_161 = arith.constant 0 : index
    %1076 = vector.load %arg19[%c0_160, %c0_161] : memref<32x128xf32, #tpu.memory_space<vmem>>, vector<32x128xf32>
    %cst_162 = arith.constant dense<0.000000e+00> : vector<8x128xf32>
    %1077 = tpu.matmul %1075, %1076, %cst_162 {dimension_numbers = #tpu.dot_dimension_numbers<[1], [0], [0], [1], [0, 0, 1, 1], [], []>} : vector<8x32xf32>, vector<32x128xf32>, vector<8x128xf32> -> vector<8x128xf32>
    %c0_163 = arith.constant 0 : index
    %c0_164 = arith.constant 0 : index
    %1078 = vector.load %arg20[%c0_163, %c0_164] : memref<1x128xf32, #tpu.memory_space<vmem>>, vector<1x128xf32>
    %1079 = vector.broadcast %1078 : vector<1x128xf32> to vector<8x128xf32>
    %1080 = arith.addf %1077, %1079 : vector<8x128xf32>
    %c0_165 = arith.constant 0 : index
    %c0_166 = arith.constant 0 : index
    %1081 = vector.load %arg21[%c0_165, %c0_166] : memref<8x128xf32, #tpu.memory_space<vmem>>, vector<8x128xf32>
    tpu.vector_store %arg21[%c0_165, %c0_166], %1080 {strides = array<i32>} : memref<8x128xf32, #tpu.memory_space<vmem>>, vector<8x128xf32>,
    return
  }
}

</mosaic_0001>

<bundles_post_ra>
// kernel: tpu_custom_call.1
= control target key start
LH: loop header
LB: loop body
LE: loop exit
PB: predicated region body
PF: predicated region fallthrough
CT: control target
= control target key end

     0   :  { %s10643_s0 = inlined_call_operand.vmem [shape: f32[64,32], index: 0, kind: input, shape index: {}]   ;;  %s10644_s1 = inlined_call_operand.hbm [shape: f32[64,128], index: 1, kind: input, shape index: {}]   ;;  %s10645_s2 = inlined_call_operand.vmem [shape: f32[1,128], index: 2, kind: input, shape index: {}]   ;;  %s10646_s3 = inlined_call_operand.hbm [shape: f32[64,128], index: 3, kind: input, shape index: {}]   ;;  %s10647_s4 = inlined_call_operand.hbm [shape: f32[1,128], index: 4, kind: input, shape index: {}]   ;;  %s10648_s5 = inlined_call_operand.vmem [shape: f32[96,128], index: 5, kind: input, shape index: {}]   ;;  %s10649_s6 = inlined_call_operand.hbm [shape: f32[1,128], index: 6, kind: input, shape index: {}]   ;;  %s10650_s7 = inlined_call_operand.vmem [shape: f32[96,128], index: 7, kind: input, shape index: {}]   ;;  %s10651_s8 = inlined_call_operand.hbm [shape: f32[1,128], index: 8, kind: input, shape index: {}]   ;;  %s10652_s9 = inlined_call_operand.hbm [shape: f32[96,128], index: 9, kind: input, shape index: {}]   ;;  %s10653_s10 = inlined_call_operand.hbm [shape: f32[1,128], index: 10, kind: input, shape index: {}]   ;;  %s10654_s11 = inlined_call_operand.hbm [shape: f32[96,128], index: 11, kind: input, shape index: {}]   ;;  %s10655_s12 = inlined_call_operand.hbm [shape: f32[1,128], index: 12, kind: input, shape index: {}]   ;;  %s10656_s13 = inlined_call_operand.hbm [shape: f32[1,64], index: 13, kind: input, shape index: {}]   ;;  %s10657_s14 = inlined_call_operand.<no memory space> [shape: f32[1,1], index: 14, kind: input, shape index: {}]   ;;  %s10658_s15 = inlined_call_operand.vmem [shape: f32[64,32], index: 15, kind: input, shape index: {}]   ;;  %s10659_s16 = inlined_call_operand.hbm [shape: f32[1,32], index: 16, kind: input, shape index: {}]   ;;  %s10660_s17 = inlined_call_operand.hbm [shape: f32[1,32], index: 17, kind: input, shape index: {}]   ;;  %s10661_s18 = inlined_call_operand.hbm [shape: f32[1,32], index: 18, kind: input, shape index: {}]   ;;  %s10662_s19 = inlined_call_operand.vmem [shape: f32[32,128], index: 19, kind: input, shape index: {}]   ;;  %s10663_s20 = inlined_call_operand.vmem [shape: f32[1,128], index: 20, kind: input, shape index: {}]   ;;  %s10664_s21 = inlined_call_operand.hbm [shape: f32[8,128], index: 21, kind: output, shape index: {}]  }
   0x1   :  { %10667 = sst [smem:[#allocation33_spill]] %s10643_s0  ;;  %v26_v0 = vstv %s10657_s14 }
   0x2   :  { %10668 = sst [smem:[#allocation34_spill]] %s10644_s1  ;;  %27 = vst [vmem:[#allocation2] sm:$0x1] %v26_v0 }
   0x3   :  { %10669 = sst [smem:[#allocation35_spill]] %s10645_s2 }
   0x4   :  { %10670 = sst [smem:[#allocation36_spill]] %s10646_s3 }
   0x5   :  { %10671 = sst [smem:[#allocation37_spill]] %s10647_s4 }
   0x6   :  { %10672 = sst [smem:[#allocation38_spill]] %s10648_s5 }
   0x7   :  { %28 = vsyncpa [#allocation4], 0 }
   0x8   :  { %29 = vsyncpa [#allocation7], 0 }
   0x9   :  { %30 = vsyncpa [#allocation10], 0 }
   0xa   :  { %31 = vsyncpa [#allocation13], 0 }
   0xb   :  { %32 = vsyncpa [#allocation16], 0 }
   0xc   :  { %33 = vsyncpa [#allocation19], 0 }
   0xd   :  { %34 = vsyncpa [#allocation22], 0 }
   0xe   :  { %35 = vsyncpa [#allocation5], 0  ;;  %s8879_s26 = smov [#allocation6]   ;;  %s8880_s3 = smov [#allocation9]  }
   0xf   :  { %s57_s27 = sshll.u32 %s8879_s26, 4  ;;  %s82_s28 = sshll.u32 %s8880_s3, 4  ;;  %s58_s27 = int_to_ptr.vmem [resolvable:$true] %s57_s27  ;;  %s83_s28 = int_to_ptr.vmem [resolvable:$true] %s82_s28 }
  0x10   :  { %s8591_s29 = scalar_lea.vmem %s58_s27, 1024  ;;  %p8596_p1 = scmp.lt.s32.totalorder %s58_s27, %s58_s27 }
  0x11   :  { %p8592_p0 = scmp.ne.s32.totalorder %s58_s27, %s8591_s29  ;;  %p8597_p2 = scmp.lt.s32.totalorder %s8591_s29, %s8591_s29 }
  0x13   :  { %p8598_p3 = por %p8597_p2, %p8596_p1 }
  0x15   :  { %p8599_p4 = pnand %p8598_p3, %p8592_p0 }
  0x17   :  { %8602 = shalt.err (!%p8599_p4)
}
  0x18   :  { %s8881_s14 = smov 128   ;;  %s8882_s0 = smov 8  }
  0x19   :  { %s10673_s5 = sld [smem:[#allocation36_spill]]  ;;  %s8611_s22 = scalar_lea.vmem %s83_s28, 16 }
  0x1a   :  { %p8612_p5 = scmp.ne.s32.totalorder %s83_s28, %s8611_s22  ;;  %s8615_s23 = scalar_lea.vmem %s83_s28, 32 }
  0x1b   :  { %p8616_p6 = scmp.lt.s32.totalorder %s83_s28, %s83_s28  ;;  %p8617_p7 = scmp.lt.s32.totalorder %s8615_s23, %s8611_s22 }
  0x1d   :  { %p8618_p8 = por %p8617_p7, %p8616_p6 }
  0x1f   :  { %63 = dma.hbm_to_vmem [thread:$0]  %s10673_s5, 1024, %s58_s27, [#allocation7], %s8881_s14, %s8881_s14, %s8882_s0  }
  0x20   :  { %p8619_p9 = pnand %p8618_p8, %p8612_p5 }
  0x22   :  { %8622 = shalt.err (!%p8619_p9)
}
  0x23   :  { %85 = dma.hbm_to_vmem [thread:$0]  %s10649_s6, 16, %s83_s28, [#allocation10]  }
  0x24   :  { %s8883_s2 = smov [#allocation12]   ;;  %s8884_s26 = smov [#allocation15]  }
  0x25   :  { %s103_s25 = sshll.u32 %s8883_s2, 4  ;;  %s125_s3 = sshll.u32 %s8884_s26, 4  ;;  %s104_s25 = int_to_ptr.vmem [resolvable:$true] %s103_s25  ;;  %s126_s3 = int_to_ptr.vmem [resolvable:$true] %s125_s3 }
  0x26   :  { %s8631_s29 = scalar_lea.vmem %s104_s25, 1536  ;;  %p8636_p11 = scmp.lt.s32.totalorder %s104_s25, %s104_s25 }
  0x27   :  { %p8632_p10 = scmp.ne.s32.totalorder %s104_s25, %s8631_s29  ;;  %p8637_p12 = scmp.lt.s32.totalorder %s8631_s29, %s8631_s29 }
  0x29   :  { %p8638_p13 = por %p8637_p12, %p8636_p11 }
  0x2b   :  { %p8639_p0 = pnand %p8638_p13, %p8632_p10 }
  0x2d   :  { %8642 = shalt.err (!%p8639_p0)
}
  0x2e   :  { %109 = dma.hbm_to_vmem [thread:$0]  %s10652_s9, 1536, %s104_s25, [#allocation13], %s8881_s14, %s8881_s14, %s8882_s0  }
  0x2f   :  { %s8651_s6 = scalar_lea.vmem %s126_s3, 1536  ;;  %p8656_p2 = scmp.lt.s32.totalorder %s126_s3, %s126_s3 }
  0x30   :  { %p8652_p1 = scmp.ne.s32.totalorder %s126_s3, %s8651_s6  ;;  %p8657_p3 = scmp.lt.s32.totalorder %s8651_s6, %s8651_s6 }
  0x32   :  { %p8658_p4 = por %p8657_p3, %p8656_p2 }
  0x34   :  { %p8659_p5 = pnand %p8658_p4, %p8652_p1 }
  0x36   :  { %8662 = shalt.err (!%p8659_p5)
}
  0x37   :  { %131 = dma.hbm_to_vmem [thread:$0]  %s10654_s11, 1536, %s126_s3, [#allocation16], %s8881_s14, %s8881_s14, %s8882_s0  }
  0x38   :  { %s8885_s5 = smov [#allocation18]   ;;  %s8886_s23 = smov [#allocation21]  }
  0x39   :  { %s148_s22 = sshll.u32 %s8885_s5, 4  ;;  %s172_s1 = sshll.u32 %s8886_s23, 4  ;;  %s149_s22 = int_to_ptr.vmem [resolvable:$true] %s148_s22  ;;  %s173_s1 = int_to_ptr.vmem [resolvable:$true] %s172_s1 }
  0x3a   :  { %s8671_s9 = scalar_lea.vmem %s149_s22, 16  ;;  %s8675_s24 = scalar_lea.vmem %s149_s22, 32 }
  0x3b   :  { %p8672_p6 = scmp.ne.s32.totalorder %s149_s22, %s8671_s9  ;;  %p8676_p7 = scmp.lt.s32.totalorder %s149_s22, %s149_s22 }
  0x3c   :  { %p8677_p8 = scmp.lt.s32.totalorder %s8675_s24, %s8671_s9 }
  0x3e   :  { %p8678_p9 = por %p8677_p8, %p8676_p7 }
  0x40   :  { %p8679_p10 = pnand %p8678_p9, %p8672_p6 }
  0x42   :  { %8682 = shalt.err (!%p8679_p10)
}
  0x43   :  { %151 = dma.hbm_to_vmem [thread:$0]  %s10656_s13, 16, %s149_s22, [#allocation19]  }
  0x44   :  { %s8691_s26 = scalar_lea.vmem %s173_s1, 16  ;;  %s8695_s11 = scalar_lea.vmem %s173_s1, 32 }
  0x45   :  { %p8692_p11 = scmp.ne.s32.totalorder %s173_s1, %s8691_s26  ;;  %p8696_p12 = scmp.lt.s32.totalorder %s173_s1, %s173_s1 }
  0x46   :  { %p8697_p13 = scmp.lt.s32.totalorder %s8695_s11, %s8691_s26 }
  0x48   :  { %p8698_p0 = por %p8697_p13, %p8696_p12 }
  0x4a   :  { %p8699_p1 = pnand %p8698_p0, %p8692_p11 }
  0x4c   :  { %8702 = shalt.err (!%p8699_p1)
}
  0x4d   :  { %175 = dma.hbm_to_vmem [thread:$0]  %s10660_s17, 16, %s173_s1, [#allocation22]  }
  0x4e   :  { %s8887_s27 = smov [#allocation3]   ;;  %s8888_s6 = smov [#allocation8]  }
  0x4f   :  { %s43_s4 = sshll.u32 %s8887_s27, 4  ;;  %s70_s28 = sshll.u32 %s8888_s6, 4  ;;  %s44_s4 = int_to_ptr.vmem [resolvable:$true] %s43_s4  ;;  %s71_s28 = int_to_ptr.vmem [resolvable:$true] %s70_s28 }
  0x50   :  { %s8711_s30 = scalar_lea.vmem %s44_s4, 1024  ;;  %p8716_p3 = scmp.lt.s32.totalorder %s44_s4, %s44_s4 }
  0x51   :  { %p8712_p2 = scmp.ne.s32.totalorder %s44_s4, %s8711_s30  ;;  %p8717_p4 = scmp.lt.s32.totalorder %s8711_s30, %s8711_s30 }
  0x53   :  { %p8718_p5 = por %p8717_p4, %p8716_p3 }
  0x55   :  { %p8719_p6 = pnand %p8718_p5, %p8712_p2 }
  0x57   :  { %8722 = shalt.err (!%p8719_p6)
}
  0x58   :  { %s10674_s22 = sld [smem:[#allocation34_spill]]  ;;  %s8731_s17 = scalar_lea.vmem %s71_s28, 16 }
  0x59   :  { %p8732_p7 = scmp.ne.s32.totalorder %s71_s28, %s8731_s17  ;;  %s8735_s23 = scalar_lea.vmem %s71_s28, 32 }
  0x5a   :  { %p8736_p8 = scmp.lt.s32.totalorder %s71_s28, %s71_s28  ;;  %p8737_p9 = scmp.lt.s32.totalorder %s8735_s23, %s8731_s17 }
  0x5c   :  { %p8738_p10 = por %p8737_p9, %p8736_p8 }
  0x5e   :  { %49 = dma.hbm_to_vmem [thread:$0]  %s10674_s22, 1024, %s44_s4, [#allocation4], %s8881_s14, %s8881_s14, %s8882_s0  }
  0x5f   :  { %p8739_p11 = pnand %p8738_p10, %p8732_p7 }
  0x61   :  { %8742 = shalt.err (!%p8739_p11)
}
  0x62   :  { %s10675_s24 = sld [smem:[#allocation37_spill]]  ;;  %s8889_s2 = smov [#allocation11]  }
  0x63   :  { %s94_s25 = sshll.u32 %s8889_s2, 4  ;;  %s8890_s26 = smov [#allocation14]   ;;  %s95_s25 = int_to_ptr.vmem [resolvable:$true] %s94_s25 }
  0x64   :  { %s116_s11 = sshll.u32 %s8890_s26, 4  ;;  %s8751_s3 = scalar_lea.vmem %s95_s25, 16  ;;  %s117_s11 = int_to_ptr.vmem [resolvable:$true] %s116_s11 }
  0x65   :  { %p8752_p12 = scmp.ne.s32.totalorder %s95_s25, %s8751_s3  ;;  %s8755_s14 = scalar_lea.vmem %s95_s25, 32 }
  0x66   :  { %p8756_p13 = scmp.lt.s32.totalorder %s95_s25, %s95_s25  ;;  %p8757_p0 = scmp.lt.s32.totalorder %s8755_s14, %s8751_s3 }
  0x68   :  { %73 = dma.hbm_to_vmem [thread:$0]  %s10675_s24, 16, %s71_s28, [#allocation7]  }
  0x69   :  { %p8758_p1 = por %p8757_p0, %p8756_p13 }
  0x6b   :  { %p8759_p2 = pnand %p8758_p1, %p8752_p12 }
  0x6d   :  { %8762 = shalt.err (!%p8759_p2)
}
  0x6e   :  { %97 = dma.hbm_to_vmem [thread:$0]  %s10651_s8, 16, %s95_s25, [#allocation10]  }
  0x6f   :  { %s8771_s27 = scalar_lea.vmem %s117_s11, 16  ;;  %s8775_s4 = scalar_lea.vmem %s117_s11, 32 }
  0x70   :  { %p8772_p3 = scmp.ne.s32.totalorder %s117_s11, %s8771_s27  ;;  %p8776_p4 = scmp.lt.s32.totalorder %s117_s11, %s117_s11 }
  0x71   :  { %p8777_p5 = scmp.lt.s32.totalorder %s8775_s4, %s8771_s27 }
  0x73   :  { %p8778_p6 = por %p8777_p5, %p8776_p4 }
  0x75   :  { %p8779_p7 = pnand %p8778_p6, %p8772_p3 }
  0x77   :  { %8782 = shalt.err (!%p8779_p7)
}
  0x78   :  { %119 = dma.hbm_to_vmem [thread:$0]  %s10653_s10, 16, %s117_s11, [#allocation13]  }
  0x79   :  { %s8891_s30 = smov [#allocation17]   ;;  %s8892_s5 = smov [#allocation20]  }
  0x7a   :  { %s138_s13 = sshll.u32 %s8891_s30, 4  ;;  %s162_s22 = sshll.u32 %s8892_s5, 4  ;;  %s139_s13 = int_to_ptr.vmem [resolvable:$true] %s138_s13  ;;  %s163_s22 = int_to_ptr.vmem [resolvable:$true] %s162_s22 }
  0x7b   :  { %s8791_s17 = scalar_lea.vmem %s139_s13, 16  ;;  %s8795_s8 = scalar_lea.vmem %s139_s13, 32 }
  0x7c   :  { %p8792_p8 = scmp.ne.s32.totalorder %s139_s13, %s8791_s17  ;;  %p8796_p9 = scmp.lt.s32.totalorder %s139_s13, %s139_s13 }
  0x7d   :  { %p8797_p10 = scmp.lt.s32.totalorder %s8795_s8, %s8791_s17 }
  0x7f   :  { %p8798_p11 = por %p8797_p10, %p8796_p9 }
  0x81   :  { %p8799_p12 = pnand %p8798_p11, %p8792_p8 }
  0x83   :  { %8802 = shalt.err (!%p8799_p12)
}
  0x84   :  { %141 = dma.hbm_to_vmem [thread:$0]  %s10655_s12, 16, %s139_s13, [#allocation16]  }
  0x85   :  { %s8811_s9 = scalar_lea.vmem %s163_s22, 16  ;;  %s8815_s10 = scalar_lea.vmem %s163_s22, 32 }
  0x86   :  { %p8812_p13 = scmp.ne.s32.totalorder %s163_s22, %s8811_s9  ;;  %p8816_p0 = scmp.lt.s32.totalorder %s163_s22, %s163_s22 }
  0x87   :  { %p8817_p1 = scmp.lt.s32.totalorder %s8815_s10, %s8811_s9 }
  0x89   :  { %p8818_p2 = por %p8817_p1, %p8816_p0 }
  0x8b   :  { %p8819_p3 = pnand %p8818_p2, %p8812_p13 }
  0x8d   :  { %8822 = shalt.err (!%p8819_p3)
}
  0x8e   :  { %165 = dma.hbm_to_vmem [thread:$0]  %s10659_s16, 16, %s163_s22, [#allocation19]  }
  0x8f   :  { %s8893_s25 = smov [#allocation23]  }
  0x90   :  { %s182_s26 = sshll.u32 %s8893_s25, 4  ;;  %s183_s26 = int_to_ptr.vmem [resolvable:$true] %s182_s26 }
  0x91   :  { %s8831_s11 = scalar_lea.vmem %s183_s26, 16  ;;  %s8835_s3 = scalar_lea.vmem %s183_s26, 32 }
  0x92   :  { %p8832_p4 = scmp.ne.s32.totalorder %s183_s26, %s8831_s11  ;;  %p8836_p5 = scmp.lt.s32.totalorder %s183_s26, %s183_s26 }
  0x93   :  { %p8837_p6 = scmp.lt.s32.totalorder %s8835_s3, %s8831_s11 }
  0x95   :  { %p8838_p7 = por %p8837_p6, %p8836_p5 }
  0x97   :  { %p8839_p8 = pnand %p8838_p7, %p8832_p4 }
  0x99   :  { %8842 = shalt.err (!%p8839_p8)
}
  0x9a   :  { %185 = dma.hbm_to_vmem [thread:$0]  %s10661_s18, 16, %s183_s26, [#allocation22]  }
  0x9b   :  { %8863 = dma.done.wait [#allocation4], 1024  }
  0x9c   :  { %8864 = vsyncadd [#allocation4], 4294966272 }
  0x9d   :  { %8865 = dma.done.wait [#allocation7], 1040  }
  0x9e   :  { %8866 = vsyncadd [#allocation7], 4294966256 }
  0x9f   :  { %8867 = dma.done.wait [#allocation10], 32  }
  0xa0   :  { %8868 = vsyncadd [#allocation10], 4294967264 }
  0xa1   :  { %8869 = dma.done.wait [#allocation13], 1552  }
  0xa2   :  { %8870 = vsyncadd [#allocation13], 4294965744 }
  0xa3   :  { %8871 = dma.done.wait [#allocation16], 1552  }
  0xa4   :  { %8872 = vsyncadd [#allocation16], 4294965744 }
  0xa5   :  { %8873 = dma.done.wait [#allocation19], 32  }
  0xa6   :  { %8874 = vsyncadd [#allocation19], 4294967264 }
  0xa7   :  { %8875 = dma.done.wait [#allocation22], 32  }
  0xa8   :  { %8876 = vsyncadd [#allocation22], 4294967264  ;;  %vm260_vm0 = vcmask 261120   ;;  %v240_v1 = vld [vmem:[#allocation3 + $0x18] sm:$0xff]  ;;  %v239_v2 = vld [vmem:[#allocation3 + $0x10] sm:$0xff]  ;;  %s10676_s0 = sld [smem:[#allocation33_spill]] }
  0xa9   :  { %7380 = vmatprep.subr.mxu0 %v240_v1  ;;  %v238_v4 = vld [vmem:[#allocation3 + $0x8] sm:$0xff]  ;;  %v237_v5 = vld [vmem:[#allocation3] sm:$0xff]  ;;  %v9075_v7 = vld [vmem:[#allocation3 + $0x38] sm:$0xff]  ;;  %v8894_v9 = vmov 0.0   ;;  %vm8895_vm1 = vmmov 0   ;;  %s10677_s2 = sld [smem:[#allocation35_spill]] }
  0xaa   :  { %7381 = vmatpush3.msra.mxu0 %v240_v1  ;;  %v9085_v10 = vld [vmem:[#allocation3 + $0x30] sm:$0xff]  ;;  %v9101_v13 = vld [vmem:[#allocation3 + $0x28] sm:$0xff]  ;;  %v9107_v14 = vld [vmem:[#allocation3 + $0x20] sm:$0xff]  ;;  %s8896_s25 = smov 64   ;;  %s8897_s26 = smov 32  }
  0xab   :  { %7382 = vmatprep.subr.mxu0 %v239_v2  ;;  %v248_v48 = vld [vmem:[#allocation6 + $0x18] sm:$0xff]  ;;  %v247_v49 = vld [vmem:[#allocation6 + $0x10] sm:$0xff]  ;;  %v246_v50 = vld [vmem:[#allocation6 + $0x8] sm:$0xff]  ;;  %s10678_s12 = sld [smem:[#allocation38_spill]] }
  0xac   :  { %7383 = vmatpush3.msra.mxu0 %v239_v2  ;;  %7400 = vmatprep.subr.mxu1 %v248_v48  ;;  %v245_v51 = vld [vmem:[#allocation6] sm:$0xff] }
  0xad   :  { %7384 = vmatprep.subr.mxu0 %v238_v4  ;;  %7401 = vmatpush3.msra.mxu1 %v248_v48  ;;  %v9198_v55 = vld [vmem:[#allocation8] ss:$0 sm:$0xff] }
  0xae   :  { %v229_v3 = vld [vmem:[%s10676_s0] sm:$0xff]  ;;  %7385 = vmatpush3.msra.mxu0 %v238_v4  ;;  %v9073_v6 = vld [vmem:[%s10676_s0 + $0x8] sm:$0xff]  ;;  %v9080_v8 = vld [vmem:[%s10676_s0 + $0x10] sm:$0xff]  ;;  %7402 = vmatprep.subr.mxu1 %v247_v49 }
  0xaf   :  { %7388 = vmatprep.mubr.msk.f32.mxu0 %vm260_vm0, %v229_v3  ;;  %7408 = vmatprep.mubr.msk.f32.mxu1 %vm260_vm0, %v229_v3  ;;  %v9093_v11 = vld [vmem:[%s10676_s0 + $0x18] sm:$0xff]  ;;  %v9099_v12 = vld [vmem:[%s10676_s0 + $0x20] sm:$0xff]  ;;  %v9114_v15 = vld [vmem:[%s10676_s0 + $0x28] sm:$0xff] }
  0xb0   :  { %7386 = vmatprep.subr.mxu0 %v237_v5  ;;  %v9120_v16 = vld [vmem:[%s10676_s0 + $0x30] sm:$0xff]  ;;  %v9132_v17 = vld [vmem:[%s10676_s0 + $0x38] sm:$0xff]  ;;  %v6820_v18 = vld [vmem:[%s10677_s2] ss:$0 sm:$0xff]  ;;  %7403 = vmatpush3.msra.mxu1 %v247_v49  ;;  %s8900_s2 = smov [#allocation24]  }
  0xb1   :  { %7387 = vmatpush3.msra.mxu0 %v237_v5  ;;  %7404 = vmatprep.subr.mxu1 %v246_v50  ;;  %s6805_s11 = sshll.u32 %s8900_s2, 4  ;;  %s6806_s11 = int_to_ptr.vmem [resolvable:$true] %s6805_s11 }
  0xb2   :  { %7389 = vmatmul.mubr.msk.f32.vlgmr.msra.gmra.mxu0 %vm260_vm0, %v9073_v6  ;;  %7420 = vmatprep.subr.mxu0 %v8894_v9  ;;  %p8848_p10 = scmp.lt.s32.totalorder %s6806_s11, %s6806_s11 }
  0xb3   :  { %7421 = vmatpush3.msra.mxu0 %v9075_v7  ;;  %7391 = vmatprep.mubr.msk.f32.mxu0 %vm260_vm0, %v9080_v8 }
  0xb4   :  { %7422 = vmatprep.subr.mxu0 %v8894_v9  ;;  %7405 = vmatpush3.msra.mxu1 %v246_v50 }
  0xb5   :  { %7423 = vmatpush3.msra.mxu0 %v9085_v10  ;;  %7406 = vmatprep.subr.mxu1 %v245_v51 }
  0xb6   :  { %7392 = vmatmul.mubr.msk.f32.gmra.mxu0 %vm260_vm0, %v9093_v11  ;;  %7424 = vmatprep.subr.mxu0 %v8894_v9 }
  0xb7   :  { %7394 = vmatprep.mubr.msk.f32.mxu0 %vm260_vm0, %v9099_v12  ;;  %7425 = vmatpush3.msra.mxu0 %v9101_v13 }
  0xb8   :  { %7426 = vmatprep.subr.mxu0 %v8894_v9  ;;  %7407 = vmatpush3.msra.mxu1 %v245_v51 }
  0xb9   :  { %7427 = vmatpush3.msra.mxu0 %v9107_v14  ;;  %7409 = vmatmul.mubr.msk.f32.vlgmr.msra.gmra.mxu1 %vm260_vm0, %v9073_v6 }
  0xba   :  { %7395 = vmatmul.mubr.msk.f32.gmra.mxu0 %vm260_vm0, %v9114_v15  ;;  %7442 = vmatprep.subr.mxu0 %v8894_v9 }
  0xbb   :  { %7397 = vmatprep.mubr.msk.f32.mxu0 %vm260_vm0, %v9120_v16  ;;  %7431 = vmatprep.subr.mxu1 %v8894_v9 }
  0xbc   :  { %7432 = vmatpush3.msra.mxu1 %v9075_v7  ;;  %7411 = vmatprep.mubr.msk.f32.mxu1 %vm260_vm0, %v9080_v8 }
  0xbd   :  { %7433 = vmatprep.subr.mxu1 %v8894_v9  ;;  %7412 = vmatmul.mubr.msk.f32.gmra.mxu1 %vm260_vm0, %v9093_v11 }
  0xbe   :  { %7398 = vmatmul.mubr.msk.f32.gmra.mxu0 %vm260_vm0, %v9132_v17  ;;  %7434 = vmatpush3.msra.mxu1 %v9085_v10 }
  0xbf   :  { %7428 = vmatprep.mubr.msk.f32.mxu0 %vm8895_vm1, %v8894_v9  ;;  %7435 = vmatprep.subr.mxu1 %v8894_v9 }
  0xc0   :  { %7414 = vmatprep.mubr.msk.f32.mxu1 %vm260_vm0, %v9099_v12  ;;  %7436 = vmatpush3.msra.mxu1 %v9101_v13 }
  0xc1   :  { %7437 = vmatprep.subr.mxu1 %v8894_v9  ;;  %7415 = vmatmul.mubr.msk.f32.gmra.mxu1 %vm260_vm0, %v9114_v15 }
  0xc2   :  { %7429 = vmatmul.mubr.f32.vlgmr.msra.gmra.mxu0 %v8894_v9  ;;  %7438 = vmatpush3.msra.mxu1 %v9107_v14 }
  0xc3   :  { %7443 = vmatpush3.msra.mxu0 %v9075_v7  ;;  %7450 = vmatprep.mubr.msk.f32.mxu0 %vm8895_vm1, %v8894_v9 }
  0xc4   :  { %7444 = vmatprep.subr.mxu0 %v8894_v9  ;;  %7453 = vmatprep.subr.mxu1 %v8894_v9 }
  0xc5   :  { %7445 = vmatpush3.msra.mxu0 %v9085_v10  ;;  %7417 = vmatprep.mubr.msk.f32.mxu1 %vm260_vm0, %v9120_v16 }
  0xc6   :  { %7446 = vmatprep.subr.mxu0 %v8894_v9  ;;  %7418 = vmatmul.mubr.msk.f32.gmra.mxu1 %vm260_vm0, %v9132_v17 }
  0xc7   :  { %7447 = vmatpush3.msra.mxu0 %v9101_v13  ;;  %7439 = vmatprep.mubr.msk.f32.mxu1 %vm8895_vm1, %v8894_v9 }
  0xc8   :  { %7448 = vmatprep.subr.mxu0 %v8894_v9 }
  0xc9   :  { %7449 = vmatpush3.msra.mxu0 %v9107_v14 }
  0xca   :  { %7464 = vmatprep.subr.mxu0 %v8894_v9 }
 0x172   :  { %v7390_v19 = vpop.f32.mrf.mxu0 }
 0x173   :  { %v9152_v20 = vadd.f32 %v7390_v19, %v6820_v18 }
 0x174   :  { %v351_v21 = vpop.f32.mrf.mxu0 }
 0x175   :  { %v352_v33 = vadd.f32 %v6820_v18, %v351_v21 }
 0x176   :  { %v7393_v22 = vpop.f32.mrf.mxu0 }
 0x177   :  { %v9154_v23 = vadd.f32 %v7393_v22, %v6820_v18 }
 0x178   :  { %v361_v24 = vpop.f32.mrf.mxu0 }
 0x179   :  { %v9156_v25 = vadd.f32 %v6820_v18, %v361_v24  ;;  %v7410_v56 = vpop.f32.mrf.mxu1 }
 0x17a   :  { %v7396_v26 = vpop.f32.mrf.mxu0  ;;  %v9201_v57 = vadd.f32 %v7410_v56, %v9198_v55 }
 0x17b   :  { %v9158_v27 = vadd.f32 %v7396_v26, %v6820_v18  ;;  %v463_v58 = vpop.f32.mrf.mxu1 }
 0x17c   :  { %v371_v28 = vpop.f32.mrf.mxu0  ;;  %v9204_v59 = vadd.f32 %v9198_v55, %v463_v58 }
 0x17d   :  { %v9160_v29 = vadd.f32 %v6820_v18, %v371_v28  ;;  %v7413_v60 = vpop.f32.mrf.mxu1 }
 0x17e   :  { %v7399_v30 = vpop.f32.mrf.mxu0  ;;  %v9207_v61 = vadd.f32 %v7413_v60, %v9198_v55 }
 0x17f   :  { %v9162_v31 = vadd.f32 %v7399_v30, %v6820_v18  ;;  %v473_v62 = vpop.f32.mrf.mxu1 }
 0x180   :  { %v381_v32 = vpop.f32.mrf.mxu0  ;;  %v9210_v63 = vadd.f32 %v9198_v55, %v473_v62 }
 0x181   :  { %v9164_v34 = vadd.f32 %v6820_v18, %v381_v32  ;;  %v7416_v0 = vpop.f32.mrf.mxu1 }
 0x182   :  { %v571_v35 = vpop.f32.mrf.mxu0  ;;  %v9213_v1 = vadd.f32 %v7416_v0, %v9198_v55 }
 0x183   :  { %v575_v36 = vadd.f32 %v571_v35, %v352_v33  ;;  %v483_v2 = vpop.f32.mrf.mxu1 }
 0x184   :  { %v7430_v37 = vpop.f32.mrf.mxu0  ;;  %v9216_v3 = vadd.f32 %v9198_v55, %v483_v2 }
 0x185   :  { %8165 = vtanh.f32 %v575_v36  ;;  %v6838_v39 = vmul.f32 -1.442695, %v575_v36 }
 0x186   :  { %v9232_v5 = vpop.f32.mrf.mxu1 }
 0x187   :  { %8167 = vpow2.f32 %v6838_v39 }
 0x188   :  { %v9234_v6 = vpop.f32.mrf.mxu1 }
 0x192   :  { %v8166_v38 = vpop.eup %8165 }
 0x193   :  { %585 = vrot.lane.b32.xlu0 %v8166_v38, %s8896_s25 }
 0x194   :  { %v8168_v40 = vpop.eup %8167 }
 0x195   :  { %v579_v41 = vadd.f32 1.0, %v8168_v40 }
 0x197   :  { %8169 = vrcp.f32 %v579_v41 }
 0x1a4   :  { %v8170_v42 = vpop.eup %8169 }
 0x1a5   :  { %v583_v45 = vmul.f32 0.0, %v8170_v42 }
 0x205   :  { %v586_v43 = vpop.permute.xlu0 %585 }
 0x206   :  { %v588_v44 = vmul.f32 %v8170_v42, %v586_v43 }
 0x208   :  { %590 = vrot.lane.b32.xlu0 %v588_v44, %s8897_s26 }
 0x27a   :  { %v591_v46 = vpop.permute.xlu0 %590 }
 0x27b   :  { %v9168_v47 = vadd.f32 %v591_v46, %v583_v45 }
 0x27d   :  { %8171 = vtanh.f32 %v9168_v47 }
 0x28a   :  { %v8172_v52 = vpop.eup %8171 }
 0x28b   :  { %596 = vrot.lane.b32.xlu1 %v8172_v52, %s8896_s25 }
 0x2fd   :  { %v597_v53 = vpop.permute.xlu1 %596 }
 0x2fe   :  { %v599_v54 = vmul.f32 %v8170_v42, %v597_v53 }
 0x300   :  { %601 = vrot.lane.b32.xlu1 %v599_v54, %s8897_s26 }
 0x372   :  { %v9218_v4 = vpop.permute.xlu1 %601 }
 0x373   :  { %7440 = vmatmul.mubr.msk.f32.vlgmr.msra.gmra.mxu1 %vm260_vm0, %v9218_v4 }
 0x374   :  { %7454 = vmatpush3.msra.mxu1 %v9075_v7  ;;  %7461 = vmatprep.mubr.msk.f32.mxu1 %vm8895_vm1, %v8894_v9 }
 0x375   :  { %7455 = vmatprep.subr.mxu1 %v8894_v9 }
 0x376   :  { %7456 = vmatpush3.msra.mxu1 %v9085_v10 }
 0x377   :  { %7457 = vmatprep.subr.mxu1 %v8894_v9 }
 0x378   :  { %7458 = vmatpush3.msra.mxu1 %v9101_v13 }
 0x379   :  { %7459 = vmatprep.subr.mxu1 %v8894_v9 }
 0x37a   :  { %7460 = vmatpush3.msra.mxu1 %v9107_v14 }
 0x37b   :  { %7475 = vmatprep.subr.mxu1 %v8894_v9 }
 0x433   :  { %v671_v8 = vpop.f32.mrf.mxu1 }
 0x434   :  { %v675_v11 = vadd.f32 %v671_v8, %v9152_v20 }
 0x435   :  { %v7441_v12 = vpop.f32.mrf.mxu1 }
 0x436   :  { %8173 = vtanh.f32 %v675_v11  ;;  %v6840_v16 = vmul.f32 -1.442695, %v675_v11 }
 0x438   :  { %8175 = vpow2.f32 %v6840_v16 }
 0x443   :  { %v8174_v15 = vpop.eup %8173 }
 0x444   :  { %685 = vrot.lane.b32.xlu0 %v8174_v15, %s8896_s25 }
 0x445   :  { %v8176_v17 = vpop.eup %8175 }
 0x446   :  { %v679_v18 = vadd.f32 1.0, %v8176_v17 }
 0x448   :  { %8177 = vrcp.f32 %v679_v18 }
 0x455   :  { %v8178_v19 = vpop.eup %8177 }
 0x456   :  { %v683_v24 = vmul.f32 %v8178_v19, %v9168_v47 }
 0x4b6   :  { %v686_v21 = vpop.permute.xlu0 %685 }
 0x4b7   :  { %v688_v22 = vmul.f32 %v8178_v19, %v686_v21 }
 0x4b9   :  { %690 = vrot.lane.b32.xlu1 %v688_v22, %s8897_s26 }
 0x52b   :  { %v691_v26 = vpop.permute.xlu1 %690 }
 0x52c   :  { %v693_v28 = vadd.f32 %v691_v26, %v683_v24 }
 0x52e   :  { %8179 = vtanh.f32 %v693_v28 }
 0x53b   :  { %v8180_v20 = vpop.eup %8179 }
 0x53c   :  { %696 = vrot.lane.b32.xlu0 %v8180_v20, %s8896_s25 }
 0x5ae   :  { %v697_v30 = vpop.permute.xlu0 %696 }
 0x5af   :  { %v699_v32 = vmul.f32 %v8178_v19, %v697_v30 }
 0x5b1   :  { %701 = vrot.lane.b32.xlu1 %v699_v32, %s8897_s26 }
 0x623   :  { %v9242_v33 = vpop.permute.xlu1 %701 }
 0x624   :  { %7451 = vmatmul.mubr.msk.f32.vlgmr.msra.gmra.mxu0 %vm260_vm0, %v9242_v33 }
 0x625   :  { %7465 = vmatpush3.msra.mxu0 %v9075_v7  ;;  %7472 = vmatprep.mubr.msk.f32.mxu0 %vm8895_vm1, %v8894_v9 }
 0x626   :  { %7466 = vmatprep.subr.mxu0 %v8894_v9 }
 0x627   :  { %7467 = vmatpush3.msra.mxu0 %v9085_v10 }
 0x628   :  { %7468 = vmatprep.subr.mxu0 %v8894_v9 }
 0x629   :  { %7469 = vmatpush3.msra.mxu0 %v9101_v13 }
 0x62a   :  { %7470 = vmatprep.subr.mxu0 %v8894_v9 }
 0x62b   :  { %7471 = vmatpush3.msra.mxu0 %v9107_v14 }
 0x62c   :  { %7486 = vmatprep.subr.mxu0 %v8894_v9 }
 0x6e4   :  { %v771_v35 = vpop.f32.mrf.mxu0 }
 0x6e5   :  { %v775_v36 = vadd.f32 %v771_v35, %v9156_v25 }
 0x6e6   :  { %v7452_v37 = vpop.f32.mrf.mxu0 }
 0x6e7   :  { %8181 = vtanh.f32 %v775_v36  ;;  %v6842_v39 = vmul.f32 -1.442695, %v775_v36 }
 0x6e9   :  { %8183 = vpow2.f32 %v6842_v39 }
 0x6f4   :  { %v8182_v38 = vpop.eup %8181 }
 0x6f5   :  { %785 = vrot.lane.b32.xlu0 %v8182_v38, %s8896_s25 }
 0x6f6   :  { %v8184_v40 = vpop.eup %8183 }
 0x6f7   :  { %v779_v41 = vadd.f32 1.0, %v8184_v40 }
 0x6f9   :  { %8185 = vrcp.f32 %v779_v41 }
 0x706   :  { %v8186_v42 = vpop.eup %8185 }
 0x707   :  { %v783_v45 = vmul.f32 %v8186_v42, %v693_v28 }
 0x767   :  { %v786_v43 = vpop.permute.xlu0 %785 }
 0x768   :  { %v788_v44 = vmul.f32 %v8186_v42, %v786_v43 }
 0x76a   :  { %790 = vrot.lane.b32.xlu1 %v788_v44, %s8897_s26 }
 0x7dc   :  { %v791_v46 = vpop.permute.xlu1 %790 }
 0x7dd   :  { %v793_v47 = vadd.f32 %v791_v46, %v783_v45 }
 0x7df   :  { %8187 = vtanh.f32 %v793_v47 }
 0x7ec   :  { %v8188_v25 = vpop.eup %8187 }
 0x7ed   :  { %796 = vrot.lane.b32.xlu0 %v8188_v25, %s8896_s25 }
 0x85f   :  { %v797_v48 = vpop.permute.xlu0 %796 }
 0x860   :  { %v799_v49 = vmul.f32 %v8186_v42, %v797_v48 }
 0x862   :  { %801 = vrot.lane.b32.xlu1 %v799_v49, %s8897_s26 }
 0x8d4   :  { %v9261_v50 = vpop.permute.xlu1 %801 }
 0x8d5   :  { %7462 = vmatmul.mubr.msk.f32.vlgmr.msra.gmra.mxu1 %vm260_vm0, %v9261_v50 }
 0x8d6   :  { %7476 = vmatpush3.msra.mxu1 %v9075_v7  ;;  %7483 = vmatprep.mubr.msk.f32.mxu1 %vm8895_vm1, %v8894_v9 }
 0x8d7   :  { %7477 = vmatprep.subr.mxu1 %v8894_v9 }
 0x8d8   :  { %7478 = vmatpush3.msra.mxu1 %v9085_v10 }
 0x8d9   :  { %7479 = vmatprep.subr.mxu1 %v8894_v9 }
 0x8da   :  { %7480 = vmatpush3.msra.mxu1 %v9101_v13 }
 0x8db   :  { %7481 = vmatprep.subr.mxu1 %v8894_v9 }
 0x8dc   :  { %7482 = vmatpush3.msra.mxu1 %v9107_v14 }
 0x8dd   :  { %7497 = vmatprep.subr.mxu1 %v8894_v9 }
 0x995   :  { %v871_v51 = vpop.f32.mrf.mxu1 }
 0x996   :  { %v875_v52 = vadd.f32 %v871_v51, %v9154_v23 }
 0x997   :  { %v7463_v53 = vpop.f32.mrf.mxu1 }
 0x998   :  { %8189 = vtanh.f32 %v875_v52  ;;  %v6844_v56 = vmul.f32 -1.442695, %v875_v52  ;;  %v9321_v52 = vld [vmem:[#allocation6 + $0x38] sm:$0xff] }
 0x99a   :  { %8191 = vpow2.f32 %v6844_v56  ;;  %v9333_v56 = vld [vmem:[#allocation6 + $0x28] sm:$0xff] }
 0x9a5   :  { %v8190_v54 = vpop.eup %8189 }
 0x9a6   :  { %885 = vrot.lane.b32.xlu0 %v8190_v54, %s8896_s25  ;;  %v9327_v54 = vld [vmem:[#allocation6 + $0x30] sm:$0xff] }
 0x9a7   :  { %v8192_v58 = vpop.eup %8191 }
 0x9a8   :  { %v879_v60 = vadd.f32 1.0, %v8192_v58  ;;  %v9337_v58 = vld [vmem:[#allocation6 + $0x20] sm:$0xff] }
 0x9aa   :  { %8193 = vrcp.f32 %v879_v60 }
 0x9b7   :  { %v8194_v62 = vpop.eup %8193 }
 0x9b8   :  { %v883_v8 = vmul.f32 %v8194_v62, %v793_v47 }
 0xa18   :  { %v886_v0 = vpop.permute.xlu0 %885 }
 0xa19   :  { %v888_v2 = vmul.f32 %v8194_v62, %v886_v0 }
 0xa1b   :  { %890 = vrot.lane.b32.xlu1 %v888_v2, %s8897_s26  ;;  %v499_v2 = vadd.f32 %v9232_v5, %v9198_v55 }
 0xa8d   :  { %v891_v11 = vpop.permute.xlu1 %890 }
 0xa8e   :  { %v893_v12 = vadd.f32 %v891_v11, %v883_v8 }
 0xa90   :  { %8195 = vtanh.f32 %v893_v12 }
 0xa9d   :  { %v8196_v23 = vpop.eup %8195 }
 0xa9e   :  { %896 = vrot.lane.b32.xlu0 %v8196_v23, %s8896_s25 }
 0xb10   :  { %v897_v15 = vpop.permute.xlu0 %896 }
 0xb11   :  { %v899_v16 = vmul.f32 %v8194_v62, %v897_v15 }
 0xb13   :  { %901 = vrot.lane.b32.xlu1 %v899_v16, %s8897_s26 }
 0xb85   :  { %v9280_v17 = vpop.permute.xlu1 %901 }
 0xb86   :  { %7473 = vmatmul.mubr.msk.f32.vlgmr.msra.gmra.mxu0 %vm260_vm0, %v9280_v17 }
 0xb87   :  { %7487 = vmatpush3.msra.mxu0 %v9075_v7  ;;  %7494 = vmatprep.mubr.msk.f32.mxu0 %vm8895_vm1, %v8894_v9 }
 0xb88   :  { %7488 = vmatprep.subr.mxu0 %v8894_v9 }
 0xb89   :  { %7489 = vmatpush3.msra.mxu0 %v9085_v10 }
 0xb8a   :  { %7490 = vmatprep.subr.mxu0 %v8894_v9 }
 0xb8b   :  { %7491 = vmatpush3.msra.mxu0 %v9101_v13 }
 0xb8c   :  { %7492 = vmatprep.subr.mxu0 %v8894_v9 }
 0xb8d   :  { %7493 = vmatpush3.msra.mxu0 %v9107_v14 }
 0xb8e   :  { %7508 = vmatprep.subr.mxu0 %v8894_v9 }
 0xc46   :  { %v971_v18 = vpop.f32.mrf.mxu0 }
 0xc47   :  { %v975_v19 = vadd.f32 %v971_v18, %v9160_v29 }
 0xc48   :  { %v7474_v21 = vpop.f32.mrf.mxu0 }
 0xc49   :  { %8197 = vtanh.f32 %v975_v19  ;;  %v6846_v24 = vmul.f32 -1.442695, %v975_v19 }
 0xc4b   :  { %8199 = vpow2.f32 %v6846_v24 }
 0xc56   :  { %v8198_v22 = vpop.eup %8197 }
 0xc57   :  { %985 = vrot.lane.b32.xlu0 %v8198_v22, %s8896_s25 }
 0xc58   :  { %v8200_v26 = vpop.eup %8199 }
 0xc59   :  { %v979_v28 = vadd.f32 1.0, %v8200_v26 }
 0xc5b   :  { %8201 = vrcp.f32 %v979_v28 }
 0xc68   :  { %v8202_v20 = vpop.eup %8201 }
 0xc69   :  { %v983_v35 = vmul.f32 %v8202_v20, %v893_v12 }
 0xcc9   :  { %v986_v30 = vpop.permute.xlu0 %985 }
 0xcca   :  { %v988_v32 = vmul.f32 %v8202_v20, %v986_v30 }
 0xccc   :  { %990 = vrot.lane.b32.xlu1 %v988_v32, %s8897_s26 }
 0xd3e   :  { %v991_v36 = vpop.permute.xlu1 %990 }
 0xd3f   :  { %v993_v37 = vadd.f32 %v991_v36, %v983_v35 }
 0xd41   :  { %8203 = vtanh.f32 %v993_v37 }
 0xd4e   :  { %v8204_v29 = vpop.eup %8203 }
 0xd4f   :  { %996 = vrot.lane.b32.xlu0 %v8204_v29, %s8896_s25 }
 0xdc1   :  { %v997_v38 = vpop.permute.xlu0 %996 }
 0xdc2   :  { %v999_v39 = vmul.f32 %v8202_v20, %v997_v38 }
 0xdc4   :  { %1001 = vrot.lane.b32.xlu1 %v999_v39, %s8897_s26 }
 0xe36   :  { %v9299_v40 = vpop.permute.xlu1 %1001 }
 0xe37   :  { %7484 = vmatmul.mubr.msk.f32.vlgmr.msra.gmra.mxu1 %vm260_vm0, %v9299_v40 }
 0xe38   :  { %7498 = vmatpush3.msra.mxu1 %v9075_v7  ;;  %7505 = vmatprep.mubr.msk.f32.mxu1 %vm8895_vm1, %v8894_v9 }
 0xe39   :  { %7499 = vmatprep.subr.mxu1 %v8894_v9 }
 0xe3a   :  { %7500 = vmatpush3.msra.mxu1 %v9085_v10 }
 0xe3b   :  { %7501 = vmatprep.subr.mxu1 %v8894_v9 }
 0xe3c   :  { %7502 = vmatpush3.msra.mxu1 %v9101_v13 }
 0xe3d   :  { %7503 = vmatprep.subr.mxu1 %v8894_v9 }
 0xe3e   :  { %7504 = vmatpush3.msra.mxu1 %v9107_v14 }
 0xe3f   :  { %7519 = vmatprep.subr.mxu1 %v8894_v9 }
 0xef7   :  { %v1071_v41 = vpop.f32.mrf.mxu1 }
 0xef8   :  { %v1075_v7 = vadd.f32 %v1071_v41, %v9158_v27 }
 0xef9   :  { %v7485_v42 = vpop.f32.mrf.mxu1 }
 0xefa   :  { %8205 = vtanh.f32 %v1075_v7  ;;  %v6848_v44 = vmul.f32 -1.442695, %v1075_v7 }
 0xefc   :  { %8207 = vpow2.f32 %v6848_v44 }
 0xf07   :  { %v8206_v43 = vpop.eup %8205 }
 0xf08   :  { %1085 = vrot.lane.b32.xlu0 %v8206_v43, %s8896_s25 }
 0xf09   :  { %v8208_v10 = vpop.eup %8207 }
 0xf0a   :  { %v1079_v45 = vadd.f32 1.0, %v8208_v10 }
 0xf0c   :  { %8209 = vrcp.f32 %v1079_v45 }
 0xf19   :  { %v8210_v13 = vpop.eup %8209 }
 0xf1a   :  { %v1083_v14 = vmul.f32 %v8210_v13, %v993_v37 }
 0xf7a   :  { %v1086_v46 = vpop.permute.xlu0 %1085 }
 0xf7b   :  { %v1088_v47 = vmul.f32 %v8210_v13, %v1086_v46 }
 0xf7d   :  { %1090 = vrot.lane.b32.xlu1 %v1088_v47, %s8897_s26 }
 0xfef   :  { %v1091_v25 = vpop.permute.xlu1 %1090 }
 0xff0   :  { %v9316_v48 = vadd.f32 %v1091_v25, %v1083_v14  ;;  %v494_v14 = vadd.f32 %v9198_v55, %v9234_v6 }
 0xff2   :  { %8211 = vtanh.f32 %v9316_v48 }
 0xfff   :  { %v8212_v27 = vpop.eup %8211 }
0x1000   :  { %1096 = vrot.lane.b32.xlu0 %v8212_v27, %s8896_s25 }
0x1072   :  { %v1097_v49 = vpop.permute.xlu0 %1096 }
0x1073   :  { %v1099_v51 = vmul.f32 %v8210_v13, %v1097_v49 }
0x1075   :  { %1101 = vrot.lane.b32.xlu1 %v1099_v51, %s8897_s26 }
0x10e7   :  { %v9323_v53 = vpop.permute.xlu1 %1101 }
0x10e8   :  { %7495 = vmatmul.mubr.msk.f32.vlgmr.msra.gmra.mxu0 %vm260_vm0, %v9323_v53 }
0x10e9   :  { %7509 = vmatpush3.msra.mxu0 %v9321_v52  ;;  %7516 = vmatprep.mubr.msk.f32.mxu0 %vm8895_vm1, %v8894_v9 }
0x10ea   :  { %7510 = vmatprep.subr.mxu0 %v8894_v9 }
0x10eb   :  { %7511 = vmatpush3.msra.mxu0 %v9327_v54 }
0x10ec   :  { %7512 = vmatprep.subr.mxu0 %v8894_v9 }
0x10ed   :  { %7513 = vmatpush3.msra.mxu0 %v9333_v56 }
0x10ee   :  { %7514 = vmatprep.subr.mxu0 %v8894_v9 }
0x10ef   :  { %7515 = vmatpush3.msra.mxu0 %v9337_v58 }
0x10f0   :  { %7517 = vmatmul.mubr.f32.vlgmr.msra.gmra.mxu0 %v8894_v9  ;;  %7530 = vmatprep.subr.mxu0 %v8894_v9 }
0x10f1   :  { %7531 = vmatpush3.msra.mxu0 %v9321_v52  ;;  %7538 = vmatprep.mubr.msk.f32.mxu0 %vm8895_vm1, %v8894_v9 }
0x10f2   :  { %7532 = vmatprep.subr.mxu0 %v8894_v9 }
0x10f3   :  { %7533 = vmatpush3.msra.mxu0 %v9327_v54 }
0x10f4   :  { %7534 = vmatprep.subr.mxu0 %v8894_v9 }
0x10f5   :  { %7535 = vmatpush3.msra.mxu0 %v9333_v56 }
0x10f6   :  { %7536 = vmatprep.subr.mxu0 %v8894_v9 }
0x10f7   :  { %7537 = vmatpush3.msra.mxu0 %v9337_v58 }
0x10f8   :  { %7552 = vmatprep.subr.mxu0 %v8894_v9 }
0x11a8   :  { %v1171_v60 = vpop.f32.mrf.mxu0 }
0x11a9   :  { %v1175_v62 = vadd.f32 %v1171_v60, %v9164_v34 }
0x11aa   :  { %v7496_v0 = vpop.f32.mrf.mxu0 }
0x11ab   :  { %8213 = vtanh.f32 %v1175_v62  ;;  %v6850_v16 = vmul.f32 -1.442695, %v1175_v62 }
0x11b0   :  { %v1366_v8 = vpop.f32.mrf.mxu0 }
0x11b1   :  { %v1370_v11 = vadd.f32 %v1366_v8, %v499_v2 }
0x11b2   :  { %v7518_v12 = vpop.f32.mrf.mxu0 }
0x11b3   :  { %8215 = vtanh.f32 %v1370_v11  ;;  %v6853_v18 = vmul.f32 -1.442695, %v1370_v11 }
0x11b4   :  { %8217 = vpow2.f32 %v6850_v16 }
0x11b5   :  { %8219 = vpow2.f32 %v6853_v18 }
0x11b8   :  { %v8214_v23 = vpop.eup %8213 }
0x11b9   :  { %1185 = vrot.lane.b32.xlu0 %v8214_v23, %s8896_s25 }
0x11c0   :  { %v8216_v15 = vpop.eup %8215 }
0x11c1   :  { %1380 = vrot.lane.b32.xlu1 %v8216_v15, %s8896_s25  ;;  %v8218_v34 = vpop.eup %8217 }
0x11c2   :  { %v1179_v19 = vadd.f32 1.0, %v8218_v34  ;;  %v8220_v21 = vpop.eup %8219 }
0x11c3   :  { %v1374_v22 = vadd.f32 1.0, %v8220_v21 }
0x11c4   :  { %8221 = vrcp.f32 %v1179_v19 }
0x11c5   :  { %8223 = vrcp.f32 %v1374_v22 }
0x11d1   :  { %v8222_v5 = vpop.eup %8221 }
0x11d2   :  { %v8224_v28 = vpop.eup %8223  ;;  %v1183_v32 = vmul.f32 %v8222_v5, %v9316_v48 }
0x11d3   :  { %v1378_v37 = vmul.f32 0.0, %v8224_v28 }
0x122b   :  { %v1186_v24 = vpop.permute.xlu0 %1185 }
0x122c   :  { %v1188_v26 = vmul.f32 %v8222_v5, %v1186_v24 }
0x122e   :  { %1190 = vrot.lane.b32.xlu0 %v1188_v26, %s8897_s26 }
0x1233   :  { %v1381_v20 = vpop.permute.xlu1 %1380 }
0x1234   :  { %v1383_v30 = vmul.f32 %v8224_v28, %v1381_v20 }
0x1236   :  { %1385 = vrot.lane.b32.xlu1 %v1383_v30, %s8897_s26 }
0x12a0   :  { %v1191_v35 = vpop.permute.xlu0 %1190 }
0x12a1   :  { %v9362_v36 = vadd.f32 %v1191_v35, %v1183_v32 }
0x12a3   :  { %8225 = vtanh.f32 %v9362_v36 }
0x12a8   :  { %v1386_v29 = vpop.permute.xlu1 %1385 }
0x12a9   :  { %v1388_v38 = vadd.f32 %v1386_v29, %v1378_v37 }
0x12ab   :  { %8227 = vtanh.f32 %v1388_v38 }
0x12b0   :  { %v8226_v39 = vpop.eup %8225 }
0x12b1   :  { %1196 = vrot.lane.b32.xlu0 %v8226_v39, %s8896_s25 }
0x12b8   :  { %v8228_v41 = vpop.eup %8227 }
0x12b9   :  { %1391 = vrot.lane.b32.xlu1 %v8228_v41, %s8896_s25 }
0x1323   :  { %v1197_v7 = vpop.permute.xlu0 %1196 }
0x1324   :  { %v1199_v42 = vmul.f32 %v8222_v5, %v1197_v7 }
0x1326   :  { %1201 = vrot.lane.b32.xlu0 %v1199_v42, %s8897_s26 }
0x132b   :  { %v1392_v43 = vpop.permute.xlu1 %1391 }
0x132c   :  { %v1394_v44 = vmul.f32 %v8224_v28, %v1392_v43 }
0x132e   :  { %1396 = vrot.lane.b32.xlu1 %v1394_v44, %s8897_s26 }
0x1398   :  { %v9369_v10 = vpop.permute.xlu0 %1201 }
0x1399   :  { %7506 = vmatmul.mubr.msk.f32.vlgmr.msra.gmra.mxu1 %vm260_vm0, %v9369_v10 }
0x139a   :  { %7520 = vmatpush3.msra.mxu1 %v9321_v52  ;;  %7527 = vmatprep.mubr.msk.f32.mxu1 %vm8895_vm1, %v8894_v9 }
0x139b   :  { %7521 = vmatprep.subr.mxu1 %v8894_v9 }
0x139c   :  { %7522 = vmatpush3.msra.mxu1 %v9327_v54 }
0x139d   :  { %7523 = vmatprep.subr.mxu1 %v8894_v9 }
0x139e   :  { %7524 = vmatpush3.msra.mxu1 %v9333_v56 }
0x139f   :  { %7525 = vmatprep.subr.mxu1 %v8894_v9 }
0x13a0   :  { %7526 = vmatpush3.msra.mxu1 %v9337_v58  ;;  %v9382_v45 = vpop.permute.xlu1 %1396 }
0x13a1   :  { %7528 = vmatmul.mubr.msk.f32.vlgmr.msra.gmra.mxu1 %vm260_vm0, %v9382_v45  ;;  %7541 = vmatprep.subr.mxu1 %v8894_v9 }
0x13a2   :  { %7542 = vmatpush3.msra.mxu1 %v9321_v52  ;;  %7549 = vmatprep.mubr.msk.f32.mxu1 %vm8895_vm1, %v8894_v9 }
0x13a3   :  { %7543 = vmatprep.subr.mxu1 %v8894_v9 }
0x13a4   :  { %7544 = vmatpush3.msra.mxu1 %v9327_v54 }
0x13a5   :  { %7545 = vmatprep.subr.mxu1 %v8894_v9 }
0x13a6   :  { %7546 = vmatpush3.msra.mxu1 %v9333_v56 }
0x13a7   :  { %7547 = vmatprep.subr.mxu1 %v8894_v9 }
0x13a8   :  { %7548 = vmatpush3.msra.mxu1 %v9337_v58 }
0x13a9   :  { %7563 = vmatprep.subr.mxu1 %v8894_v9 }
0x1459   :  { %v1271_v13 = vpop.f32.mrf.mxu1 }
0x145a   :  { %v9398_v46 = vadd.f32 %v1271_v13, %v9162_v31 }
0x145b   :  { %v7507_v47 = vpop.f32.mrf.mxu1 }
0x1461   :  { %v1466_v25 = vpop.f32.mrf.mxu1 }
0x1462   :  { %v1470_v48 = vadd.f32 %v1466_v25, %v494_v14 }
0x1463   :  { %v7529_v27 = vpop.f32.mrf.mxu1 }
0x1464   :  { %8229 = vtanh.f32 %v1470_v48  ;;  %v6855_v51 = vmul.f32 -1.442695, %v1470_v48 }
0x1466   :  { %8231 = vpow2.f32 %v6855_v51 }
0x1471   :  { %v8230_v49 = vpop.eup %8229 }
0x1472   :  { %1480 = vrot.lane.b32.xlu0 %v8230_v49, %s8896_s25 }
0x1473   :  { %v8232_v60 = vpop.eup %8231 }
0x1474   :  { %v1474_v62 = vadd.f32 1.0, %v8232_v60 }
0x1476   :  { %8233 = vrcp.f32 %v1474_v62 }
0x1483   :  { %v8234_v0 = vpop.eup %8233 }
0x1484   :  { %v1478_v8 = vmul.f32 %v8234_v0, %v1388_v38 }
0x14e4   :  { %v1481_v2 = vpop.permute.xlu0 %1480 }
0x14e5   :  { %v1483_v31 = vmul.f32 %v8234_v0, %v1481_v2 }
0x14e7   :  { %1485 = vrot.lane.b32.xlu1 %v1483_v31, %s8897_s26 }
0x1559   :  { %v1486_v11 = vpop.permute.xlu1 %1485 }
0x155a   :  { %v1488_v55 = vadd.f32 %v1486_v11, %v1478_v8 }
0x155c   :  { %8235 = vtanh.f32 %v1488_v55 }
0x1569   :  { %v8236_v6 = vpop.eup %8235 }
0x156a   :  { %1491 = vrot.lane.b32.xlu0 %v8236_v6, %s8896_s25 }
0x15dc   :  { %v1492_v12 = vpop.permute.xlu0 %1491 }
0x15dd   :  { %v1494_v23 = vmul.f32 %v8234_v0, %v1492_v12 }
0x15df   :  { %1496 = vrot.lane.b32.xlu1 %v1494_v23, %s8897_s26 }
0x1651   :  { %v9406_v15 = vpop.permute.xlu1 %1496 }
0x1652   :  { %7539 = vmatmul.mubr.msk.f32.vlgmr.msra.gmra.mxu0 %vm260_vm0, %v9406_v15 }
0x1653   :  { %7553 = vmatpush3.msra.mxu0 %v9321_v52  ;;  %7560 = vmatprep.mubr.msk.f32.mxu0 %vm8895_vm1, %v8894_v9 }
0x1654   :  { %7554 = vmatprep.subr.mxu0 %v8894_v9 }
0x1655   :  { %7555 = vmatpush3.msra.mxu0 %v9327_v54 }
0x1656   :  { %7556 = vmatprep.subr.mxu0 %v8894_v9 }
0x1657   :  { %7557 = vmatpush3.msra.mxu0 %v9333_v56 }
0x1658   :  { %7558 = vmatprep.subr.mxu0 %v8894_v9 }
0x1659   :  { %7559 = vmatpush3.msra.mxu0 %v9337_v58 }
0x165a   :  { %7574 = vmatprep.subr.mxu0 %v8894_v9 }
0x1712   :  { %v1566_v16 = vpop.f32.mrf.mxu0 }
0x1713   :  { %v1570_v18 = vadd.f32 %v1566_v16, %v9213_v1 }
0x1714   :  { %v7540_v34 = vpop.f32.mrf.mxu0 }
0x1715   :  { %8237 = vtanh.f32 %v1570_v18  ;;  %v6857_v21 = vmul.f32 -1.442695, %v1570_v18 }
0x1717   :  { %8239 = vpow2.f32 %v6857_v21 }
0x1722   :  { %v8238_v19 = vpop.eup %8237 }
0x1723   :  { %1580 = vrot.lane.b32.xlu0 %v8238_v19, %s8896_s25 }
0x1724   :  { %v8240_v22 = vpop.eup %8239 }
0x1725   :  { %v1574_v5 = vadd.f32 1.0, %v8240_v22 }
0x1727   :  { %8241 = vrcp.f32 %v1574_v5 }
0x1734   :  { %v8242_v24 = vpop.eup %8241 }
0x1735   :  { %v1578_v20 = vmul.f32 %v8242_v24, %v1488_v55 }
0x1795   :  { %v1581_v26 = vpop.permute.xlu0 %1580 }
0x1796   :  { %v1583_v28 = vmul.f32 %v8242_v24, %v1581_v26 }
0x1798   :  { %1585 = vrot.lane.b32.xlu1 %v1583_v28, %s8897_s26 }
0x180a   :  { %v1586_v30 = vpop.permute.xlu1 %1585 }
0x180b   :  { %v1588_v32 = vadd.f32 %v1586_v30, %v1578_v20 }
0x180d   :  { %8243 = vtanh.f32 %v1588_v32 }
0x181a   :  { %v8244_v1 = vpop.eup %8243 }
0x181b   :  { %1591 = vrot.lane.b32.xlu0 %v8244_v1, %s8896_s25 }
0x188d   :  { %v1592_v35 = vpop.permute.xlu0 %1591 }
0x188e   :  { %v1594_v37 = vmul.f32 %v8242_v24, %v1592_v35 }
0x1890   :  { %1596 = vrot.lane.b32.xlu1 %v1594_v37, %s8897_s26 }
0x1902   :  { %v9425_v29 = vpop.permute.xlu1 %1596 }
0x1903   :  { %7550 = vmatmul.mubr.msk.f32.vlgmr.msra.gmra.mxu1 %vm260_vm0, %v9425_v29 }
0x1904   :  { %7564 = vmatpush3.msra.mxu1 %v9321_v52  ;;  %7571 = vmatprep.mubr.msk.f32.mxu1 %vm8895_vm1, %v8894_v9 }
0x1905   :  { %7565 = vmatprep.subr.mxu1 %v8894_v9 }
0x1906   :  { %7566 = vmatpush3.msra.mxu1 %v9327_v54 }
0x1907   :  { %7567 = vmatprep.subr.mxu1 %v8894_v9 }
0x1908   :  { %7568 = vmatpush3.msra.mxu1 %v9333_v56 }
0x1909   :  { %7569 = vmatprep.subr.mxu1 %v8894_v9 }
0x190a   :  { %7570 = vmatpush3.msra.mxu1 %v9337_v58 }
0x190b   :  { %7585 = vmatprep.subr.mxu1 %v8894_v9 }
0x19c3   :  { %v1666_v38 = vpop.f32.mrf.mxu1 }
0x19c4   :  { %v1670_v39 = vadd.f32 %v1666_v38, %v9216_v3 }
0x19c5   :  { %v7551_v41 = vpop.f32.mrf.mxu1 }
0x19c6   :  { %8245 = vtanh.f32 %v1670_v39  ;;  %v6859_v42 = vmul.f32 -1.442695, %v1670_v39 }
0x19c8   :  { %8247 = vpow2.f32 %v6859_v42 }
0x19d3   :  { %v8246_v7 = vpop.eup %8245 }
0x19d4   :  { %1680 = vrot.lane.b32.xlu0 %v8246_v7, %s8896_s25 }
0x19d5   :  { %v8248_v43 = vpop.eup %8247 }
0x19d6   :  { %v1674_v44 = vadd.f32 1.0, %v8248_v43 }
0x19d8   :  { %8249 = vrcp.f32 %v1674_v44 }
0x19e5   :  { %v8250_v13 = vpop.eup %8249 }
0x19e6   :  { %v1678_v25 = vmul.f32 %v8250_v13, %v1588_v32 }
0x1a46   :  { %v1681_v47 = vpop.permute.xlu0 %1680 }
0x1a47   :  { %v1683_v14 = vmul.f32 %v8250_v13, %v1681_v47 }
0x1a49   :  { %1685 = vrot.lane.b32.xlu1 %v1683_v14, %s8897_s26 }
0x1abb   :  { %v1686_v48 = vpop.permute.xlu1 %1685 }
0x1abc   :  { %v1688_v27 = vadd.f32 %v1686_v48, %v1678_v25 }
0x1abe   :  { %8251 = vtanh.f32 %v1688_v27 }
0x1acb   :  { %v8252_v3 = vpop.eup %8251 }
0x1acc   :  { %1691 = vrot.lane.b32.xlu0 %v8252_v3, %s8896_s25 }
0x1b3e   :  { %v1692_v49 = vpop.permute.xlu0 %1691 }
0x1b3f   :  { %v1694_v51 = vmul.f32 %v8250_v13, %v1692_v49 }
0x1b41   :  { %1696 = vrot.lane.b32.xlu1 %v1694_v51, %s8897_s26 }
0x1bb3   :  { %v9444_v60 = vpop.permute.xlu1 %1696 }
0x1bb4   :  { %7561 = vmatmul.mubr.msk.f32.vlgmr.msra.gmra.mxu0 %vm260_vm0, %v9444_v60 }
0x1bb5   :  { %7575 = vmatpush3.msra.mxu0 %v9321_v52  ;;  %7582 = vmatprep.mubr.msk.f32.mxu0 %vm8895_vm1, %v8894_v9 }
0x1bb6   :  { %7576 = vmatprep.subr.mxu0 %v8894_v9 }
0x1bb7   :  { %7577 = vmatpush3.msra.mxu0 %v9327_v54 }
0x1bb8   :  { %7578 = vmatprep.subr.mxu0 %v8894_v9 }
0x1bb9   :  { %7579 = vmatpush3.msra.mxu0 %v9333_v56 }
0x1bba   :  { %7580 = vmatprep.subr.mxu0 %v8894_v9 }
0x1bbb   :  { %7581 = vmatpush3.msra.mxu0 %v9337_v58 }
0x1c74   :  { %v1766_v62 = vpop.f32.mrf.mxu0 }
0x1c75   :  { %v1770_v0 = vadd.f32 %v1766_v62, %v9207_v61 }
0x1c76   :  { %v7562_v2 = vpop.f32.mrf.mxu0 }
0x1c77   :  { %8253 = vtanh.f32 %v1770_v0  ;;  %v6861_v8 = vmul.f32 -1.442695, %v1770_v0 }
0x1c79   :  { %8255 = vpow2.f32 %v6861_v8  ;;  %v2096_v8 = vld [vmem:[%s10678_s12 + $0x8] sm:$0xff] }
0x1c84   :  { %v8254_v31 = vpop.eup %8253 }
0x1c85   :  { %1780 = vrot.lane.b32.xlu0 %v8254_v31, %s8896_s25  ;;  %v2097_v31 = vld [vmem:[%s10678_s12 + $0x10] sm:$0xff] }
0x1c86   :  { %v8256_v11 = vpop.eup %8255 }
0x1c87   :  { %v1774_v55 = vadd.f32 1.0, %v8256_v11  ;;  %v2095_v11 = vld [vmem:[%s10678_s12] sm:$0xff] }
0x1c89   :  { %8257 = vrcp.f32 %v1774_v55 }
0x1c96   :  { %v8258_v6 = vpop.eup %8257 }
0x1c97   :  { %v1778_v16 = vmul.f32 %v8258_v6, %v1688_v27 }
0x1cf7   :  { %v1781_v12 = vpop.permute.xlu0 %1780 }
0x1cf8   :  { %v1783_v23 = vmul.f32 %v8258_v6, %v1781_v12 }
0x1cfa   :  { %1785 = vrot.lane.b32.xlu1 %v1783_v23, %s8897_s26 }
0x1d6c   :  { %v1786_v18 = vpop.permute.xlu1 %1785 }
0x1d6d   :  { %v1788_v34 = vadd.f32 %v1786_v18, %v1778_v16 }
0x1d6f   :  { %8259 = vtanh.f32 %v1788_v34 }
0x1d7c   :  { %v8260_v61 = vpop.eup %8259 }
0x1d7d   :  { %1791 = vrot.lane.b32.xlu0 %v8260_v61, %s8896_s25 }
0x1def   :  { %v1792_v19 = vpop.permute.xlu0 %1791 }
0x1df0   :  { %v1794_v21 = vmul.f32 %v8258_v6, %v1792_v19 }
0x1df2   :  { %1796 = vrot.lane.b32.xlu1 %v1794_v21, %s8897_s26 }
0x1e64   :  { %v9462_v22 = vpop.permute.xlu1 %1796 }
0x1e65   :  { %7572 = vmatmul.mubr.msk.f32.vlgmr.msra.gmra.mxu1 %vm260_vm0, %v9462_v22 }
0x1e66   :  { %7586 = vmatpush3.msra.mxu1 %v9321_v52  ;;  %7593 = vmatprep.mubr.msk.f32.mxu1 %vm8895_vm1, %v8894_v9 }
0x1e67   :  { %7587 = vmatprep.subr.mxu1 %v8894_v9 }
0x1e68   :  { %7588 = vmatpush3.msra.mxu1 %v9327_v54 }
0x1e69   :  { %7589 = vmatprep.subr.mxu1 %v8894_v9 }
0x1e6a   :  { %7590 = vmatpush3.msra.mxu1 %v9333_v56 }
0x1e6b   :  { %7591 = vmatprep.subr.mxu1 %v8894_v9 }
0x1e6c   :  { %7592 = vmatpush3.msra.mxu1 %v9337_v58 }
0x1f25   :  { %v1866_v5 = vpop.f32.mrf.mxu1 }
0x1f26   :  { %v1870_v24 = vadd.f32 %v1866_v5, %v9210_v63 }
0x1f27   :  { %v7573_v26 = vpop.f32.mrf.mxu1 }
0x1f28   :  { %8261 = vtanh.f32 %v1870_v24  ;;  %v6863_v28 = vmul.f32 -1.442695, %v1870_v24 }
0x1f2a   :  { %8263 = vpow2.f32 %v6863_v28  ;;  %v2100_v28 = vld [vmem:[%s10678_s12 + $0x28] sm:$0xff] }
0x1f35   :  { %v8262_v52 = vpop.eup %8261 }
0x1f36   :  { %1880 = vrot.lane.b32.xlu0 %v8262_v52, %s8896_s25  ;;  %v2101_v52 = vld [vmem:[%s10678_s12 + $0x30] sm:$0xff] }
0x1f37   :  { %v8264_v20 = vpop.eup %8263 }
0x1f38   :  { %v1874_v54 = vadd.f32 1.0, %v8264_v20  ;;  %v2099_v20 = vld [vmem:[%s10678_s12 + $0x20] sm:$0xff] }
0x1f3a   :  { %8265 = vrcp.f32 %v1874_v54 }
0x1f47   :  { %v8266_v30 = vpop.eup %8265 }
0x1f48   :  { %v1878_v1 = vmul.f32 %v8266_v30, %v1788_v34 }
0x1fa8   :  { %v1881_v32 = vpop.permute.xlu0 %1880 }
0x1fa9   :  { %v1883_v56 = vmul.f32 %v8266_v30, %v1881_v32  ;;  %v6852_v32 = vmul.f32 -1.442695, %v9398_v46 }
0x1fab   :  { %1885 = vrot.lane.b32.xlu1 %v1883_v56, %s8897_s26 }
0x201d   :  { %v1886_v58 = vpop.permute.xlu1 %1885 }
0x201e   :  { %v1888_v35 = vadd.f32 %v1886_v58, %v1878_v1  ;;  %v2114_v58 = vld [vmem:[%s10650_s7 + $0x38] sm:$0xff] }
0x2020   :  { %8267 = vtanh.f32 %v1888_v35 }
0x202d   :  { %v8268_v63 = vpop.eup %8267 }
0x202e   :  { %1891 = vrot.lane.b32.xlu0 %v8268_v63, %s8896_s25 }
0x20a0   :  { %v1892_v37 = vpop.permute.xlu0 %1891 }
0x20a1   :  { %v1894_v38 = vmul.f32 %v8266_v30, %v1892_v37 }
0x20a3   :  { %1896 = vrot.lane.b32.xlu1 %v1894_v38, %s8897_s26 }
0x2115   :  { %v9480_v39 = vpop.permute.xlu1 %1896 }
0x2116   :  { %7583 = vmatmul.mubr.msk.f32.vlgmr.msra.gmra.mxu0 %vm260_vm0, %v9480_v39 }
0x21d6   :  { %v1966_v41 = vpop.f32.mrf.mxu0 }
0x21d7   :  { %v1970_v7 = vadd.f32 %v1966_v41, %v9201_v57  ;;  %v2098_v57 = vld [vmem:[%s10678_s12 + $0x18] sm:$0xff] }
0x21d8   :  { %v7584_v42 = vpop.f32.mrf.mxu0  ;;  %7616 = vmatprep.subr.mxu1 %v2098_v57 }
0x21d9   :  { %8269 = vtanh.f32 %v1970_v7  ;;  %v6865_v44 = vmul.f32 -1.442695, %v1970_v7  ;;  %v2113_v7 = vld [vmem:[%s10650_s7 + $0x30] sm:$0xff] }
0x21db   :  { %8271 = vpow2.f32 %v6865_v44 }
0x21e6   :  { %v8270_v43 = vpop.eup %8269 }
0x21e7   :  { %1980 = vrot.lane.b32.xlu0 %v8270_v43, %s8896_s25  ;;  %v2112_v43 = vld [vmem:[%s10650_s7 + $0x28] sm:$0xff] }
0x21e8   :  { %v8272_v13 = vpop.eup %8271 }
0x21e9   :  { %v1974_v47 = vadd.f32 1.0, %v8272_v13 }
0x21eb   :  { %8273 = vrcp.f32 %v1974_v47  ;;  %v2111_v47 = vld [vmem:[%s10650_s7 + $0x20] sm:$0xff] }
0x21f8   :  { %v8274_v14 = vpop.eup %8273 }
0x21f9   :  { %v1978_v27 = vmul.f32 %v8274_v14, %v1888_v35 }
0x2259   :  { %v1981_v25 = vpop.permute.xlu0 %1980 }
0x225a   :  { %v1983_v48 = vmul.f32 %v8274_v14, %v1981_v25 }
0x225c   :  { %1985 = vrot.lane.b32.xlu1 %v1983_v48, %s8897_s26  ;;  %v9593_v48 = vld [vmem:[%s10678_s12 + $0x48] sm:$0xff] }
0x22ce   :  { %v1986_v3 = vpop.permute.xlu1 %1985 }
0x22cf   :  { %v1988_v49 = vadd.f32 %v1986_v3, %v1978_v27 }
0x22d1   :  { %8275 = vtanh.f32 %v1988_v49 }
0x22de   :  { %v8276_v51 = vpop.eup %8275 }
0x22df   :  { %1991 = vrot.lane.b32.xlu0 %v8276_v51, %s8896_s25 }
0x2351   :  { %v1992_v62 = vpop.permute.xlu0 %1991 }
0x2352   :  { %v1994_v0 = vmul.f32 %v8274_v14, %v1992_v62  ;;  %v9584_v14 = vld [vmem:[%s10678_s12 + $0x50] sm:$0xff] }
0x2354   :  { %1996 = vrot.lane.b32.xlu1 %v1994_v0, %s8897_s26 }
0x23c6   :  { %v9492_v2 = vpop.permute.xlu1 %1996 }
0x23c7   :  { %7594 = vmatmul.mubr.msk.f32.vlgmr.msra.gmra.mxu1 %vm260_vm0, %v9492_v2 }
0x23c8   :  { %7617 = vmatpush3.msra.mxu1 %v2098_v57  ;;  %7624 = vmatprep.mubr.msk.f32.mxu1 %vm260_vm0, %v9218_v4 }
0x23c9   :  { %7618 = vmatprep.subr.mxu1 %v2097_v31 }
0x23ca   :  { %7619 = vmatpush3.msra.mxu1 %v2097_v31 }
0x23cb   :  { %7620 = vmatprep.subr.mxu1 %v2096_v8 }
0x23cc   :  { %7621 = vmatpush3.msra.mxu1 %v2096_v8 }
0x23cd   :  { %7622 = vmatprep.subr.mxu1 %v2095_v11 }
0x23ce   :  { %7623 = vmatpush3.msra.mxu1 %v2095_v11 }
0x23cf   :  { %7625 = vmatmul.mubr.msk.f32.vlgmr.msra.gmra.mxu1 %vm260_vm0, %v9242_v33 }
0x23d0   :  { %7627 = vmatprep.mubr.msk.f32.mxu1 %vm260_vm0, %v9261_v50 }
0x23d3   :  { %7628 = vmatmul.mubr.msk.f32.gmra.mxu1 %vm260_vm0, %v9280_v17 }
0x23d4   :  { %7630 = vmatprep.mubr.msk.f32.mxu1 %vm260_vm0, %v9299_v40 }
0x23d7   :  { %7631 = vmatmul.mubr.msk.f32.gmra.mxu1 %vm260_vm0, %v9323_v53 }
0x23d8   :  { %7633 = vmatprep.mubr.msk.f32.mxu1 %vm260_vm0, %v9369_v10 }
0x2487   :  { %v2066_v55 = vpop.f32.mrf.mxu1 }
0x2488   :  { %v2070_v6 = vadd.f32 %v2066_v55, %v9204_v59  ;;  %v2102_v59 = vld [vmem:[%s10678_s12 + $0x38] sm:$0xff] }
0x2489   :  { %v7595_v12 = vpop.f32.mrf.mxu1  ;;  %7596 = vmatprep.subr.mxu0 %v2102_v59 }
0x248a   :  { %8277 = vtanh.f32 %v2070_v6  ;;  %v6867_v16 = vmul.f32 -1.442695, %v2070_v6  ;;  %7597 = vmatpush3.msra.mxu0 %v2102_v59 }
0x248b   :  { %7598 = vmatprep.subr.mxu0 %v2101_v52 }
0x248c   :  { %8279 = vpow2.f32 %v6867_v16  ;;  %7599 = vmatpush3.msra.mxu0 %v2101_v52 }
0x248d   :  { %7600 = vmatprep.subr.mxu0 %v2100_v28 }
0x248e   :  { %7601 = vmatpush3.msra.mxu0 %v2100_v28 }
0x248f   :  { %7602 = vmatprep.subr.mxu0 %v2099_v20  ;;  %v9659_v6 = vpop.f32.mrf.mxu1 }
0x2490   :  { %7603 = vmatpush3.msra.mxu0 %v2099_v20 }
0x2491   :  { %7636 = vmatprep.subr.mxu0 %v2114_v58  ;;  %v2300_v16 = vpop.f32.mrf.mxu1 }
0x2497   :  { %v8278_v23 = vpop.eup %8277 }
0x2498   :  { %2080 = vrot.lane.b32.xlu0 %v8278_v23, %s8896_s25 }
0x2499   :  { %v8280_v18 = vpop.eup %8279 }
0x249a   :  { %v2074_v34 = vadd.f32 1.0, %v8280_v18 }
0x249c   :  { %8281 = vrcp.f32 %v2074_v34 }
0x24a9   :  { %v8282_v61 = vpop.eup %8281 }
0x24aa   :  { %v2078_v5 = vmul.f32 %v8282_v61, %v1988_v49 }
0x250a   :  { %v2081_v19 = vpop.permute.xlu0 %2080 }
0x250b   :  { %v2083_v21 = vmul.f32 %v8282_v61, %v2081_v19 }
0x250d   :  { %2085 = vrot.lane.b32.xlu1 %v2083_v21, %s8897_s26  ;;  %v9665_v21 = vld [vmem:[#allocation9] ss:$0 sm:$0xff] }
0x257f   :  { %v2086_v24 = vpop.permute.xlu1 %2085 }
0x2580   :  { %v2088_v26 = vadd.f32 %v2086_v24, %v2078_v5 }
0x2582   :  { %8283 = vtanh.f32 %v2088_v26 }
0x2583   :  { %8285 = vtanh.f32 %v9398_v46 }
0x2584   :  { %8287 = vpow2.f32 %v6852_v32 }
0x258f   :  { %v8284_v54 = vpop.eup %8283 }
0x2590   :  { %2091 = vrot.lane.b32.xlu0 %v8284_v54, %s8896_s25  ;;  %v8286_v30 = vpop.eup %8285 }
0x2591   :  { %v8288_v56 = vpop.eup %8287 }
0x2592   :  { %v1279_v1 = vadd.f32 1.0, %v8288_v56 }
0x2594   :  { %1285 = vrot.lane.b32.xlu0 %v8286_v30, %s8896_s25  ;;  %8289 = vrcp.f32 %v1279_v1 }
0x25a1   :  { %v9542_v37 = vpop.eup %8289 }
0x25a2   :  { %v1283_v42 = vmul.f32 %v9542_v37, %v9362_v36  ;;  %v9577_v36 = vld [vmem:[%s10678_s12 + $0x58] sm:$0xff] }
0x2602   :  { %v2092_v35 = vpop.permute.xlu0 %2091 }
0x2603   :  { %v2094_v63 = vmul.f32 %v8282_v61, %v2092_v35 }
0x2605   :  { %2120 = vrot.lane.b32.xlu1 %v2094_v63, %s8897_s26 }
0x2606   :  { %v1286_v38 = vpop.permute.xlu0 %1285 }
0x2607   :  { %v1288_v41 = vmul.f32 %v9542_v37, %v1286_v38 }
0x2609   :  { %1290 = vrot.lane.b32.xlu0 %v1288_v41, %s8897_s26 }
0x2677   :  { %v2121_v46 = vpop.permute.xlu1 %2120 }
0x2678   :  { %7604 = vmatprep.mubr.msk.f32.mxu0 %vm260_vm0, %v2121_v46 }
0x2679   :  { %7605 = vmatmul.mubr.msk.f32.vlgmr.msra.gmra.mxu0 %vm260_vm0, %v9492_v2 }
0x267a   :  { %7607 = vmatprep.mubr.msk.f32.mxu0 %vm260_vm0, %v9480_v39  ;;  %7637 = vmatpush3.msra.mxu0 %v2114_v58  ;;  %v9708_v58 = vld [vmem:[#allocation11] ss:$0 sm:$0xff] }
0x267b   :  { %v1291_v44 = vpop.permute.xlu0 %1290  ;;  %7638 = vmatprep.subr.mxu0 %v2113_v7 }
0x267c   :  { %v1293_v13 = vadd.f32 %v1291_v44, %v1283_v42  ;;  %7639 = vmatpush3.msra.mxu0 %v2113_v7 }
0x267d   :  { %7608 = vmatmul.mubr.msk.f32.gmra.mxu0 %vm260_vm0, %v9462_v22  ;;  %7640 = vmatprep.subr.mxu0 %v2112_v43 }
0x267e   :  { %8291 = vtanh.f32 %v1293_v13  ;;  %7610 = vmatprep.mubr.msk.f32.mxu0 %vm260_vm0, %v9444_v60  ;;  %7641 = vmatpush3.msra.mxu0 %v2112_v43 }
0x267f   :  { %7642 = vmatprep.subr.mxu0 %v2111_v47 }
0x2680   :  { %7643 = vmatpush3.msra.mxu0 %v2111_v47 }
0x2681   :  { %7611 = vmatmul.mubr.msk.f32.gmra.mxu0 %vm260_vm0, %v9425_v29  ;;  %7676 = vmatprep.subr.mxu0 %v8894_v9 }
0x2682   :  { %7613 = vmatprep.mubr.msk.f32.mxu0 %vm260_vm0, %v9406_v15 }
0x2685   :  { %7614 = vmatmul.mubr.msk.f32.gmra.mxu0 %vm260_vm0, %v9382_v45 }
0x2686   :  { %7644 = vmatprep.mubr.msk.f32.mxu0 %vm260_vm0, %v2121_v46 }
0x2689   :  { %7645 = vmatmul.mubr.msk.f32.vlgmr.msra.gmra.mxu0 %vm260_vm0, %v9492_v2 }
0x268a   :  { %7647 = vmatprep.mubr.msk.f32.mxu0 %vm260_vm0, %v9480_v39  ;;  %7677 = vmatpush3.msra.mxu0 %v9577_v36  ;;  %v9603_v39 = vld [vmem:[%s10678_s12 + $0x40] sm:$0xff] }
0x268b   :  { %v8292_v25 = vpop.eup %8291  ;;  %7678 = vmatprep.subr.mxu0 %v8894_v9 }
0x268c   :  { %1296 = vrot.lane.b32.xlu0 %v8292_v25, %s8896_s25  ;;  %7679 = vmatpush3.msra.mxu0 %v9584_v14 }
0x268d   :  { %7648 = vmatmul.mubr.msk.f32.gmra.mxu0 %vm260_vm0, %v9462_v22  ;;  %7680 = vmatprep.subr.mxu0 %v8894_v9 }
0x268e   :  { %7650 = vmatprep.mubr.msk.f32.mxu0 %vm260_vm0, %v9444_v60  ;;  %7681 = vmatpush3.msra.mxu0 %v9593_v48  ;;  %v2107_v60 = vld [vmem:[%s10650_s7] sm:$0xff] }
0x268f   :  { %7682 = vmatprep.subr.mxu0 %v8894_v9 }
0x2690   :  { %7683 = vmatpush3.msra.mxu0 %v9603_v39 }
0x2691   :  { %7651 = vmatmul.mubr.msk.f32.gmra.mxu0 %vm260_vm0, %v9425_v29  ;;  %7698 = vmatprep.subr.mxu0 %v8894_v9  ;;  %v2108_v29 = vld [vmem:[%s10650_s7 + $0x8] sm:$0xff] }
0x2692   :  { %7653 = vmatprep.mubr.msk.f32.mxu0 %vm260_vm0, %v9406_v15  ;;  %v2109_v15 = vld [vmem:[%s10650_s7 + $0x10] sm:$0xff] }
0x2695   :  { %7654 = vmatmul.mubr.msk.f32.gmra.mxu0 %vm260_vm0, %v9382_v45  ;;  %v2110_v45 = vld [vmem:[%s10650_s7 + $0x18] sm:$0xff] }
0x2696   :  { %7684 = vmatprep.mubr.msk.f32.mxu0 %vm8895_vm1, %v8894_v9  ;;  %7656 = vmatprep.subr.mxu1 %v2110_v45 }
0x2697   :  { %7657 = vmatpush3.msra.mxu1 %v2110_v45 }
0x2698   :  { %7658 = vmatprep.subr.mxu1 %v2109_v15 }
0x2699   :  { %7685 = vmatmul.mubr.f32.vlgmr.msra.gmra.mxu0 %v8894_v9  ;;  %7659 = vmatpush3.msra.mxu1 %v2109_v15 }
0x269a   :  { %7699 = vmatpush3.msra.mxu0 %v9577_v36  ;;  %7706 = vmatprep.mubr.msk.f32.mxu0 %vm8895_vm1, %v8894_v9 }
0x269b   :  { %7700 = vmatprep.subr.mxu0 %v8894_v9  ;;  %7660 = vmatprep.subr.mxu1 %v2108_v29 }
0x269c   :  { %7701 = vmatpush3.msra.mxu0 %v9584_v14  ;;  %7661 = vmatpush3.msra.mxu1 %v2108_v29 }
0x269d   :  { %7702 = vmatprep.subr.mxu0 %v8894_v9  ;;  %7662 = vmatprep.subr.mxu1 %v2107_v60 }
0x269e   :  { %7703 = vmatpush3.msra.mxu0 %v9593_v48  ;;  %7663 = vmatpush3.msra.mxu1 %v2107_v60 }
0x269f   :  { %7704 = vmatprep.subr.mxu0 %v8894_v9  ;;  %7687 = vmatprep.subr.mxu1 %v8894_v9 }
0x26a0   :  { %7705 = vmatpush3.msra.mxu0 %v9603_v39 }
0x26a1   :  { %7720 = vmatprep.subr.mxu0 %v8894_v9 }
0x26fe   :  { %v1297_v22 = vpop.permute.xlu0 %1296 }
0x26ff   :  { %v1299_v27 = vmul.f32 %v9542_v37, %v1297_v22 }
0x2701   :  { %2230 = vrot.lane.b32.xlu0 %v1299_v27, %s8897_s26 }
0x2739   :  { %v9645_v3 = vpop.f32.mrf.mxu0 }
0x273b   :  { %v2190_v49 = vpop.f32.mrf.mxu0 }
0x273c   :  { %v2301_v34 = vadd.f32 %v2300_v16, %v2190_v49  ;;  %v2306_v16 = vadd.f32 %v9659_v6, %v9645_v3 }
0x273d   :  { %v9647_v57 = vpop.f32.mrf.mxu0 }
0x273e   :  { %v2346_v5 = vadd.f32 %v9665_v21, %v2301_v34  ;;  %v2347_v34 = vadd.f32 %v9665_v21, %v2306_v16 }
0x273f   :  { %v9649_v51 = vpop.f32.mrf.mxu0 }
0x2741   :  { %v9651_v62 = vpop.f32.mrf.mxu0 }
0x2743   :  { %v9653_v0 = vpop.f32.mrf.mxu0 }
0x2745   :  { %v9655_v2 = vpop.f32.mrf.mxu0 }
0x2747   :  { %v9657_v31 = vpop.f32.mrf.mxu0 }
0x2749   :  { %v7646_v8 = vpop.f32.mrf.mxu0 }
0x274b   :  { %v2420_v11 = vpop.f32.mrf.mxu0 }
0x274d   :  { %v7649_v55 = vpop.f32.mrf.mxu0 }
0x274f   :  { %v2430_v12 = vpop.f32.mrf.mxu0 }
0x2751   :  { %v7652_v23 = vpop.f32.mrf.mxu0 }
0x2753   :  { %v2440_v18 = vpop.f32.mrf.mxu0 }
0x2755   :  { %v9661_v61 = vpop.f32.mrf.mxu0 }
0x2757   :  { %v9663_v19 = vpop.f32.mrf.mxu0 }
0x2759   :  { %v2645_v24 = vpop.f32.mrf.mxu0 }
0x275a   :  { %v2649_v26 = vadd.f32 %v2645_v24, %v2346_v5 }
0x275b   :  { %v7686_v59 = vpop.f32.mrf.mxu0 }
0x275c   :  { %8293 = vtanh.f32 %v2649_v26 }
0x2769   :  { %v8294_v52 = vpop.eup %8293 }
0x276a   :  { %2659 = vrot.lane.b32.xlu1 %v8294_v52, %s8896_s25 }
0x2773   :  { %v2231_v28 = vpop.permute.xlu0 %2230 }
0x2774   :  { %7634 = vmatmul.mubr.msk.f32.gmra.mxu1 %vm260_vm0, %v2231_v28 }
0x2775   :  { %7664 = vmatprep.mubr.msk.f32.mxu1 %vm260_vm0, %v9218_v4  ;;  %v6902_v4 = vmul.f32 -1.442695, %v2649_v26 }
0x2777   :  { %8295 = vpow2.f32 %v6902_v4 }
0x2778   :  { %7665 = vmatmul.mubr.msk.f32.vlgmr.msra.gmra.mxu1 %vm260_vm0, %v9242_v33 }
0x2779   :  { %7667 = vmatprep.mubr.msk.f32.mxu1 %vm260_vm0, %v9261_v50  ;;  %7688 = vmatpush3.msra.mxu1 %v9577_v36 }
0x277a   :  { %7689 = vmatprep.subr.mxu1 %v8894_v9 }
0x277b   :  { %7690 = vmatpush3.msra.mxu1 %v9584_v14 }
0x277c   :  { %7668 = vmatmul.mubr.msk.f32.gmra.mxu1 %vm260_vm0, %v9280_v17  ;;  %7691 = vmatprep.subr.mxu1 %v8894_v9 }
0x277d   :  { %7670 = vmatprep.mubr.msk.f32.mxu1 %vm260_vm0, %v9299_v40  ;;  %7692 = vmatpush3.msra.mxu1 %v9593_v48 }
0x277e   :  { %7693 = vmatprep.subr.mxu1 %v8894_v9 }
0x277f   :  { %7694 = vmatpush3.msra.mxu1 %v9603_v39 }
0x2780   :  { %7671 = vmatmul.mubr.msk.f32.gmra.mxu1 %vm260_vm0, %v9323_v53  ;;  %7709 = vmatprep.subr.mxu1 %v8894_v9  ;;  %v9696_v53 = vpop.f32.mrf.mxu1 }
0x2781   :  { %7673 = vmatprep.mubr.msk.f32.mxu1 %vm260_vm0, %v9369_v10 }
0x2782   :  { %v9698_v54 = vpop.f32.mrf.mxu1 }
0x2784   :  { %7674 = vmatmul.mubr.msk.f32.gmra.mxu1 %vm260_vm0, %v2231_v28  ;;  %v8296_v33 = vpop.eup %8295  ;;  %v9700_v10 = vpop.f32.mrf.mxu1 }
0x2785   :  { %7695 = vmatprep.mubr.msk.f32.mxu1 %vm8895_vm1, %v8894_v9  ;;  %v2653_v50 = vadd.f32 1.0, %v8296_v33 }
0x2786   :  { %v9702_v30 = vpop.f32.mrf.mxu1 }
0x2787   :  { %8297 = vrcp.f32 %v2653_v50 }
0x2794   :  { %v8298_v17 = vpop.eup %8297 }
0x2795   :  { %v2657_v22 = vmul.f32 0.0, %v8298_v17 }
0x27dc   :  { %v2660_v40 = vpop.permute.xlu1 %2659 }
0x27dd   :  { %v2662_v20 = vmul.f32 %v8298_v17, %v2660_v40 }
0x27df   :  { %2664 = vrot.lane.b32.xlu1 %v2662_v20, %s8897_s26 }
0x2834   :  { %v9704_v32 = vpop.f32.mrf.mxu1 }
0x2836   :  { %v9706_v56 = vpop.f32.mrf.mxu1 }
0x2838   :  { %v7666_v1 = vpop.f32.mrf.mxu1 }
0x2839   :  { %v2531_v35 = vadd.f32 %v7666_v1, %v7646_v8 }
0x283a   :  { %v2525_v63 = vpop.f32.mrf.mxu1 }
0x283b   :  { %v2526_v37 = vadd.f32 %v2525_v63, %v2420_v11  ;;  %v9711_v38 = vadd.f32 %v9708_v58, %v2531_v35 }
0x283c   :  { %v7669_v41 = vpop.f32.mrf.mxu1 }
0x283d   :  { %v2541_v46 = vadd.f32 %v7669_v41, %v7649_v55  ;;  %v9714_v7 = vadd.f32 %v9708_v58, %v2526_v37  ;;  %v2311_v37 = vadd.f32 %v9698_v54, %v9649_v51 }
0x283e   :  { %v2535_v42 = vpop.f32.mrf.mxu1 }
0x283f   :  { %v2536_v43 = vadd.f32 %v2535_v42, %v2430_v12  ;;  %v9717_v44 = vadd.f32 %v9708_v58, %v2541_v46  ;;  %v2348_v41 = vadd.f32 %v9665_v21, %v2311_v37 }
0x2840   :  { %v7672_v13 = vpop.f32.mrf.mxu1 }
0x2841   :  { %v2551_v47 = vadd.f32 %v7672_v13, %v7652_v23  ;;  %v9720_v25 = vadd.f32 %v9708_v58, %v2536_v43 }
0x2842   :  { %v2545_v45 = vpop.f32.mrf.mxu1 }
0x2843   :  { %v2546_v15 = vadd.f32 %v2545_v45, %v2440_v18  ;;  %v9723_v29 = vadd.f32 %v9708_v58, %v2551_v47 }
0x2844   :  { %v9744_v23 = vpop.f32.mrf.mxu1 }
0x2845   :  { %v9726_v60 = vadd.f32 %v9708_v58, %v2546_v15 }
0x2846   :  { %v9748_v18 = vpop.f32.mrf.mxu1 }
0x2851   :  { %v2665_v27 = vpop.permute.xlu1 %2664 }
0x2852   :  { %v2667_v49 = vadd.f32 %v2665_v27, %v2657_v22 }
0x2854   :  { %8299 = vtanh.f32 %v2667_v49 }
0x2861   :  { %v8300_v8 = vpop.eup %8299 }
0x2862   :  { %2670 = vrot.lane.b32.xlu1 %v8300_v8, %s8896_s25 }
0x28d4   :  { %v2671_v11 = vpop.permute.xlu1 %2670 }
0x28d5   :  { %v2673_v55 = vmul.f32 %v8298_v17, %v2671_v11 }
0x28d7   :  { %2675 = vrot.lane.b32.xlu1 %v2673_v55, %s8897_s26 }
0x2949   :  { %v9730_v12 = vpop.permute.xlu1 %2675 }
0x294a   :  { %7696 = vmatmul.mubr.msk.f32.vlgmr.msra.gmra.mxu1 %vm260_vm0, %v9730_v12 }
0x294b   :  { %7710 = vmatpush3.msra.mxu1 %v9577_v36  ;;  %7717 = vmatprep.mubr.msk.f32.mxu1 %vm8895_vm1, %v8894_v9 }
0x294c   :  { %7711 = vmatprep.subr.mxu1 %v8894_v9 }
0x294d   :  { %7712 = vmatpush3.msra.mxu1 %v9584_v14 }
0x294e   :  { %7713 = vmatprep.subr.mxu1 %v8894_v9 }
0x294f   :  { %7714 = vmatpush3.msra.mxu1 %v9593_v48 }
0x2950   :  { %7715 = vmatprep.subr.mxu1 %v8894_v9 }
0x2951   :  { %7716 = vmatpush3.msra.mxu1 %v9603_v39 }
0x2952   :  { %7731 = vmatprep.subr.mxu1 %v8894_v9 }
0x2a0a   :  { %v2745_v5 = vpop.f32.mrf.mxu1 }
0x2a0b   :  { %v2749_v24 = vadd.f32 %v2745_v5, %v2347_v34  ;;  %v2316_v5 = vadd.f32 %v9696_v53, %v9647_v57 }
0x2a0c   :  { %v7697_v26 = vpop.f32.mrf.mxu1 }
0x2a0d   :  { %8301 = vtanh.f32 %v2749_v24  ;;  %v6904_v52 = vmul.f32 -1.442695, %v2749_v24  ;;  %v2349_v24 = vadd.f32 %v9665_v21, %v2316_v5 }
0x2a0f   :  { %8303 = vpow2.f32 %v6904_v52 }
0x2a1a   :  { %v8302_v59 = vpop.eup %8301 }
0x2a1b   :  { %2759 = vrot.lane.b32.xlu0 %v8302_v59, %s8896_s25 }
0x2a1c   :  { %v8304_v28 = vpop.eup %8303 }
0x2a1d   :  { %v2753_v4 = vadd.f32 1.0, %v8304_v28 }
0x2a1f   :  { %8305 = vrcp.f32 %v2753_v4 }
0x2a2c   :  { %v8306_v33 = vpop.eup %8305 }
0x2a2d   :  { %v2757_v3 = vmul.f32 %v8306_v33, %v2667_v49 }
0x2a8d   :  { %v2760_v50 = vpop.permute.xlu0 %2759 }
0x2a8e   :  { %v2762_v17 = vmul.f32 %v8306_v33, %v2760_v50 }
0x2a90   :  { %2764 = vrot.lane.b32.xlu1 %v2762_v17, %s8897_s26 }
0x2b02   :  { %v2765_v6 = vpop.permute.xlu1 %2764 }
0x2b03   :  { %v2767_v40 = vadd.f32 %v2765_v6, %v2757_v3 }
0x2b05   :  { %8307 = vtanh.f32 %v2767_v40 }
0x2b12   :  { %v8308_v20 = vpop.eup %8307 }
0x2b13   :  { %2770 = vrot.lane.b32.xlu0 %v8308_v20, %s8896_s25 }
0x2b85   :  { %v2771_v1 = vpop.permute.xlu0 %2770 }
0x2b86   :  { %v2773_v35 = vmul.f32 %v8306_v33, %v2771_v1 }
0x2b88   :  { %2775 = vrot.lane.b32.xlu1 %v2773_v35, %s8897_s26 }
0x2bfa   :  { %v9755_v63 = vpop.permute.xlu1 %2775 }
0x2bfb   :  { %7707 = vmatmul.mubr.msk.f32.vlgmr.msra.gmra.mxu0 %vm260_vm0, %v9755_v63 }
0x2bfc   :  { %7721 = vmatpush3.msra.mxu0 %v9577_v36  ;;  %7728 = vmatprep.mubr.msk.f32.mxu0 %vm8895_vm1, %v8894_v9 }
0x2bfd   :  { %7722 = vmatprep.subr.mxu0 %v8894_v9 }
0x2bfe   :  { %7723 = vmatpush3.msra.mxu0 %v9584_v14 }
0x2bff   :  { %7724 = vmatprep.subr.mxu0 %v8894_v9 }
0x2c00   :  { %7725 = vmatpush3.msra.mxu0 %v9593_v48 }
0x2c01   :  { %7726 = vmatprep.subr.mxu0 %v8894_v9 }
0x2c02   :  { %7727 = vmatpush3.msra.mxu0 %v9603_v39 }
0x2c03   :  { %7742 = vmatprep.subr.mxu0 %v8894_v9 }
0x2cbb   :  { %v2845_v46 = vpop.f32.mrf.mxu0 }
0x2cbc   :  { %v2849_v42 = vadd.f32 %v2845_v46, %v2348_v41  ;;  %v2321_v41 = vadd.f32 %v9702_v30, %v9653_v0 }
0x2cbd   :  { %v7708_v43 = vpop.f32.mrf.mxu0 }
0x2cbe   :  { %8309 = vtanh.f32 %v2849_v42  ;;  %v6906_v47 = vmul.f32 -1.442695, %v2849_v42  ;;  %v2350_v46 = vadd.f32 %v9665_v21, %v2321_v41 }
0x2cc0   :  { %8311 = vpow2.f32 %v6906_v47 }
0x2ccb   :  { %v8310_v13 = vpop.eup %8309 }
0x2ccc   :  { %2859 = vrot.lane.b32.xlu0 %v8310_v13, %s8896_s25 }
0x2ccd   :  { %v8312_v45 = vpop.eup %8311 }
0x2cce   :  { %v2853_v15 = vadd.f32 1.0, %v8312_v45 }
0x2cd0   :  { %8313 = vrcp.f32 %v2853_v15 }
0x2cdd   :  { %v8314_v22 = vpop.eup %8313 }
0x2cde   :  { %v2857_v51 = vmul.f32 %v8314_v22, %v2767_v40 }
0x2d3e   :  { %v2860_v27 = vpop.permute.xlu0 %2859 }
0x2d3f   :  { %v2862_v49 = vmul.f32 %v8314_v22, %v2860_v27 }
0x2d41   :  { %2864 = vrot.lane.b32.xlu1 %v2862_v49, %s8897_s26 }
0x2db3   :  { %v2865_v54 = vpop.permute.xlu1 %2864 }
0x2db4   :  { %v2867_v8 = vadd.f32 %v2865_v54, %v2857_v51 }
0x2db6   :  { %8315 = vtanh.f32 %v2867_v8 }
0x2dc3   :  { %v8316_v11 = vpop.eup %8315 }
0x2dc4   :  { %2870 = vrot.lane.b32.xlu0 %v8316_v11, %s8896_s25 }
0x2e36   :  { %v2871_v55 = vpop.permute.xlu0 %2870 }
0x2e37   :  { %v2873_v16 = vmul.f32 %v8314_v22, %v2871_v55 }
0x2e39   :  { %2875 = vrot.lane.b32.xlu1 %v2873_v16, %s8897_s26 }
0x2eab   :  { %v9776_v34 = vpop.permute.xlu1 %2875 }
0x2eac   :  { %7718 = vmatmul.mubr.msk.f32.vlgmr.msra.gmra.mxu1 %vm260_vm0, %v9776_v34 }
0x2ead   :  { %7732 = vmatpush3.msra.mxu1 %v9577_v36  ;;  %7739 = vmatprep.mubr.msk.f32.mxu1 %vm8895_vm1, %v8894_v9 }
0x2eae   :  { %7733 = vmatprep.subr.mxu1 %v8894_v9 }
0x2eaf   :  { %7734 = vmatpush3.msra.mxu1 %v9584_v14 }
0x2eb0   :  { %7735 = vmatprep.subr.mxu1 %v8894_v9 }
0x2eb1   :  { %7736 = vmatpush3.msra.mxu1 %v9593_v48 }
0x2eb2   :  { %7737 = vmatprep.subr.mxu1 %v8894_v9 }
0x2eb3   :  { %7738 = vmatpush3.msra.mxu1 %v9603_v39 }
0x2eb4   :  { %7753 = vmatprep.subr.mxu1 %v8894_v9 }
0x2f6c   :  { %v2945_v26 = vpop.f32.mrf.mxu1 }
0x2f6d   :  { %v2949_v59 = vadd.f32 %v2945_v26, %v2349_v24 }
0x2f6e   :  { %v7719_v52 = vpop.f32.mrf.mxu1 }
0x2f6f   :  { %8317 = vtanh.f32 %v2949_v59  ;;  %v6908_v4 = vmul.f32 -1.442695, %v2949_v59 }
0x2f71   :  { %8319 = vpow2.f32 %v6908_v4 }
0x2f7c   :  { %v8318_v28 = vpop.eup %8317 }
0x2f7d   :  { %2959 = vrot.lane.b32.xlu0 %v8318_v28, %s8896_s25 }
0x2f7e   :  { %v8320_v33 = vpop.eup %8319 }
0x2f7f   :  { %v2953_v50 = vadd.f32 1.0, %v8320_v33 }
0x2f81   :  { %8321 = vrcp.f32 %v2953_v50 }
0x2f8e   :  { %v8322_v17 = vpop.eup %8321 }
0x2f8f   :  { %v2957_v57 = vmul.f32 %v8322_v17, %v2867_v8 }
0x2fef   :  { %v2960_v3 = vpop.permute.xlu0 %2959 }
0x2ff0   :  { %v2962_v6 = vmul.f32 %v8322_v17, %v2960_v3 }
0x2ff2   :  { %2964 = vrot.lane.b32.xlu1 %v2962_v6, %s8897_s26 }
0x3064   :  { %v2965_v53 = vpop.permute.xlu1 %2964 }
0x3065   :  { %v2967_v40 = vadd.f32 %v2965_v53, %v2957_v57  ;;  %v9845_v57 = vld [vmem:[%s10650_s7 + $0x58] sm:$0xff] }
0x3067   :  { %8323 = vtanh.f32 %v2967_v40 }
0x3074   :  { %v8324_v20 = vpop.eup %8323 }
0x3075   :  { %2970 = vrot.lane.b32.xlu0 %v8324_v20, %s8896_s25  ;;  %v9863_v20 = vld [vmem:[%s10650_s7 + $0x48] sm:$0xff] }
0x30e7   :  { %v2971_v1 = vpop.permute.xlu0 %2970 }
0x30e8   :  { %v2973_v35 = vmul.f32 %v8322_v17, %v2971_v1  ;;  %v9870_v1 = vld [vmem:[%s10650_s7 + $0x40] sm:$0xff] }
0x30ea   :  { %2975 = vrot.lane.b32.xlu1 %v2973_v35, %s8897_s26  ;;  %v2331_v35 = vadd.f32 %v9706_v56, %v9657_v31 }
0x30ec   :  { %v2352_v41 = vadd.f32 %v9665_v21, %v2331_v35 }
0x315c   :  { %v9797_v37 = vpop.permute.xlu1 %2975 }
0x315d   :  { %7729 = vmatmul.mubr.msk.f32.vlgmr.msra.gmra.mxu0 %vm260_vm0, %v9797_v37 }
0x315e   :  { %7743 = vmatpush3.msra.mxu0 %v9577_v36  ;;  %7750 = vmatprep.mubr.msk.f32.mxu0 %vm8895_vm1, %v8894_v9 }
0x315f   :  { %7744 = vmatprep.subr.mxu0 %v8894_v9 }
0x3160   :  { %7745 = vmatpush3.msra.mxu0 %v9584_v14 }
0x3161   :  { %7746 = vmatprep.subr.mxu0 %v8894_v9 }
0x3162   :  { %7747 = vmatpush3.msra.mxu0 %v9593_v48 }
0x3163   :  { %7748 = vmatprep.subr.mxu0 %v8894_v9 }
0x3164   :  { %7749 = vmatpush3.msra.mxu0 %v9603_v39 }
0x3165   :  { %7764 = vmatprep.subr.mxu0 %v8894_v9 }
0x321d   :  { %v3045_v42 = vpop.f32.mrf.mxu0 }
0x321e   :  { %v3049_v43 = vadd.f32 %v3045_v42, %v2350_v46 }
0x321f   :  { %v7730_v13 = vpop.f32.mrf.mxu0 }
0x3220   :  { %8325 = vtanh.f32 %v3049_v43  ;;  %v6910_v45 = vmul.f32 -1.442695, %v3049_v43  ;;  %v2561_v13 = vadd.f32 %v9744_v23, %v9661_v61 }
0x3222   :  { %8327 = vpow2.f32 %v6910_v45 }
0x322d   :  { %v8326_v47 = vpop.eup %8325 }
0x322e   :  { %3059 = vrot.lane.b32.xlu0 %v8326_v47, %s8896_s25  ;;  %v2578_v47 = vadd.f32 %v9708_v58, %v2561_v13 }
0x322f   :  { %v8328_v15 = vpop.eup %8327 }
0x3230   :  { %v3053_v22 = vadd.f32 1.0, %v8328_v15 }
0x3232   :  { %8329 = vrcp.f32 %v3053_v22 }
0x323f   :  { %v8330_v27 = vpop.eup %8329 }
0x3240   :  { %v3057_v0 = vmul.f32 %v8330_v27, %v2967_v40  ;;  %v9854_v40 = vld [vmem:[%s10650_s7 + $0x50] sm:$0xff]  ;;  %s8898_s7 = smov 96  }
0x32a0   :  { %v3060_v49 = vpop.permute.xlu0 %3059 }
0x32a1   :  { %v3062_v51 = vmul.f32 %v8330_v27, %v3060_v49 }
0x32a3   :  { %3064 = vrot.lane.b32.xlu1 %v3062_v51, %s8897_s26 }
0x3315   :  { %v3065_v30 = vpop.permute.xlu1 %3064 }
0x3316   :  { %v3067_v54 = vadd.f32 %v3065_v30, %v3057_v0 }
0x3318   :  { %8331 = vtanh.f32 %v3067_v54 }
0x3325   :  { %v8332_v8 = vpop.eup %8331 }
0x3326   :  { %3070 = vrot.lane.b32.xlu0 %v8332_v8, %s8896_s25 }
0x3398   :  { %v3071_v11 = vpop.permute.xlu0 %3070 }
0x3399   :  { %v3073_v55 = vmul.f32 %v8330_v27, %v3071_v11 }
0x339b   :  { %3075 = vrot.lane.b32.xlu1 %v3073_v55, %s8897_s26 }
0x340d   :  { %v9818_v16 = vpop.permute.xlu1 %3075 }
0x340e   :  { %7740 = vmatmul.mubr.msk.f32.vlgmr.msra.gmra.mxu1 %vm260_vm0, %v9818_v16 }
0x340f   :  { %7754 = vmatpush3.msra.mxu1 %v9577_v36  ;;  %7761 = vmatprep.mubr.msk.f32.mxu1 %vm8895_vm1, %v8894_v9  ;;  %v2326_v36 = vadd.f32 %v9700_v10, %v9651_v62 }
0x3410   :  { %7755 = vmatprep.subr.mxu1 %v8894_v9 }
0x3411   :  { %7756 = vmatpush3.msra.mxu1 %v9584_v14  ;;  %v2351_v5 = vadd.f32 %v9665_v21, %v2326_v36 }
0x3412   :  { %7757 = vmatprep.subr.mxu1 %v8894_v9 }
0x3413   :  { %7758 = vmatpush3.msra.mxu1 %v9593_v48 }
0x3414   :  { %7759 = vmatprep.subr.mxu1 %v8894_v9 }
0x3415   :  { %7760 = vmatpush3.msra.mxu1 %v9603_v39 }
0x3416   :  { %7775 = vmatprep.subr.mxu1 %v8894_v9 }
0x34ce   :  { %v3145_v24 = vpop.f32.mrf.mxu1 }
0x34cf   :  { %v3149_v26 = vadd.f32 %v3145_v24, %v2351_v5 }
0x34d0   :  { %v7741_v59 = vpop.f32.mrf.mxu1 }
0x34d1   :  { %8333 = vtanh.f32 %v3149_v26  ;;  %v6912_v52 = vmul.f32 -1.442695, %v3149_v26 }
0x34d3   :  { %8335 = vpow2.f32 %v6912_v52 }
0x34de   :  { %v8334_v14 = vpop.eup %8333 }
0x34df   :  { %3159 = vrot.lane.b32.xlu0 %v8334_v14, %s8896_s25 }
0x34e0   :  { %v8336_v48 = vpop.eup %8335 }
0x34e1   :  { %v3153_v28 = vadd.f32 1.0, %v8336_v48 }
0x34e3   :  { %8337 = vrcp.f32 %v3153_v28 }
0x34f0   :  { %v8338_v39 = vpop.eup %8337 }
0x34f1   :  { %v3157_v62 = vmul.f32 %v8338_v39, %v3067_v54 }
0x3551   :  { %v3160_v4 = vpop.permute.xlu0 %3159 }
0x3552   :  { %v3162_v33 = vmul.f32 %v8338_v39, %v3160_v4 }
0x3554   :  { %3164 = vrot.lane.b32.xlu1 %v3162_v33, %s8897_s26 }
0x35c6   :  { %v3165_v10 = vpop.permute.xlu1 %3164 }
0x35c7   :  { %v9837_v50 = vadd.f32 %v3165_v10, %v3157_v62 }
0x35c9   :  { %8339 = vtanh.f32 %v9837_v50 }
0x35d6   :  { %v8340_v17 = vpop.eup %8339 }
0x35d7   :  { %3170 = vrot.lane.b32.xlu0 %v8340_v17, %s8896_s25  ;;  %v2336_v17 = vadd.f32 %v9704_v32, %v9655_v2 }
0x3649   :  { %v3171_v3 = vpop.permute.xlu0 %3170 }
0x364a   :  { %v3173_v6 = vmul.f32 %v8338_v39, %v3171_v3  ;;  %v2353_v3 = vadd.f32 %v9665_v21, %v2336_v17 }
0x364c   :  { %3175 = vrot.lane.b32.xlu1 %v3173_v6, %s8897_s26 }
0x36be   :  { %v9847_v53 = vpop.permute.xlu1 %3175 }
0x36bf   :  { %7751 = vmatmul.mubr.msk.f32.vlgmr.msra.gmra.mxu0 %vm260_vm0, %v9847_v53 }
0x36c0   :  { %7765 = vmatpush3.msra.mxu0 %v9845_v57  ;;  %7772 = vmatprep.mubr.msk.f32.mxu0 %vm8895_vm1, %v8894_v9 }
0x36c1   :  { %7766 = vmatprep.subr.mxu0 %v8894_v9 }
0x36c2   :  { %7767 = vmatpush3.msra.mxu0 %v9854_v40 }
0x36c3   :  { %7768 = vmatprep.subr.mxu0 %v8894_v9 }
0x36c4   :  { %7769 = vmatpush3.msra.mxu0 %v9863_v20 }
0x36c5   :  { %7770 = vmatprep.subr.mxu0 %v8894_v9 }
0x36c6   :  { %7771 = vmatpush3.msra.mxu0 %v9870_v1 }
0x36c7   :  { %7773 = vmatmul.mubr.f32.vlgmr.msra.gmra.mxu0 %v8894_v9  ;;  %7786 = vmatprep.subr.mxu0 %v8894_v9 }
0x36c8   :  { %7787 = vmatpush3.msra.mxu0 %v9845_v57  ;;  %7794 = vmatprep.mubr.msk.f32.mxu0 %vm8895_vm1, %v8894_v9 }
0x36c9   :  { %7788 = vmatprep.subr.mxu0 %v8894_v9 }
0x36ca   :  { %7789 = vmatpush3.msra.mxu0 %v9854_v40 }
0x36cb   :  { %7790 = vmatprep.subr.mxu0 %v8894_v9 }
0x36cc   :  { %7791 = vmatpush3.msra.mxu0 %v9863_v20 }
0x36cd   :  { %7792 = vmatprep.subr.mxu0 %v8894_v9 }
0x36ce   :  { %7793 = vmatpush3.msra.mxu0 %v9870_v1 }
0x36cf   :  { %7808 = vmatprep.subr.mxu0 %v8894_v9 }
0x377f   :  { %v3245_v46 = vpop.f32.mrf.mxu0 }
0x3780   :  { %v3249_v42 = vadd.f32 %v3245_v46, %v2352_v41  ;;  %v2556_v46 = vadd.f32 %v9748_v18, %v9663_v19 }
0x3781   :  { %v7752_v43 = vpop.f32.mrf.mxu0 }
0x3782   :  { %8341 = vtanh.f32 %v3249_v42  ;;  %v6914_v31 = vmul.f32 -1.442695, %v3249_v42  ;;  %v2577_v42 = vadd.f32 %v9708_v58, %v2556_v46 }
0x3787   :  { %v3440_v45 = vpop.f32.mrf.mxu0 }
0x3788   :  { %v3444_v15 = vadd.f32 %v3440_v45, %v2578_v47 }
0x3789   :  { %v7774_v22 = vpop.f32.mrf.mxu0 }
0x378a   :  { %8343 = vtanh.f32 %v3444_v15  ;;  %v6917_v56 = vmul.f32 -1.442695, %v3444_v15 }
0x378b   :  { %8345 = vpow2.f32 %v6914_v31 }
0x378c   :  { %8347 = vpow2.f32 %v6917_v56 }
0x378f   :  { %v8342_v27 = vpop.eup %8341 }
0x3790   :  { %3259 = vrot.lane.b32.xlu0 %v8342_v27, %s8896_s25 }
0x3797   :  { %v8344_v49 = vpop.eup %8343 }
0x3798   :  { %3454 = vrot.lane.b32.xlu1 %v8344_v49, %s8896_s25  ;;  %v8346_v51 = vpop.eup %8345 }
0x3799   :  { %v3253_v0 = vadd.f32 1.0, %v8346_v51  ;;  %v8348_v61 = vpop.eup %8347 }
0x379a   :  { %v3448_v23 = vadd.f32 1.0, %v8348_v61 }
0x379b   :  { %8349 = vrcp.f32 %v3253_v0 }
0x379c   :  { %8351 = vrcp.f32 %v3448_v23 }
0x37a8   :  { %v8350_v30 = vpop.eup %8349 }
0x37a9   :  { %v8352_v11 = vpop.eup %8351  ;;  %v3257_v5 = vmul.f32 %v8350_v30, %v9837_v50 }
0x37aa   :  { %v3452_v59 = vmul.f32 0.0, %v8352_v11 }
0x3802   :  { %v3260_v54 = vpop.permute.xlu0 %3259 }
0x3803   :  { %v3262_v8 = vmul.f32 %v8350_v30, %v3260_v54 }
0x3805   :  { %3264 = vrot.lane.b32.xlu0 %v3262_v8, %s8897_s26 }
0x380a   :  { %v3455_v55 = vpop.permute.xlu1 %3454 }
0x380b   :  { %v3457_v36 = vmul.f32 %v8352_v11, %v3455_v55 }
0x380d   :  { %3459 = vrot.lane.b32.xlu1 %v3457_v36, %s8897_s26 }
0x3877   :  { %v3265_v24 = vpop.permute.xlu0 %3264 }
0x3878   :  { %v9898_v26 = vadd.f32 %v3265_v24, %v3257_v5 }
0x387a   :  { %8353 = vtanh.f32 %v9898_v26 }
0x387f   :  { %v3460_v14 = vpop.permute.xlu1 %3459 }
0x3880   :  { %v3462_v52 = vadd.f32 %v3460_v14, %v3452_v59 }
0x3882   :  { %8355 = vtanh.f32 %v3462_v52 }
0x3887   :  { %v8354_v48 = vpop.eup %8353 }
0x3888   :  { %3270 = vrot.lane.b32.xlu0 %v8354_v48, %s8896_s25 }
0x388f   :  { %v8356_v28 = vpop.eup %8355 }
0x3890   :  { %3465 = vrot.lane.b32.xlu1 %v8356_v28, %s8896_s25 }
0x38fa   :  { %v3271_v39 = vpop.permute.xlu0 %3270 }
0x38fb   :  { %v3273_v4 = vmul.f32 %v8350_v30, %v3271_v39 }
0x38fd   :  { %3275 = vrot.lane.b32.xlu0 %v3273_v4, %s8897_s26 }
0x3902   :  { %v3466_v33 = vpop.permute.xlu1 %3465 }
0x3903   :  { %v3468_v62 = vmul.f32 %v8352_v11, %v3466_v33 }
0x3905   :  { %3470 = vrot.lane.b32.xlu1 %v3468_v62, %s8897_s26 }
0x396f   :  { %v9905_v10 = vpop.permute.xlu0 %3275 }
0x3970   :  { %7762 = vmatmul.mubr.msk.f32.vlgmr.msra.gmra.mxu1 %vm260_vm0, %v9905_v10 }
0x3971   :  { %7776 = vmatpush3.msra.mxu1 %v9845_v57  ;;  %7783 = vmatprep.mubr.msk.f32.mxu1 %vm8895_vm1, %v8894_v9 }
0x3972   :  { %7777 = vmatprep.subr.mxu1 %v8894_v9 }
0x3973   :  { %7778 = vmatpush3.msra.mxu1 %v9854_v40 }
0x3974   :  { %7779 = vmatprep.subr.mxu1 %v8894_v9 }
0x3975   :  { %7780 = vmatpush3.msra.mxu1 %v9863_v20 }
0x3976   :  { %7781 = vmatprep.subr.mxu1 %v8894_v9 }
0x3977   :  { %7782 = vmatpush3.msra.mxu1 %v9870_v1  ;;  %v9918_v50 = vpop.permute.xlu1 %3470 }
0x3978   :  { %7784 = vmatmul.mubr.msk.f32.vlgmr.msra.gmra.mxu1 %vm260_vm0, %v9918_v50  ;;  %7797 = vmatprep.subr.mxu1 %v8894_v9 }
0x3979   :  { %7798 = vmatpush3.msra.mxu1 %v9845_v57  ;;  %7805 = vmatprep.mubr.msk.f32.mxu1 %vm8895_vm1, %v8894_v9 }
0x397a   :  { %7799 = vmatprep.subr.mxu1 %v8894_v9 }
0x397b   :  { %7800 = vmatpush3.msra.mxu1 %v9854_v40 }
0x397c   :  { %7801 = vmatprep.subr.mxu1 %v8894_v9 }
0x397d   :  { %7802 = vmatpush3.msra.mxu1 %v9863_v20 }
0x397e   :  { %7803 = vmatprep.subr.mxu1 %v8894_v9 }
0x397f   :  { %7804 = vmatpush3.msra.mxu1 %v9870_v1 }
0x3980   :  { %7819 = vmatprep.subr.mxu1 %v8894_v9 }
0x3a30   :  { %v3345_v6 = vpop.f32.mrf.mxu1 }
0x3a31   :  { %v9936_v35 = vadd.f32 %v3345_v6, %v2353_v3 }
0x3a32   :  { %v7763_v41 = vpop.f32.mrf.mxu1 }
0x3a38   :  { %v3540_v43 = vpop.f32.mrf.mxu1 }
0x3a39   :  { %v3544_v13 = vadd.f32 %v3540_v43, %v2577_v42 }
0x3a3a   :  { %v7785_v47 = vpop.f32.mrf.mxu1 }
0x3a3b   :  { %8357 = vtanh.f32 %v3544_v13  ;;  %v6919_v15 = vmul.f32 -1.442695, %v3544_v13 }
0x3a3d   :  { %8359 = vpow2.f32 %v6919_v15 }
0x3a48   :  { %v8358_v45 = vpop.eup %8357 }
0x3a49   :  { %3554 = vrot.lane.b32.xlu0 %v8358_v45, %s8896_s25 }
0x3a4a   :  { %v8360_v2 = vpop.eup %8359 }
0x3a4b   :  { %v3548_v21 = vadd.f32 1.0, %v8360_v2 }
0x3a4d   :  { %8361 = vrcp.f32 %v3548_v21 }
0x3a5a   :  { %v8362_v32 = vpop.eup %8361 }
0x3a5b   :  { %v3552_v19 = vmul.f32 %v8362_v32, %v3462_v52 }
0x3abb   :  { %v3555_v22 = vpop.permute.xlu0 %3554 }
0x3abc   :  { %v3557_v27 = vmul.f32 %v8362_v32, %v3555_v22 }
0x3abe   :  { %3559 = vrot.lane.b32.xlu1 %v3557_v27, %s8897_s26 }
0x3b30   :  { %v3560_v18 = vpop.permute.xlu1 %3559 }
0x3b31   :  { %v3562_v58 = vadd.f32 %v3560_v18, %v3552_v19 }
0x3b33   :  { %8363 = vtanh.f32 %v3562_v58 }
0x3b40   :  { %v8364_v49 = vpop.eup %8363 }
0x3b41   :  { %3565 = vrot.lane.b32.xlu0 %v8364_v49, %s8896_s25 }
0x3bb3   :  { %v3566_v31 = vpop.permute.xlu0 %3565 }
0x3bb4   :  { %v3568_v56 = vmul.f32 %v8362_v32, %v3566_v31 }
0x3bb6   :  { %3570 = vrot.lane.b32.xlu1 %v3568_v56, %s8897_s26 }
0x3c28   :  { %v9945_v51 = vpop.permute.xlu1 %3570 }
0x3c29   :  { %7795 = vmatmul.mubr.msk.f32.vlgmr.msra.gmra.mxu0 %vm260_vm0, %v9945_v51 }
0x3c2a   :  { %7809 = vmatpush3.msra.mxu0 %v9845_v57  ;;  %7816 = vmatprep.mubr.msk.f32.mxu0 %vm8895_vm1, %v8894_v9 }
0x3c2b   :  { %7810 = vmatprep.subr.mxu0 %v8894_v9 }
0x3c2c   :  { %7811 = vmatpush3.msra.mxu0 %v9854_v40 }
0x3c2d   :  { %7812 = vmatprep.subr.mxu0 %v8894_v9 }
0x3c2e   :  { %7813 = vmatpush3.msra.mxu0 %v9863_v20 }
0x3c2f   :  { %7814 = vmatprep.subr.mxu0 %v8894_v9 }
0x3c30   :  { %7815 = vmatpush3.msra.mxu0 %v9870_v1 }
0x3c31   :  { %7830 = vmatprep.subr.mxu0 %v8894_v9 }
0x3ce9   :  { %v3640_v0 = vpop.f32.mrf.mxu0 }
0x3cea   :  { %v3644_v61 = vadd.f32 %v3640_v0, %v9723_v29 }
0x3ceb   :  { %v7796_v23 = vpop.f32.mrf.mxu0 }
0x3cec   :  { %8365 = vtanh.f32 %v3644_v61  ;;  %v6921_v54 = vmul.f32 -1.442695, %v3644_v61 }
0x3cee   :  { %8367 = vpow2.f32 %v6921_v54 }
0x3cf9   :  { %v8366_v30 = vpop.eup %8365 }
0x3cfa   :  { %3654 = vrot.lane.b32.xlu0 %v8366_v30, %s8896_s25 }
0x3cfb   :  { %v8368_v8 = vpop.eup %8367 }
0x3cfc   :  { %v3648_v11 = vadd.f32 1.0, %v8368_v8 }
0x3cfe   :  { %8369 = vrcp.f32 %v3648_v11 }
0x3d0b   :  { %v8370_v55 = vpop.eup %8369 }
0x3d0c   :  { %v3652_v24 = vmul.f32 %v8370_v55, %v3562_v58 }
0x3d6c   :  { %v3655_v36 = vpop.permute.xlu0 %3654 }
0x3d6d   :  { %v3657_v5 = vmul.f32 %v8370_v55, %v3655_v36 }
0x3d6f   :  { %3659 = vrot.lane.b32.xlu1 %v3657_v5, %s8897_s26 }
0x3de1   :  { %v3660_v59 = vpop.permute.xlu1 %3659 }
0x3de2   :  { %v3662_v14 = vadd.f32 %v3660_v59, %v3652_v24 }
0x3de4   :  { %8371 = vtanh.f32 %v3662_v14 }
0x3df1   :  { %v8372_v29 = vpop.eup %8371 }
0x3df2   :  { %3665 = vrot.lane.b32.xlu0 %v8372_v29, %s8896_s25 }
0x3e64   :  { %v3666_v52 = vpop.permute.xlu0 %3665 }
0x3e65   :  { %v3668_v48 = vmul.f32 %v8370_v55, %v3666_v52 }
0x3e67   :  { %3670 = vrot.lane.b32.xlu1 %v3668_v48, %s8897_s26 }
0x3ed9   :  { %v9964_v28 = vpop.permute.xlu1 %3670 }
0x3eda   :  { %7806 = vmatmul.mubr.msk.f32.vlgmr.msra.gmra.mxu1 %vm260_vm0, %v9964_v28 }
0x3edb   :  { %7820 = vmatpush3.msra.mxu1 %v9845_v57  ;;  %7827 = vmatprep.mubr.msk.f32.mxu1 %vm8895_vm1, %v8894_v9 }
0x3edc   :  { %7821 = vmatprep.subr.mxu1 %v8894_v9 }
0x3edd   :  { %7822 = vmatpush3.msra.mxu1 %v9854_v40 }
0x3ede   :  { %7823 = vmatprep.subr.mxu1 %v8894_v9 }
0x3edf   :  { %7824 = vmatpush3.msra.mxu1 %v9863_v20 }
0x3ee0   :  { %7825 = vmatprep.subr.mxu1 %v8894_v9 }
0x3ee1   :  { %7826 = vmatpush3.msra.mxu1 %v9870_v1 }
0x3ee2   :  { %7841 = vmatprep.subr.mxu1 %v8894_v9 }
0x3f9a   :  { %v3740_v39 = vpop.f32.mrf.mxu1 }
0x3f9b   :  { %v3744_v4 = vadd.f32 %v3740_v39, %v9726_v60 }
0x3f9c   :  { %v7807_v33 = vpop.f32.mrf.mxu1 }
0x3f9d   :  { %8373 = vtanh.f32 %v3744_v4  ;;  %v6923_v17 = vmul.f32 -1.442695, %v3744_v4 }
0x3f9f   :  { %8375 = vpow2.f32 %v6923_v17 }
0x3faa   :  { %v8374_v62 = vpop.eup %8373 }
0x3fab   :  { %3754 = vrot.lane.b32.xlu0 %v8374_v62, %s8896_s25 }
0x3fac   :  { %v8376_v3 = vpop.eup %8375 }
0x3fad   :  { %v3748_v6 = vadd.f32 1.0, %v8376_v3 }
0x3faf   :  { %8377 = vrcp.f32 %v3748_v6 }
0x3fbc   :  { %v8378_v41 = vpop.eup %8377 }
0x3fbd   :  { %v3752_v43 = vmul.f32 %v8378_v41, %v3662_v14 }
0x401d   :  { %v3755_v46 = vpop.permute.xlu0 %3754 }
0x401e   :  { %v3757_v42 = vmul.f32 %v8378_v41, %v3755_v46 }
0x4020   :  { %3759 = vrot.lane.b32.xlu1 %v3757_v42, %s8897_s26 }
0x4092   :  { %v3760_v13 = vpop.permute.xlu1 %3759 }
0x4093   :  { %v3762_v47 = vadd.f32 %v3760_v13, %v3752_v43 }
0x4095   :  { %8379 = vtanh.f32 %v3762_v47 }
0x40a2   :  { %v8380_v60 = vpop.eup %8379 }
0x40a3   :  { %3765 = vrot.lane.b32.xlu0 %v8380_v60, %s8896_s25 }
0x4115   :  { %v3766_v45 = vpop.permute.xlu0 %3765 }
0x4116   :  { %v3768_v15 = vmul.f32 %v8378_v41, %v3766_v45 }
0x4118   :  { %3770 = vrot.lane.b32.xlu1 %v3768_v15, %s8897_s26 }
0x418a   :  { %v9983_v2 = vpop.permute.xlu1 %3770 }
0x418b   :  { %7817 = vmatmul.mubr.msk.f32.vlgmr.msra.gmra.mxu0 %vm260_vm0, %v9983_v2 }
0x418c   :  { %7831 = vmatpush3.msra.mxu0 %v9845_v57  ;;  %7838 = vmatprep.mubr.msk.f32.mxu0 %vm8895_vm1, %v8894_v9 }
0x418d   :  { %7832 = vmatprep.subr.mxu0 %v8894_v9 }
0x418e   :  { %7833 = vmatpush3.msra.mxu0 %v9854_v40 }
0x418f   :  { %7834 = vmatprep.subr.mxu0 %v8894_v9 }
0x4190   :  { %7835 = vmatpush3.msra.mxu0 %v9863_v20 }
0x4191   :  { %7836 = vmatprep.subr.mxu0 %v8894_v9 }
0x4192   :  { %7837 = vmatpush3.msra.mxu0 %v9870_v1 }
0x424b   :  { %v3840_v21 = vpop.f32.mrf.mxu0 }
0x424c   :  { %v3844_v32 = vadd.f32 %v3840_v21, %v9717_v44 }
0x424d   :  { %v7818_v22 = vpop.f32.mrf.mxu0 }
0x424e   :  { %8381 = vtanh.f32 %v3844_v32  ;;  %v6925_v19 = vmul.f32 -1.442695, %v3844_v32 }
0x4250   :  { %8383 = vpow2.f32 %v6925_v19  ;;  %v4170_v19 = vld [vmem:[#allocation12 + $0x8] sm:$0xff] }
0x425b   :  { %v8382_v27 = vpop.eup %8381 }
0x425c   :  { %3854 = vrot.lane.b32.xlu0 %v8382_v27, %s8896_s25  ;;  %v4171_v27 = vld [vmem:[#allocation12 + $0x10] sm:$0xff] }
0x425d   :  { %v8384_v18 = vpop.eup %8383 }
0x425e   :  { %v3848_v58 = vadd.f32 1.0, %v8384_v18  ;;  %v4169_v18 = vld [vmem:[#allocation12] sm:$0xff] }
0x4260   :  { %8385 = vrcp.f32 %v3848_v58 }
0x426d   :  { %v8386_v49 = vpop.eup %8385 }
0x426e   :  { %v3852_v0 = vmul.f32 %v8386_v49, %v3762_v47 }
0x42ce   :  { %v3855_v31 = vpop.permute.xlu0 %3854 }
0x42cf   :  { %v3857_v56 = vmul.f32 %v8386_v49, %v3855_v31 }
0x42d1   :  { %3859 = vrot.lane.b32.xlu1 %v3857_v56, %s8897_s26 }
0x4343   :  { %v3860_v61 = vpop.permute.xlu1 %3859 }
0x4344   :  { %v3862_v23 = vadd.f32 %v3860_v61, %v3852_v0 }
0x4346   :  { %8387 = vtanh.f32 %v3862_v23 }
0x4353   :  { %v8388_v44 = vpop.eup %8387 }
0x4354   :  { %3865 = vrot.lane.b32.xlu0 %v8388_v44, %s8896_s25 }
0x43c6   :  { %v3866_v30 = vpop.permute.xlu0 %3865 }
0x43c7   :  { %v3868_v54 = vmul.f32 %v8386_v49, %v3866_v30 }
0x43c9   :  { %3870 = vrot.lane.b32.xlu1 %v3868_v54, %s8897_s26 }
0x443b   :  { %v10001_v8 = vpop.permute.xlu1 %3870 }
0x443c   :  { %7828 = vmatmul.mubr.msk.f32.vlgmr.msra.gmra.mxu1 %vm260_vm0, %v10001_v8 }
0x443d   :  { %7842 = vmatpush3.msra.mxu1 %v9845_v57  ;;  %7849 = vmatprep.mubr.msk.f32.mxu1 %vm8895_vm1, %v8894_v9 }
0x443e   :  { %7843 = vmatprep.subr.mxu1 %v8894_v9 }
0x443f   :  { %7844 = vmatpush3.msra.mxu1 %v9854_v40 }
0x4440   :  { %7845 = vmatprep.subr.mxu1 %v8894_v9 }
0x4441   :  { %7846 = vmatpush3.msra.mxu1 %v9863_v20 }
0x4442   :  { %7847 = vmatprep.subr.mxu1 %v8894_v9 }
0x4443   :  { %7848 = vmatpush3.msra.mxu1 %v9870_v1 }
0x44fc   :  { %v3940_v11 = vpop.f32.mrf.mxu1 }
0x44fd   :  { %v3944_v55 = vadd.f32 %v3940_v11, %v9720_v25 }
0x44fe   :  { %v7829_v36 = vpop.f32.mrf.mxu1 }
0x44ff   :  { %8389 = vtanh.f32 %v3944_v55  ;;  %v6927_v5 = vmul.f32 -1.442695, %v3944_v55 }
0x4501   :  { %8391 = vpow2.f32 %v6927_v5  ;;  %v4174_v5 = vld [vmem:[#allocation12 + $0x28] sm:$0xff] }
0x450c   :  { %v8390_v57 = vpop.eup %8389 }
0x450d   :  { %3954 = vrot.lane.b32.xlu0 %v8390_v57, %s8896_s25  ;;  %v4175_v57 = vld [vmem:[#allocation12 + $0x30] sm:$0xff] }
0x450e   :  { %v8392_v24 = vpop.eup %8391 }
0x450f   :  { %v3948_v40 = vadd.f32 1.0, %v8392_v24  ;;  %v4173_v24 = vld [vmem:[#allocation12 + $0x20] sm:$0xff] }
0x4511   :  { %8393 = vrcp.f32 %v3948_v40 }
0x451e   :  { %v8394_v59 = vpop.eup %8393 }
0x451f   :  { %v3952_v29 = vmul.f32 %v8394_v59, %v3862_v23 }
0x457f   :  { %v3955_v14 = vpop.permute.xlu0 %3954 }
0x4580   :  { %v3957_v20 = vmul.f32 %v8394_v59, %v3955_v14  ;;  %v6916_v14 = vmul.f32 -1.442695, %v9936_v35 }
0x4582   :  { %3959 = vrot.lane.b32.xlu1 %v3957_v20, %s8897_s26 }
0x45f4   :  { %v3960_v1 = vpop.permute.xlu1 %3959 }
0x45f5   :  { %v3962_v52 = vadd.f32 %v3960_v1, %v3952_v29  ;;  %v4188_v1 = vld [vmem:[#allocation15 + $0x38] sm:$0xff] }
0x45f7   :  { %8395 = vtanh.f32 %v3962_v52 }
0x4604   :  { %v8396_v25 = vpop.eup %8395 }
0x4605   :  { %3965 = vrot.lane.b32.xlu0 %v8396_v25, %s8896_s25 }
0x4677   :  { %v3966_v48 = vpop.permute.xlu0 %3965 }
0x4678   :  { %v3968_v39 = vmul.f32 %v8394_v59, %v3966_v48 }
0x467a   :  { %3970 = vrot.lane.b32.xlu1 %v3968_v39, %s8897_s26 }
0x46ec   :  { %v10019_v4 = vpop.permute.xlu1 %3970 }
0x46ed   :  { %7839 = vmatmul.mubr.msk.f32.vlgmr.msra.gmra.mxu0 %vm260_vm0, %v10019_v4 }
0x47ad   :  { %v4040_v33 = vpop.f32.mrf.mxu0 }
0x47ae   :  { %v4044_v62 = vadd.f32 %v4040_v33, %v9711_v38  ;;  %v4172_v38 = vld [vmem:[#allocation12 + $0x18] sm:$0xff] }
0x47af   :  { %v7840_v17 = vpop.f32.mrf.mxu0  ;;  %7872 = vmatprep.subr.mxu1 %v4172_v38 }
0x47b0   :  { %8397 = vtanh.f32 %v4044_v62  ;;  %v6929_v6 = vmul.f32 -1.442695, %v4044_v62 }
0x47b2   :  { %8399 = vpow2.f32 %v6929_v6 }
0x47bd   :  { %v8398_v3 = vpop.eup %8397 }
0x47be   :  { %4054 = vrot.lane.b32.xlu0 %v8398_v3, %s8896_s25  ;;  %v4186_v3 = vld [vmem:[#allocation15 + $0x28] sm:$0xff] }
0x47bf   :  { %v8400_v41 = vpop.eup %8399 }
0x47c0   :  { %v4048_v46 = vadd.f32 1.0, %v8400_v41 }
0x47c2   :  { %8401 = vrcp.f32 %v4048_v46  ;;  %v4185_v46 = vld [vmem:[#allocation15 + $0x20] sm:$0xff] }
0x47cf   :  { %v8402_v42 = vpop.eup %8401 }
0x47d0   :  { %v4052_v47 = vmul.f32 %v8402_v42, %v3962_v52 }
0x4830   :  { %v4055_v43 = vpop.permute.xlu0 %4054 }
0x4831   :  { %v4057_v13 = vmul.f32 %v8402_v42, %v4055_v43 }
0x4833   :  { %4059 = vrot.lane.b32.xlu1 %v4057_v13, %s8897_s26  ;;  %v10087_v13 = vld [vmem:[#allocation12 + $0x48] sm:$0xff] }
0x48a5   :  { %v4060_v60 = vpop.permute.xlu1 %4059 }
0x48a6   :  { %v4062_v45 = vadd.f32 %v4060_v60, %v4052_v47  ;;  %v10094_v47 = vld [vmem:[#allocation12 + $0x40] sm:$0xff] }
0x48a8   :  { %8403 = vtanh.f32 %v4062_v45 }
0x48b5   :  { %v8404_v15 = vpop.eup %8403 }
0x48b6   :  { %4065 = vrot.lane.b32.xlu0 %v8404_v15, %s8896_s25 }
0x4928   :  { %v4066_v21 = vpop.permute.xlu0 %4065 }
0x4929   :  { %v4068_v32 = vmul.f32 %v8402_v42, %v4066_v21  ;;  %v10081_v42 = vld [vmem:[#allocation12 + $0x50] sm:$0xff] }
0x492b   :  { %4070 = vrot.lane.b32.xlu1 %v4068_v32, %s8897_s26 }
0x499d   :  { %v10028_v22 = vpop.permute.xlu1 %4070 }
0x499e   :  { %7850 = vmatmul.mubr.msk.f32.vlgmr.msra.gmra.mxu1 %vm260_vm0, %v10028_v22 }
0x499f   :  { %7873 = vmatpush3.msra.mxu1 %v4172_v38  ;;  %7880 = vmatprep.mubr.msk.f32.mxu1 %vm260_vm0, %v9730_v12 }
0x49a0   :  { %7874 = vmatprep.subr.mxu1 %v4171_v27 }
0x49a1   :  { %7875 = vmatpush3.msra.mxu1 %v4171_v27 }
0x49a2   :  { %7876 = vmatprep.subr.mxu1 %v4170_v19 }
0x49a3   :  { %7877 = vmatpush3.msra.mxu1 %v4170_v19 }
0x49a4   :  { %7878 = vmatprep.subr.mxu1 %v4169_v18 }
0x49a5   :  { %7879 = vmatpush3.msra.mxu1 %v4169_v18 }
0x49a6   :  { %7881 = vmatmul.mubr.msk.f32.vlgmr.msra.gmra.mxu1 %vm260_vm0, %v9755_v63 }
0x49a7   :  { %7883 = vmatprep.mubr.msk.f32.mxu1 %vm260_vm0, %v9776_v34 }
0x49aa   :  { %7884 = vmatmul.mubr.msk.f32.gmra.mxu1 %vm260_vm0, %v9797_v37 }
0x49ab   :  { %7886 = vmatprep.mubr.msk.f32.mxu1 %vm260_vm0, %v9818_v16 }
0x49ae   :  { %7887 = vmatmul.mubr.msk.f32.gmra.mxu1 %vm260_vm0, %v9847_v53 }
0x49af   :  { %7889 = vmatprep.mubr.msk.f32.mxu1 %vm260_vm0, %v9905_v10 }
0x4a5e   :  { %v4140_v58 = vpop.f32.mrf.mxu1 }
0x4a5f   :  { %v4144_v49 = vadd.f32 %v4140_v58, %v9714_v7  ;;  %v4176_v7 = vld [vmem:[#allocation12 + $0x38] sm:$0xff] }
0x4a60   :  { %v7851_v31 = vpop.f32.mrf.mxu1  ;;  %7852 = vmatprep.subr.mxu0 %v4176_v7 }
0x4a61   :  { %8405 = vtanh.f32 %v4144_v49  ;;  %v6931_v0 = vmul.f32 -1.442695, %v4144_v49  ;;  %7853 = vmatpush3.msra.mxu0 %v4176_v7 }
0x4a62   :  { %7854 = vmatprep.subr.mxu0 %v4175_v57 }
0x4a63   :  { %8407 = vpow2.f32 %v6931_v0  ;;  %7855 = vmatpush3.msra.mxu0 %v4175_v57 }
0x4a64   :  { %7856 = vmatprep.subr.mxu0 %v4174_v5 }
0x4a65   :  { %7857 = vmatpush3.msra.mxu0 %v4174_v5 }
0x4a66   :  { %7858 = vmatprep.subr.mxu0 %v4173_v24  ;;  %v10138_v49 = vpop.f32.mrf.mxu1 }
0x4a67   :  { %7859 = vmatpush3.msra.mxu0 %v4173_v24 }
0x4a68   :  { %7892 = vmatprep.subr.mxu0 %v4188_v1  ;;  %v4374_v0 = vpop.f32.mrf.mxu1 }
0x4a6e   :  { %v8406_v56 = vpop.eup %8405 }
0x4a6f   :  { %4154 = vrot.lane.b32.xlu0 %v8406_v56, %s8896_s25 }
0x4a70   :  { %v8408_v61 = vpop.eup %8407 }
0x4a71   :  { %v4148_v23 = vadd.f32 1.0, %v8408_v61 }
0x4a73   :  { %8409 = vrcp.f32 %v4148_v23 }
0x4a80   :  { %v8410_v44 = vpop.eup %8409 }
0x4a81   :  { %v4152_v11 = vmul.f32 %v8410_v44, %v4062_v45 }
0x4ae1   :  { %v4155_v30 = vpop.permute.xlu0 %4154 }
0x4ae2   :  { %v4157_v54 = vmul.f32 %v8410_v44, %v4155_v30 }
0x4ae4   :  { %4159 = vrot.lane.b32.xlu1 %v4157_v54, %s8897_s26  ;;  %v10144_v54 = vld [vmem:[#allocation14] ss:$0 sm:$0xff] }
0x4b56   :  { %v4160_v55 = vpop.permute.xlu1 %4159 }
0x4b57   :  { %v4162_v36 = vadd.f32 %v4160_v55, %v4152_v11 }
0x4b59   :  { %8411 = vtanh.f32 %v4162_v36 }
0x4b5a   :  { %8413 = vtanh.f32 %v9936_v35  ;;  %v4187_v35 = vld [vmem:[#allocation15 + $0x30] sm:$0xff] }
0x4b5b   :  { %8415 = vpow2.f32 %v6916_v14 }
0x4b66   :  { %v8412_v40 = vpop.eup %8411 }
0x4b67   :  { %4165 = vrot.lane.b32.xlu0 %v8412_v40, %s8896_s25  ;;  %v8414_v59 = vpop.eup %8413 }
0x4b68   :  { %v8416_v20 = vpop.eup %8415 }
0x4b69   :  { %v3353_v29 = vadd.f32 1.0, %v8416_v20 }
0x4b6b   :  { %3359 = vrot.lane.b32.xlu0 %v8414_v59, %s8896_s25  ;;  %8417 = vrcp.f32 %v3353_v29 }
0x4b78   :  { %v10054_v48 = vpop.eup %8417 }
0x4b79   :  { %v3357_v17 = vmul.f32 %v10054_v48, %v9898_v26  ;;  %v10077_v26 = vld [vmem:[#allocation12 + $0x58] sm:$0xff] }
0x4bd9   :  { %v4166_v52 = vpop.permute.xlu0 %4165 }
0x4bda   :  { %v4168_v25 = vmul.f32 %v8410_v44, %v4166_v52 }
0x4bdc   :  { %4194 = vrot.lane.b32.xlu1 %v4168_v25, %s8897_s26 }
0x4bdd   :  { %v3360_v39 = vpop.permute.xlu0 %3359 }
0x4bde   :  { %v3362_v33 = vmul.f32 %v10054_v48, %v3360_v39 }
0x4be0   :  { %3364 = vrot.lane.b32.xlu0 %v3362_v33, %s8897_s26 }
0x4c4e   :  { %v4195_v62 = vpop.permute.xlu1 %4194 }
0x4c4f   :  { %7860 = vmatprep.mubr.msk.f32.mxu0 %vm260_vm0, %v4195_v62 }
0x4c50   :  { %7861 = vmatmul.mubr.msk.f32.vlgmr.msra.gmra.mxu0 %vm260_vm0, %v10028_v22 }
0x4c51   :  { %7863 = vmatprep.mubr.msk.f32.mxu0 %vm260_vm0, %v10019_v4  ;;  %7893 = vmatpush3.msra.mxu0 %v4188_v1  ;;  %v10187_v1 = vld [vmem:[#allocation17] ss:$0 sm:$0xff] }
0x4c52   :  { %v3365_v6 = vpop.permute.xlu0 %3364  ;;  %7894 = vmatprep.subr.mxu0 %v4187_v35 }
0x4c53   :  { %v3367_v41 = vadd.f32 %v3365_v6, %v3357_v17  ;;  %7895 = vmatpush3.msra.mxu0 %v4187_v35 }
0x4c54   :  { %7864 = vmatmul.mubr.msk.f32.gmra.mxu0 %vm260_vm0, %v10001_v8  ;;  %7896 = vmatprep.subr.mxu0 %v4186_v3 }
0x4c55   :  { %8419 = vtanh.f32 %v3367_v41  ;;  %7866 = vmatprep.mubr.msk.f32.mxu0 %vm260_vm0, %v9983_v2  ;;  %7897 = vmatpush3.msra.mxu0 %v4186_v3 }
0x4c56   :  { %7898 = vmatprep.subr.mxu0 %v4185_v46 }
0x4c57   :  { %7899 = vmatpush3.msra.mxu0 %v4185_v46 }
0x4c58   :  { %7867 = vmatmul.mubr.msk.f32.gmra.mxu0 %vm260_vm0, %v9964_v28  ;;  %7932 = vmatprep.subr.mxu0 %v8894_v9 }
0x4c59   :  { %7869 = vmatprep.mubr.msk.f32.mxu0 %vm260_vm0, %v9945_v51 }
0x4c5c   :  { %7870 = vmatmul.mubr.msk.f32.gmra.mxu0 %vm260_vm0, %v9918_v50 }
0x4c5d   :  { %7900 = vmatprep.mubr.msk.f32.mxu0 %vm260_vm0, %v4195_v62 }
0x4c60   :  { %7901 = vmatmul.mubr.msk.f32.vlgmr.msra.gmra.mxu0 %vm260_vm0, %v10028_v22 }
0x4c61   :  { %7903 = vmatprep.mubr.msk.f32.mxu0 %vm260_vm0, %v10019_v4  ;;  %7933 = vmatpush3.msra.mxu0 %v10077_v26 }
0x4c62   :  { %v8420_v43 = vpop.eup %8419  ;;  %7934 = vmatprep.subr.mxu0 %v8894_v9 }
0x4c63   :  { %3370 = vrot.lane.b32.xlu0 %v8420_v43, %s8896_s25  ;;  %7935 = vmatpush3.msra.mxu0 %v10081_v42 }
0x4c64   :  { %7904 = vmatmul.mubr.msk.f32.gmra.mxu0 %vm260_vm0, %v10001_v8  ;;  %7936 = vmatprep.subr.mxu0 %v8894_v9 }
0x4c65   :  { %7906 = vmatprep.mubr.msk.f32.mxu0 %vm260_vm0, %v9983_v2  ;;  %7937 = vmatpush3.msra.mxu0 %v10087_v13  ;;  %v4181_v2 = vld [vmem:[#allocation15] sm:$0xff] }
0x4c66   :  { %7938 = vmatprep.subr.mxu0 %v8894_v9 }
0x4c67   :  { %7939 = vmatpush3.msra.mxu0 %v10094_v47 }
0x4c68   :  { %7907 = vmatmul.mubr.msk.f32.gmra.mxu0 %vm260_vm0, %v9964_v28  ;;  %7954 = vmatprep.subr.mxu0 %v8894_v9  ;;  %v4182_v28 = vld [vmem:[#allocation15 + $0x8] sm:$0xff] }
0x4c69   :  { %7909 = vmatprep.mubr.msk.f32.mxu0 %vm260_vm0, %v9945_v51  ;;  %v4183_v51 = vld [vmem:[#allocation15 + $0x10] sm:$0xff] }
0x4c6c   :  { %7910 = vmatmul.mubr.msk.f32.gmra.mxu0 %vm260_vm0, %v9918_v50  ;;  %v4184_v50 = vld [vmem:[#allocation15 + $0x18] sm:$0xff] }
0x4c6d   :  { %7940 = vmatprep.mubr.msk.f32.mxu0 %vm8895_vm1, %v8894_v9  ;;  %7912 = vmatprep.subr.mxu1 %v4184_v50 }
0x4c6e   :  { %7913 = vmatpush3.msra.mxu1 %v4184_v50 }
0x4c6f   :  { %7914 = vmatprep.subr.mxu1 %v4183_v51 }
0x4c70   :  { %7941 = vmatmul.mubr.f32.vlgmr.msra.gmra.mxu0 %v8894_v9  ;;  %7915 = vmatpush3.msra.mxu1 %v4183_v51 }
0x4c71   :  { %7955 = vmatpush3.msra.mxu0 %v10077_v26  ;;  %7962 = vmatprep.mubr.msk.f32.mxu0 %vm8895_vm1, %v8894_v9 }
0x4c72   :  { %7956 = vmatprep.subr.mxu0 %v8894_v9  ;;  %7916 = vmatprep.subr.mxu1 %v4182_v28 }
0x4c73   :  { %7957 = vmatpush3.msra.mxu0 %v10081_v42  ;;  %7917 = vmatpush3.msra.mxu1 %v4182_v28 }
0x4c74   :  { %7958 = vmatprep.subr.mxu0 %v8894_v9  ;;  %7918 = vmatprep.subr.mxu1 %v4181_v2 }
0x4c75   :  { %7959 = vmatpush3.msra.mxu0 %v10087_v13  ;;  %7919 = vmatpush3.msra.mxu1 %v4181_v2 }
0x4c76   :  { %7960 = vmatprep.subr.mxu0 %v8894_v9  ;;  %7943 = vmatprep.subr.mxu1 %v8894_v9 }
0x4c77   :  { %7961 = vmatpush3.msra.mxu0 %v10094_v47 }
0x4c78   :  { %7976 = vmatprep.subr.mxu0 %v8894_v9 }
0x4cd5   :  { %v3371_v8 = vpop.permute.xlu0 %3370 }
0x4cd6   :  { %v3373_v4 = vmul.f32 %v10054_v48, %v3371_v8 }
0x4cd8   :  { %4304 = vrot.lane.b32.xlu0 %v3373_v4, %s8897_s26 }
0x4d10   :  { %v10124_v60 = vpop.f32.mrf.mxu0 }
0x4d12   :  { %v4264_v45 = vpop.f32.mrf.mxu0 }
0x4d13   :  { %v4375_v23 = vadd.f32 %v4374_v0, %v4264_v45  ;;  %v4380_v0 = vadd.f32 %v10138_v49, %v10124_v60 }
0x4d14   :  { %v10126_v38 = vpop.f32.mrf.mxu0 }
0x4d15   :  { %v4420_v11 = vadd.f32 %v10144_v54, %v4375_v23  ;;  %v4421_v23 = vadd.f32 %v10144_v54, %v4380_v0 }
0x4d16   :  { %v10128_v15 = vpop.f32.mrf.mxu0 }
0x4d18   :  { %v10130_v21 = vpop.f32.mrf.mxu0 }
0x4d1a   :  { %v10132_v32 = vpop.f32.mrf.mxu0 }
0x4d1c   :  { %v10134_v22 = vpop.f32.mrf.mxu0 }
0x4d1e   :  { %v10136_v27 = vpop.f32.mrf.mxu0 }
0x4d20   :  { %v7902_v19 = vpop.f32.mrf.mxu0 }
0x4d22   :  { %v4494_v18 = vpop.f32.mrf.mxu0 }
0x4d24   :  { %v7905_v58 = vpop.f32.mrf.mxu0 }
0x4d26   :  { %v4504_v31 = vpop.f32.mrf.mxu0 }
0x4d28   :  { %v7908_v56 = vpop.f32.mrf.mxu0 }
0x4d2a   :  { %v4514_v61 = vpop.f32.mrf.mxu0 }
0x4d2c   :  { %v10140_v44 = vpop.f32.mrf.mxu0 }
0x4d2e   :  { %v10142_v30 = vpop.f32.mrf.mxu0 }
0x4d30   :  { %v4719_v55 = vpop.f32.mrf.mxu0 }
0x4d31   :  { %v4723_v36 = vadd.f32 %v4719_v55, %v4420_v11 }
0x4d32   :  { %v7942_v7 = vpop.f32.mrf.mxu0 }
0x4d33   :  { %8421 = vtanh.f32 %v4723_v36 }
0x4d40   :  { %v8422_v57 = vpop.eup %8421 }
0x4d41   :  { %4733 = vrot.lane.b32.xlu1 %v8422_v57, %s8896_s25 }
0x4d4a   :  { %v4305_v5 = vpop.permute.xlu0 %4304 }
0x4d4b   :  { %7890 = vmatmul.mubr.msk.f32.gmra.mxu1 %vm260_vm0, %v4305_v5 }
0x4d4c   :  { %7920 = vmatprep.mubr.msk.f32.mxu1 %vm260_vm0, %v9730_v12  ;;  %v6966_v12 = vmul.f32 -1.442695, %v4723_v36 }
0x4d4e   :  { %8423 = vpow2.f32 %v6966_v12 }
0x4d4f   :  { %7921 = vmatmul.mubr.msk.f32.vlgmr.msra.gmra.mxu1 %vm260_vm0, %v9755_v63 }
0x4d50   :  { %7923 = vmatprep.mubr.msk.f32.mxu1 %vm260_vm0, %v9776_v34  ;;  %7944 = vmatpush3.msra.mxu1 %v10077_v26 }
0x4d51   :  { %7945 = vmatprep.subr.mxu1 %v8894_v9 }
0x4d52   :  { %7946 = vmatpush3.msra.mxu1 %v10081_v42 }
0x4d53   :  { %7924 = vmatmul.mubr.msk.f32.gmra.mxu1 %vm260_vm0, %v9797_v37  ;;  %7947 = vmatprep.subr.mxu1 %v8894_v9 }
0x4d54   :  { %7926 = vmatprep.mubr.msk.f32.mxu1 %vm260_vm0, %v9818_v16  ;;  %7948 = vmatpush3.msra.mxu1 %v10087_v13 }
0x4d55   :  { %7949 = vmatprep.subr.mxu1 %v8894_v9 }
0x4d56   :  { %7950 = vmatpush3.msra.mxu1 %v10094_v47 }
0x4d57   :  { %7927 = vmatmul.mubr.msk.f32.gmra.mxu1 %vm260_vm0, %v9847_v53  ;;  %7965 = vmatprep.subr.mxu1 %v8894_v9  ;;  %v10175_v53 = vpop.f32.mrf.mxu1 }
0x4d58   :  { %7929 = vmatprep.mubr.msk.f32.mxu1 %vm260_vm0, %v9905_v10 }
0x4d59   :  { %v10177_v40 = vpop.f32.mrf.mxu1 }
0x4d5b   :  { %7930 = vmatmul.mubr.msk.f32.gmra.mxu1 %vm260_vm0, %v4305_v5  ;;  %v8424_v63 = vpop.eup %8423  ;;  %v10179_v10 = vpop.f32.mrf.mxu1 }
0x4d5c   :  { %7951 = vmatprep.mubr.msk.f32.mxu1 %vm8895_vm1, %v8894_v9  ;;  %v4727_v34 = vadd.f32 1.0, %v8424_v63 }
0x4d5d   :  { %v10181_v59 = vpop.f32.mrf.mxu1 }
0x4d5e   :  { %8425 = vrcp.f32 %v4727_v34 }
0x4d6b   :  { %v8426_v37 = vpop.eup %8425 }
0x4d6c   :  { %v4731_v8 = vmul.f32 0.0, %v8426_v37 }
0x4db3   :  { %v4734_v16 = vpop.permute.xlu1 %4733 }
0x4db4   :  { %v4736_v24 = vmul.f32 %v8426_v37, %v4734_v16 }
0x4db6   :  { %4738 = vrot.lane.b32.xlu1 %v4736_v24, %s8897_s26 }
0x4e0b   :  { %v10183_v14 = vpop.f32.mrf.mxu1 }
0x4e0d   :  { %v10185_v20 = vpop.f32.mrf.mxu1 }
0x4e0f   :  { %v7922_v29 = vpop.f32.mrf.mxu1 }
0x4e10   :  { %v4605_v52 = vadd.f32 %v7922_v29, %v7902_v19 }
0x4e11   :  { %v4599_v25 = vpop.f32.mrf.mxu1 }
0x4e12   :  { %v4600_v48 = vadd.f32 %v4599_v25, %v4494_v18  ;;  %v10190_v39 = vadd.f32 %v10187_v1, %v4605_v52 }
0x4e13   :  { %v7925_v33 = vpop.f32.mrf.mxu1 }
0x4e14   :  { %v4615_v62 = vadd.f32 %v7925_v33, %v7905_v58  ;;  %v10193_v35 = vadd.f32 %v10187_v1, %v4600_v48  ;;  %v4385_v48 = vadd.f32 %v10177_v40, %v10128_v15 }
0x4e15   :  { %v4609_v17 = vpop.f32.mrf.mxu1 }
0x4e16   :  { %v4610_v3 = vadd.f32 %v4609_v17, %v4504_v31  ;;  %v10196_v6 = vadd.f32 %v10187_v1, %v4615_v62  ;;  %v4422_v33 = vadd.f32 %v10144_v54, %v4385_v48 }
0x4e17   :  { %v7928_v41 = vpop.f32.mrf.mxu1 }
0x4e18   :  { %v4625_v46 = vadd.f32 %v7928_v41, %v7908_v56  ;;  %v10199_v43 = vadd.f32 %v10187_v1, %v4610_v3 }
0x4e19   :  { %v4619_v50 = vpop.f32.mrf.mxu1 }
0x4e1a   :  { %v4620_v51 = vadd.f32 %v4619_v50, %v4514_v61  ;;  %v10202_v28 = vadd.f32 %v10187_v1, %v4625_v46 }
0x4e1b   :  { %v10223_v56 = vpop.f32.mrf.mxu1 }
0x4e1c   :  { %v10205_v2 = vadd.f32 %v10187_v1, %v4620_v51 }
0x4e1d   :  { %v10227_v61 = vpop.f32.mrf.mxu1 }
0x4e28   :  { %v4739_v4 = vpop.permute.xlu1 %4738 }
0x4e29   :  { %v4741_v45 = vadd.f32 %v4739_v4, %v4731_v8 }
0x4e2b   :  { %8427 = vtanh.f32 %v4741_v45 }
0x4e38   :  { %v8428_v19 = vpop.eup %8427 }
0x4e39   :  { %4744 = vrot.lane.b32.xlu1 %v8428_v19, %s8896_s25 }
0x4eab   :  { %v4745_v18 = vpop.permute.xlu1 %4744 }
0x4eac   :  { %v10208_v58 = vmul.f32 %v8426_v37, %v4745_v18 }
0x4eae   :  { %4749 = vrot.lane.b32.xlu1 %v10208_v58, %s8897_s26 }
0x4f20   :  { %v4750_v31 = vpop.permute.xlu1 %4749 }
0x4f21   :  { %7952 = vmatmul.mubr.msk.f32.vlgmr.msra.gmra.mxu1 %vm260_vm0, %v4750_v31 }
0x4f22   :  { %7966 = vmatpush3.msra.mxu1 %v10077_v26  ;;  %7973 = vmatprep.mubr.msk.f32.mxu1 %vm8895_vm1, %v8894_v9 }
0x4f23   :  { %7967 = vmatprep.subr.mxu1 %v8894_v9 }
0x4f24   :  { %7968 = vmatpush3.msra.mxu1 %v10081_v42 }
0x4f25   :  { %7969 = vmatprep.subr.mxu1 %v8894_v9 }
0x4f26   :  { %7970 = vmatpush3.msra.mxu1 %v10087_v13 }
0x4f27   :  { %7971 = vmatprep.subr.mxu1 %v8894_v9 }
0x4f28   :  { %7972 = vmatpush3.msra.mxu1 %v10094_v47 }
0x4f29   :  { %7987 = vmatprep.subr.mxu1 %v8894_v9 }
0x4fe1   :  { %v4819_v11 = vpop.f32.mrf.mxu1 }
0x4fe2   :  { %v4823_v55 = vadd.f32 %v4819_v11, %v4421_v23  ;;  %v4390_v11 = vadd.f32 %v10175_v53, %v10126_v38 }
0x4fe3   :  { %v7953_v36 = vpop.f32.mrf.mxu1 }
0x4fe4   :  { %8429 = vtanh.f32 %v4823_v55  ;;  %v6968_v57 = vmul.f32 -1.442695, %v4823_v55  ;;  %v4423_v55 = vadd.f32 %v10144_v54, %v4390_v11 }
0x4fe6   :  { %8431 = vpow2.f32 %v6968_v57 }
0x4ff1   :  { %v8430_v7 = vpop.eup %8429 }
0x4ff2   :  { %4833 = vrot.lane.b32.xlu0 %v8430_v7, %s8896_s25 }
0x4ff3   :  { %v8432_v5 = vpop.eup %8431 }
0x4ff4   :  { %v4827_v12 = vadd.f32 1.0, %v8432_v5 }
0x4ff6   :  { %8433 = vrcp.f32 %v4827_v12 }
0x5003   :  { %v8434_v63 = vpop.eup %8433 }
0x5004   :  { %v4831_v60 = vmul.f32 %v8434_v63, %v4741_v45 }
0x5064   :  { %v4834_v34 = vpop.permute.xlu0 %4833 }
0x5065   :  { %v4836_v37 = vmul.f32 %v8434_v63, %v4834_v34 }
0x5067   :  { %4838 = vrot.lane.b32.xlu1 %v4836_v37, %s8897_s26 }
0x50d9   :  { %v4839_v49 = vpop.permute.xlu1 %4838 }
0x50da   :  { %v4841_v16 = vadd.f32 %v4839_v49, %v4831_v60 }
0x50dc   :  { %8435 = vtanh.f32 %v4841_v16 }
0x50e9   :  { %v8436_v24 = vpop.eup %8435 }
0x50ea   :  { %4844 = vrot.lane.b32.xlu0 %v8436_v24, %s8896_s25 }
0x515c   :  { %v4845_v29 = vpop.permute.xlu0 %4844 }
0x515d   :  { %v10233_v52 = vmul.f32 %v8434_v63, %v4845_v29 }
0x515f   :  { %4849 = vrot.lane.b32.xlu1 %v10233_v52, %s8897_s26 }
0x51d1   :  { %v4850_v25 = vpop.permute.xlu1 %4849 }
0x51d2   :  { %7963 = vmatmul.mubr.msk.f32.vlgmr.msra.gmra.mxu0 %vm260_vm0, %v4850_v25 }
0x51d3   :  { %7977 = vmatpush3.msra.mxu0 %v10077_v26  ;;  %7984 = vmatprep.mubr.msk.f32.mxu0 %vm8895_vm1, %v8894_v9 }
0x51d4   :  { %7978 = vmatprep.subr.mxu0 %v8894_v9 }
0x51d5   :  { %7979 = vmatpush3.msra.mxu0 %v10081_v42 }
0x51d6   :  { %7980 = vmatprep.subr.mxu0 %v8894_v9 }
0x51d7   :  { %7981 = vmatpush3.msra.mxu0 %v10087_v13 }
0x51d8   :  { %7982 = vmatprep.subr.mxu0 %v8894_v9 }
0x51d9   :  { %7983 = vmatpush3.msra.mxu0 %v10094_v47 }
0x51da   :  { %7998 = vmatprep.subr.mxu0 %v8894_v9 }
0x5292   :  { %v4919_v62 = vpop.f32.mrf.mxu0 }
0x5293   :  { %v4923_v17 = vadd.f32 %v4919_v62, %v4422_v33  ;;  %v4395_v33 = vadd.f32 %v10181_v59, %v10132_v32 }
0x5294   :  { %v7964_v3 = vpop.f32.mrf.mxu0 }
0x5295   :  { %8437 = vtanh.f32 %v4923_v17  ;;  %v6970_v46 = vmul.f32 -1.442695, %v4923_v17  ;;  %v4424_v62 = vadd.f32 %v10144_v54, %v4395_v33 }
0x5297   :  { %8439 = vpow2.f32 %v6970_v46 }
0x52a2   :  { %v8438_v41 = vpop.eup %8437 }
0x52a3   :  { %4933 = vrot.lane.b32.xlu0 %v8438_v41, %s8896_s25 }
0x52a4   :  { %v8440_v50 = vpop.eup %8439 }
0x52a5   :  { %v4927_v51 = vadd.f32 1.0, %v8440_v50 }
0x52a7   :  { %8441 = vrcp.f32 %v4927_v51 }
0x52b4   :  { %v8442_v8 = vpop.eup %8441 }
0x52b5   :  { %v4931_v15 = vmul.f32 %v8442_v8, %v4841_v16 }
0x5315   :  { %v4934_v4 = vpop.permute.xlu0 %4933 }
0x5316   :  { %v4936_v45 = vmul.f32 %v8442_v8, %v4934_v4 }
0x5318   :  { %4938 = vrot.lane.b32.xlu1 %v4936_v45, %s8897_s26 }
0x538a   :  { %v4939_v40 = vpop.permute.xlu1 %4938 }
0x538b   :  { %v4941_v19 = vadd.f32 %v4939_v40, %v4931_v15 }
0x538d   :  { %8443 = vtanh.f32 %v4941_v19 }
0x539a   :  { %v8444_v18 = vpop.eup %8443 }
0x539b   :  { %4944 = vrot.lane.b32.xlu0 %v8444_v18, %s8896_s25 }
0x540d   :  { %v4945_v31 = vpop.permute.xlu0 %4944 }
0x540e   :  { %v10254_v0 = vmul.f32 %v8442_v8, %v4945_v31 }
0x5410   :  { %4949 = vrot.lane.b32.xlu1 %v10254_v0, %s8897_s26 }
0x5482   :  { %v4950_v23 = vpop.permute.xlu1 %4949 }
0x5483   :  { %7974 = vmatmul.mubr.msk.f32.vlgmr.msra.gmra.mxu1 %vm260_vm0, %v4950_v23 }
0x5484   :  { %7988 = vmatpush3.msra.mxu1 %v10077_v26  ;;  %7995 = vmatprep.mubr.msk.f32.mxu1 %vm8895_vm1, %v8894_v9 }
0x5485   :  { %7989 = vmatprep.subr.mxu1 %v8894_v9 }
0x5486   :  { %7990 = vmatpush3.msra.mxu1 %v10081_v42 }
0x5487   :  { %7991 = vmatprep.subr.mxu1 %v8894_v9 }
0x5488   :  { %7992 = vmatpush3.msra.mxu1 %v10087_v13 }
0x5489   :  { %7993 = vmatprep.subr.mxu1 %v8894_v9 }
0x548a   :  { %7994 = vmatpush3.msra.mxu1 %v10094_v47 }
0x548b   :  { %8009 = vmatprep.subr.mxu1 %v8894_v9 }
0x5543   :  { %v5019_v36 = vpop.f32.mrf.mxu1 }
0x5544   :  { %v5023_v7 = vadd.f32 %v5019_v36, %v4423_v55 }
0x5545   :  { %v7975_v57 = vpop.f32.mrf.mxu1 }
0x5546   :  { %8445 = vtanh.f32 %v5023_v7  ;;  %v6972_v12 = vmul.f32 -1.442695, %v5023_v7 }
0x5548   :  { %8447 = vpow2.f32 %v6972_v12 }
0x5553   :  { %v8446_v5 = vpop.eup %8445 }
0x5554   :  { %5033 = vrot.lane.b32.xlu0 %v8446_v5, %s8896_s25 }
0x5555   :  { %v8448_v63 = vpop.eup %8447 }
0x5556   :  { %v5027_v34 = vadd.f32 1.0, %v8448_v63 }
0x5558   :  { %8449 = vrcp.f32 %v5027_v34 }
0x5565   :  { %v8450_v37 = vpop.eup %8449 }
0x5566   :  { %v5031_v38 = vmul.f32 %v8450_v37, %v4941_v19 }
0x55c6   :  { %v5034_v60 = vpop.permute.xlu0 %5033 }
0x55c7   :  { %v5036_v49 = vmul.f32 %v8450_v37, %v5034_v60 }
0x55c9   :  { %5038 = vrot.lane.b32.xlu1 %v5036_v49, %s8897_s26 }
0x563b   :  { %v5039_v53 = vpop.permute.xlu1 %5038 }
0x563c   :  { %v5041_v16 = vadd.f32 %v5039_v53, %v5031_v38  ;;  %v10324_v38 = vld [vmem:[#allocation15 + $0x58] sm:$0xff] }
0x563e   :  { %8451 = vtanh.f32 %v5041_v16 }
0x564b   :  { %v8452_v24 = vpop.eup %8451 }
0x564c   :  { %5044 = vrot.lane.b32.xlu0 %v8452_v24, %s8896_s25  ;;  %v10333_v24 = vld [vmem:[#allocation15 + $0x48] sm:$0xff] }
0x56be   :  { %v5045_v29 = vpop.permute.xlu0 %5044 }
0x56bf   :  { %v10275_v25 = vmul.f32 %v8450_v37, %v5045_v29  ;;  %v10337_v29 = vld [vmem:[#allocation15 + $0x40] sm:$0xff] }
0x56c1   :  { %5049 = vrot.lane.b32.xlu1 %v10275_v25, %s8897_s26 }
0x5733   :  { %v5050_v48 = vpop.permute.xlu1 %5049 }
0x5734   :  { %7985 = vmatmul.mubr.msk.f32.vlgmr.msra.gmra.mxu0 %vm260_vm0, %v5050_v48  ;;  %v4405_v48 = vadd.f32 %v10185_v20, %v10136_v27 }
0x5735   :  { %7999 = vmatpush3.msra.mxu0 %v10077_v26  ;;  %8006 = vmatprep.mubr.msk.f32.mxu0 %vm8895_vm1, %v8894_v9 }
0x5736   :  { %8000 = vmatprep.subr.mxu0 %v8894_v9  ;;  %v4426_v33 = vadd.f32 %v10144_v54, %v4405_v48 }
0x5737   :  { %8001 = vmatpush3.msra.mxu0 %v10081_v42 }
0x5738   :  { %8002 = vmatprep.subr.mxu0 %v8894_v9 }
0x5739   :  { %8003 = vmatpush3.msra.mxu0 %v10087_v13 }
0x573a   :  { %8004 = vmatprep.subr.mxu0 %v8894_v9 }
0x573b   :  { %8005 = vmatpush3.msra.mxu0 %v10094_v47 }
0x573c   :  { %8020 = vmatprep.subr.mxu0 %v8894_v9 }
0x57f4   :  { %v5119_v17 = vpop.f32.mrf.mxu0 }
0x57f5   :  { %v5123_v3 = vadd.f32 %v5119_v17, %v4424_v62 }
0x57f6   :  { %v7986_v41 = vpop.f32.mrf.mxu0 }
0x57f7   :  { %8453 = vtanh.f32 %v5123_v3  ;;  %v6974_v50 = vmul.f32 -1.442695, %v5123_v3  ;;  %v4635_v41 = vadd.f32 %v10223_v56, %v10140_v44 }
0x57f9   :  { %8455 = vpow2.f32 %v6974_v50 }
0x5804   :  { %v8454_v46 = vpop.eup %8453 }
0x5805   :  { %5133 = vrot.lane.b32.xlu0 %v8454_v46, %s8896_s25  ;;  %v4652_v46 = vadd.f32 %v10187_v1, %v4635_v41 }
0x5806   :  { %v8456_v51 = vpop.eup %8455 }
0x5807   :  { %v5127_v8 = vadd.f32 1.0, %v8456_v51 }
0x5809   :  { %8457 = vrcp.f32 %v5127_v8 }
0x5816   :  { %v8458_v4 = vpop.eup %8457 }
0x5817   :  { %v5131_v32 = vmul.f32 %v8458_v4, %v5041_v16  ;;  %v10327_v16 = vld [vmem:[#allocation15 + $0x50] sm:$0xff] }
0x5877   :  { %v5134_v45 = vpop.permute.xlu0 %5133 }
0x5878   :  { %v5136_v15 = vmul.f32 %v8458_v4, %v5134_v45 }
0x587a   :  { %5138 = vrot.lane.b32.xlu1 %v5136_v15, %s8897_s26 }
0x58ec   :  { %v5139_v59 = vpop.permute.xlu1 %5138 }
0x58ed   :  { %v5141_v40 = vadd.f32 %v5139_v59, %v5131_v32 }
0x58ef   :  { %8459 = vtanh.f32 %v5141_v40 }
0x58fc   :  { %v8460_v19 = vpop.eup %8459 }
0x58fd   :  { %5144 = vrot.lane.b32.xlu0 %v8460_v19, %s8896_s25 }
0x596f   :  { %v5145_v18 = vpop.permute.xlu0 %5144 }
0x5970   :  { %v10296_v31 = vmul.f32 %v8458_v4, %v5145_v18 }
0x5972   :  { %5149 = vrot.lane.b32.xlu1 %v10296_v31, %s8897_s26 }
0x59e4   :  { %v5150_v23 = vpop.permute.xlu1 %5149 }
0x59e5   :  { %7996 = vmatmul.mubr.msk.f32.vlgmr.msra.gmra.mxu1 %vm260_vm0, %v5150_v23 }
0x59e6   :  { %8010 = vmatpush3.msra.mxu1 %v10077_v26  ;;  %8017 = vmatprep.mubr.msk.f32.mxu1 %vm8895_vm1, %v8894_v9  ;;  %v4400_v26 = vadd.f32 %v10179_v10, %v10130_v21 }
0x59e7   :  { %8011 = vmatprep.subr.mxu1 %v8894_v9 }
0x59e8   :  { %8012 = vmatpush3.msra.mxu1 %v10081_v42  ;;  %v4425_v11 = vadd.f32 %v10144_v54, %v4400_v26 }
0x59e9   :  { %8013 = vmatprep.subr.mxu1 %v8894_v9 }
0x59ea   :  { %8014 = vmatpush3.msra.mxu1 %v10087_v13 }
0x59eb   :  { %8015 = vmatprep.subr.mxu1 %v8894_v9 }
0x59ec   :  { %8016 = vmatpush3.msra.mxu1 %v10094_v47 }
0x59ed   :  { %8031 = vmatprep.subr.mxu1 %v8894_v9 }
0x5aa5   :  { %v5219_v55 = vpop.f32.mrf.mxu1 }
0x5aa6   :  { %v5223_v36 = vadd.f32 %v5219_v55, %v4425_v11 }
0x5aa7   :  { %v7997_v7 = vpop.f32.mrf.mxu1 }
0x5aa8   :  { %8461 = vtanh.f32 %v5223_v36  ;;  %v6976_v57 = vmul.f32 -1.442695, %v5223_v36 }
0x5aaa   :  { %8463 = vpow2.f32 %v6976_v57 }
0x5ab5   :  { %v8462_v42 = vpop.eup %8461 }
0x5ab6   :  { %5233 = vrot.lane.b32.xlu0 %v8462_v42, %s8896_s25 }
0x5ab7   :  { %v8464_v13 = vpop.eup %8463 }
0x5ab8   :  { %v5227_v5 = vadd.f32 1.0, %v8464_v13 }
0x5aba   :  { %8465 = vrcp.f32 %v5227_v5 }
0x5ac7   :  { %v8466_v47 = vpop.eup %8465 }
0x5ac8   :  { %v5231_v21 = vmul.f32 %v8466_v47, %v5141_v40 }
0x5b28   :  { %v5234_v12 = vpop.permute.xlu0 %5233 }
0x5b29   :  { %v5236_v63 = vmul.f32 %v8466_v47, %v5234_v12 }
0x5b2b   :  { %5238 = vrot.lane.b32.xlu1 %v5236_v63, %s8897_s26 }
0x5b9d   :  { %v5239_v10 = vpop.permute.xlu1 %5238 }
0x5b9e   :  { %v10316_v34 = vadd.f32 %v5239_v10, %v5231_v21 }
0x5ba0   :  { %8467 = vtanh.f32 %v10316_v34 }
0x5bad   :  { %v8468_v37 = vpop.eup %8467 }
0x5bae   :  { %5244 = vrot.lane.b32.xlu0 %v8468_v37, %s8896_s25  ;;  %v4410_v37 = vadd.f32 %v10183_v14, %v10134_v22 }
0x5c20   :  { %v5245_v60 = vpop.permute.xlu0 %5244 }
0x5c21   :  { %v10320_v49 = vmul.f32 %v8466_v47, %v5245_v60  ;;  %v4427_v60 = vadd.f32 %v10144_v54, %v4410_v37 }
0x5c23   :  { %5249 = vrot.lane.b32.xlu1 %v10320_v49, %s8897_s26 }
0x5c95   :  { %v5250_v53 = vpop.permute.xlu1 %5249 }
0x5c96   :  { %8007 = vmatmul.mubr.msk.f32.vlgmr.msra.gmra.mxu0 %vm260_vm0, %v5250_v53 }
0x5c97   :  { %8021 = vmatpush3.msra.mxu0 %v10324_v38  ;;  %8028 = vmatprep.mubr.msk.f32.mxu0 %vm8895_vm1, %v8894_v9 }
0x5c98   :  { %8022 = vmatprep.subr.mxu0 %v8894_v9 }
0x5c99   :  { %8023 = vmatpush3.msra.mxu0 %v10327_v16 }
0x5c9a   :  { %8024 = vmatprep.subr.mxu0 %v8894_v9 }
0x5c9b   :  { %8025 = vmatpush3.msra.mxu0 %v10333_v24 }
0x5c9c   :  { %8026 = vmatprep.subr.mxu0 %v8894_v9 }
0x5c9d   :  { %8027 = vmatpush3.msra.mxu0 %v10337_v29 }
0x5c9e   :  { %8029 = vmatmul.mubr.f32.vlgmr.msra.gmra.mxu0 %v8894_v9  ;;  %8042 = vmatprep.subr.mxu0 %v8894_v9 }
0x5c9f   :  { %8043 = vmatpush3.msra.mxu0 %v10324_v38  ;;  %8050 = vmatprep.mubr.msk.f32.mxu0 %vm8895_vm1, %v8894_v9 }
0x5ca0   :  { %8044 = vmatprep.subr.mxu0 %v8894_v9 }
0x5ca1   :  { %8045 = vmatpush3.msra.mxu0 %v10327_v16 }
0x5ca2   :  { %8046 = vmatprep.subr.mxu0 %v8894_v9 }
0x5ca3   :  { %8047 = vmatpush3.msra.mxu0 %v10333_v24 }
0x5ca4   :  { %8048 = vmatprep.subr.mxu0 %v8894_v9 }
0x5ca5   :  { %8049 = vmatpush3.msra.mxu0 %v10337_v29 }
0x5ca6   :  { %8064 = vmatprep.subr.mxu0 %v8894_v9 }
0x5d56   :  { %v5319_v62 = vpop.f32.mrf.mxu0 }
0x5d57   :  { %v5323_v17 = vadd.f32 %v5319_v62, %v4426_v33  ;;  %v4630_v62 = vadd.f32 %v10227_v61, %v10142_v30 }
0x5d58   :  { %v8008_v3 = vpop.f32.mrf.mxu0 }
0x5d59   :  { %8469 = vtanh.f32 %v5323_v17  ;;  %v6978_v27 = vmul.f32 -1.442695, %v5323_v17  ;;  %v4651_v17 = vadd.f32 %v10187_v1, %v4630_v62 }
0x5d5e   :  { %v5514_v50 = vpop.f32.mrf.mxu0 }
0x5d5f   :  { %v5518_v51 = vadd.f32 %v5514_v50, %v4652_v46 }
0x5d60   :  { %v8030_v8 = vpop.f32.mrf.mxu0 }
0x5d61   :  { %8471 = vtanh.f32 %v5518_v51  ;;  %v6981_v20 = vmul.f32 -1.442695, %v5518_v51 }
0x5d62   :  { %8473 = vpow2.f32 %v6978_v27 }
0x5d63   :  { %8475 = vpow2.f32 %v6981_v20 }
0x5d66   :  { %v8470_v4 = vpop.eup %8469 }
0x5d67   :  { %5333 = vrot.lane.b32.xlu0 %v8470_v4, %s8896_s25 }
0x5d6e   :  { %v8472_v45 = vpop.eup %8471 }
0x5d6f   :  { %5528 = vrot.lane.b32.xlu1 %v8472_v45, %s8896_s25  ;;  %v8474_v15 = vpop.eup %8473 }
0x5d70   :  { %v5327_v32 = vadd.f32 1.0, %v8474_v15  ;;  %v8476_v44 = vpop.eup %8475 }
0x5d71   :  { %v5522_v56 = vadd.f32 1.0, %v8476_v44 }
0x5d72   :  { %8477 = vrcp.f32 %v5327_v32 }
0x5d73   :  { %8479 = vrcp.f32 %v5522_v56 }
0x5d7f   :  { %v8478_v59 = vpop.eup %8477 }
0x5d80   :  { %v8480_v18 = vpop.eup %8479  ;;  %v5331_v11 = vmul.f32 %v8478_v59, %v10316_v34 }
0x5d81   :  { %v5526_v7 = vmul.f32 0.0, %v8480_v18 }
0x5dd9   :  { %v5334_v40 = vpop.permute.xlu0 %5333 }
0x5dda   :  { %v5336_v19 = vmul.f32 %v8478_v59, %v5334_v40 }
0x5ddc   :  { %5338 = vrot.lane.b32.xlu0 %v5336_v19, %s8897_s26 }
0x5de1   :  { %v5529_v23 = vpop.permute.xlu1 %5528 }
0x5de2   :  { %v5531_v26 = vmul.f32 %v8480_v18, %v5529_v23 }
0x5de4   :  { %5533 = vrot.lane.b32.xlu1 %v5531_v26, %s8897_s26 }
0x5e4e   :  { %v5339_v55 = vpop.permute.xlu0 %5338 }
0x5e4f   :  { %v10365_v36 = vadd.f32 %v5339_v55, %v5331_v11 }
0x5e51   :  { %8481 = vtanh.f32 %v10365_v36 }
0x5e56   :  { %v5534_v42 = vpop.permute.xlu1 %5533 }
0x5e57   :  { %v5536_v57 = vadd.f32 %v5534_v42, %v5526_v7 }
0x5e59   :  { %8483 = vtanh.f32 %v5536_v57 }
0x5e5e   :  { %v8482_v13 = vpop.eup %8481 }
0x5e5f   :  { %5344 = vrot.lane.b32.xlu0 %v8482_v13, %s8896_s25 }
0x5e66   :  { %v8484_v5 = vpop.eup %8483 }
0x5e67   :  { %5539 = vrot.lane.b32.xlu1 %v8484_v5, %s8896_s25 }
0x5ed1   :  { %v5345_v47 = vpop.permute.xlu0 %5344 }
0x5ed2   :  { %v10370_v12 = vmul.f32 %v8478_v59, %v5345_v47 }
0x5ed4   :  { %5349 = vrot.lane.b32.xlu0 %v10370_v12, %s8897_s26 }
0x5ed9   :  { %v5540_v63 = vpop.permute.xlu1 %5539 }
0x5eda   :  { %v10374_v21 = vmul.f32 %v8480_v18, %v5540_v63 }
0x5edc   :  { %5544 = vrot.lane.b32.xlu1 %v10374_v21, %s8897_s26 }
0x5f46   :  { %v5350_v10 = vpop.permute.xlu0 %5349 }
0x5f47   :  { %8018 = vmatmul.mubr.msk.f32.vlgmr.msra.gmra.mxu1 %vm260_vm0, %v5350_v10 }
0x5f48   :  { %8032 = vmatpush3.msra.mxu1 %v10324_v38  ;;  %8039 = vmatprep.mubr.msk.f32.mxu1 %vm8895_vm1, %v8894_v9 }
0x5f49   :  { %8033 = vmatprep.subr.mxu1 %v8894_v9 }
0x5f4a   :  { %8034 = vmatpush3.msra.mxu1 %v10327_v16 }
0x5f4b   :  { %8035 = vmatprep.subr.mxu1 %v8894_v9 }
0x5f4c   :  { %8036 = vmatpush3.msra.mxu1 %v10333_v24 }
0x5f4d   :  { %8037 = vmatprep.subr.mxu1 %v8894_v9 }
0x5f4e   :  { %8038 = vmatpush3.msra.mxu1 %v10337_v29  ;;  %v5545_v34 = vpop.permute.xlu1 %5544 }
0x5f4f   :  { %8040 = vmatmul.mubr.msk.f32.vlgmr.msra.gmra.mxu1 %vm260_vm0, %v5545_v34  ;;  %8053 = vmatprep.subr.mxu1 %v8894_v9 }
0x5f50   :  { %8054 = vmatpush3.msra.mxu1 %v10324_v38  ;;  %8061 = vmatprep.mubr.msk.f32.mxu1 %vm8895_vm1, %v8894_v9 }
0x5f51   :  { %8055 = vmatprep.subr.mxu1 %v8894_v9 }
0x5f52   :  { %8056 = vmatpush3.msra.mxu1 %v10327_v16 }
0x5f53   :  { %8057 = vmatprep.subr.mxu1 %v8894_v9 }
0x5f54   :  { %8058 = vmatpush3.msra.mxu1 %v10333_v24 }
0x5f55   :  { %8059 = vmatprep.subr.mxu1 %v8894_v9 }
0x5f56   :  { %8060 = vmatpush3.msra.mxu1 %v10337_v29 }
0x5f57   :  { %8075 = vmatprep.subr.mxu1 %v8894_v9 }
0x6007   :  { %v5419_v53 = vpop.f32.mrf.mxu1 }
0x6008   :  { %v10403_v48 = vadd.f32 %v5419_v53, %v4427_v60 }
0x6009   :  { %v8019_v33 = vpop.f32.mrf.mxu1 }
0x600f   :  { %v5614_v3 = vpop.f32.mrf.mxu1 }
0x6010   :  { %v5618_v41 = vadd.f32 %v5614_v3, %v4651_v17 }
0x6011   :  { %v8041_v46 = vpop.f32.mrf.mxu1 }
0x6012   :  { %8485 = vtanh.f32 %v5618_v41  ;;  %v6983_v51 = vmul.f32 -1.442695, %v5618_v41 }
0x6014   :  { %8487 = vpow2.f32 %v6983_v51 }
0x601f   :  { %v8486_v50 = vpop.eup %8485 }
0x6020   :  { %5628 = vrot.lane.b32.xlu0 %v8486_v50, %s8896_s25 }
0x6021   :  { %v8488_v22 = vpop.eup %8487 }
0x6022   :  { %v5622_v54 = vadd.f32 1.0, %v8488_v22 }
0x6024   :  { %8489 = vrcp.f32 %v5622_v54 }
0x6031   :  { %v8490_v14 = vpop.eup %8489 }
0x6032   :  { %v5626_v30 = vmul.f32 %v8490_v14, %v5536_v57 }
0x6092   :  { %v5629_v8 = vpop.permute.xlu0 %5628 }
0x6093   :  { %v5631_v4 = vmul.f32 %v8490_v14, %v5629_v8 }
0x6095   :  { %5633 = vrot.lane.b32.xlu1 %v5631_v4, %s8897_s26 }
0x6107   :  { %v5634_v61 = vpop.permute.xlu1 %5633 }
0x6108   :  { %v5636_v1 = vadd.f32 %v5634_v61, %v5626_v30 }
0x610a   :  { %8491 = vtanh.f32 %v5636_v1 }
0x6117   :  { %v8492_v45 = vpop.eup %8491 }
0x6118   :  { %5639 = vrot.lane.b32.xlu0 %v8492_v45, %s8896_s25 }
0x618a   :  { %v5640_v27 = vpop.permute.xlu0 %5639 }
0x618b   :  { %v10411_v20 = vmul.f32 %v8490_v14, %v5640_v27 }
0x618d   :  { %5644 = vrot.lane.b32.xlu1 %v10411_v20, %s8897_s26 }
0x61ff   :  { %v5645_v15 = vpop.permute.xlu1 %5644 }
0x6200   :  { %8051 = vmatmul.mubr.msk.f32.vlgmr.msra.gmra.mxu0 %vm260_vm0, %v5645_v15 }
0x6201   :  { %8065 = vmatpush3.msra.mxu0 %v10324_v38  ;;  %8072 = vmatprep.mubr.msk.f32.mxu0 %vm8895_vm1, %v8894_v9 }
0x6202   :  { %8066 = vmatprep.subr.mxu0 %v8894_v9 }
0x6203   :  { %8067 = vmatpush3.msra.mxu0 %v10327_v16 }
0x6204   :  { %8068 = vmatprep.subr.mxu0 %v8894_v9 }
0x6205   :  { %8069 = vmatpush3.msra.mxu0 %v10333_v24 }
0x6206   :  { %8070 = vmatprep.subr.mxu0 %v8894_v9 }
0x6207   :  { %8071 = vmatpush3.msra.mxu0 %v10337_v29 }
0x6208   :  { %8086 = vmatprep.subr.mxu0 %v8894_v9 }
0x62c0   :  { %v5714_v32 = vpop.f32.mrf.mxu0 }
0x62c1   :  { %v5718_v44 = vadd.f32 %v5714_v32, %v10202_v28 }
0x62c2   :  { %v8052_v56 = vpop.f32.mrf.mxu0 }
0x62c3   :  { %8493 = vtanh.f32 %v5718_v44  ;;  %v6985_v40 = vmul.f32 -1.442695, %v5718_v44 }
0x62c5   :  { %8495 = vpow2.f32 %v6985_v40 }
0x62d0   :  { %v8494_v59 = vpop.eup %8493 }
0x62d1   :  { %5728 = vrot.lane.b32.xlu0 %v8494_v59, %s8896_s25 }
0x62d2   :  { %v8496_v19 = vpop.eup %8495 }
0x62d3   :  { %v5722_v18 = vadd.f32 1.0, %v8496_v19 }
0x62d5   :  { %8497 = vrcp.f32 %v5722_v18 }
0x62e2   :  { %v8498_v23 = vpop.eup %8497 }
0x62e3   :  { %v5726_v55 = vmul.f32 %v8498_v23, %v5636_v1 }
0x6343   :  { %v5729_v26 = vpop.permute.xlu0 %5728 }
0x6344   :  { %v5731_v11 = vmul.f32 %v8498_v23, %v5729_v26 }
0x6346   :  { %5733 = vrot.lane.b32.xlu1 %v5731_v11, %s8897_s26 }
0x63b8   :  { %v5734_v7 = vpop.permute.xlu1 %5733 }
0x63b9   :  { %v5736_v42 = vadd.f32 %v5734_v7, %v5726_v55 }
0x63bb   :  { %8499 = vtanh.f32 %v5736_v42 }
0x63c8   :  { %v8500_v28 = vpop.eup %8499 }
0x63c9   :  { %5739 = vrot.lane.b32.xlu0 %v8500_v28, %s8896_s25 }
0x643b   :  { %v5740_v57 = vpop.permute.xlu0 %5739 }
0x643c   :  { %v10430_v13 = vmul.f32 %v8498_v23, %v5740_v57 }
0x643e   :  { %5744 = vrot.lane.b32.xlu1 %v10430_v13, %s8897_s26 }
0x64b0   :  { %v5745_v5 = vpop.permute.xlu1 %5744 }
0x64b1   :  { %8062 = vmatmul.mubr.msk.f32.vlgmr.msra.gmra.mxu1 %vm260_vm0, %v5745_v5 }
0x64b2   :  { %8076 = vmatpush3.msra.mxu1 %v10324_v38  ;;  %8083 = vmatprep.mubr.msk.f32.mxu1 %vm8895_vm1, %v8894_v9 }
0x64b3   :  { %8077 = vmatprep.subr.mxu1 %v8894_v9 }
0x64b4   :  { %8078 = vmatpush3.msra.mxu1 %v10327_v16 }
0x64b5   :  { %8079 = vmatprep.subr.mxu1 %v8894_v9 }
0x64b6   :  { %8080 = vmatpush3.msra.mxu1 %v10333_v24 }
0x64b7   :  { %8081 = vmatprep.subr.mxu1 %v8894_v9 }
0x64b8   :  { %8082 = vmatpush3.msra.mxu1 %v10337_v29 }
0x64b9   :  { %8097 = vmatprep.subr.mxu1 %v8894_v9 }
0x6571   :  { %v5814_v47 = vpop.f32.mrf.mxu1 }
0x6572   :  { %v5818_v63 = vadd.f32 %v5814_v47, %v10205_v2 }
0x6573   :  { %v8063_v10 = vpop.f32.mrf.mxu1 }
0x6574   :  { %8501 = vtanh.f32 %v5818_v63  ;;  %v6987_v37 = vmul.f32 -1.442695, %v5818_v63 }
0x6576   :  { %8503 = vpow2.f32 %v6987_v37 }
0x6581   :  { %v8502_v34 = vpop.eup %8501 }
0x6582   :  { %5828 = vrot.lane.b32.xlu0 %v8502_v34, %s8896_s25 }
0x6583   :  { %v8504_v60 = vpop.eup %8503 }
0x6584   :  { %v5822_v53 = vadd.f32 1.0, %v8504_v60 }
0x6586   :  { %8505 = vrcp.f32 %v5822_v53 }
0x6593   :  { %v8506_v33 = vpop.eup %8505 }
0x6594   :  { %v5826_v3 = vmul.f32 %v8506_v33, %v5736_v42 }
0x65f4   :  { %v5829_v62 = vpop.permute.xlu0 %5828 }
0x65f5   :  { %v5831_v17 = vmul.f32 %v8506_v33, %v5829_v62 }
0x65f7   :  { %5833 = vrot.lane.b32.xlu1 %v5831_v17, %s8897_s26 }
0x6669   :  { %v5834_v41 = vpop.permute.xlu1 %5833 }
0x666a   :  { %v5836_v46 = vadd.f32 %v5834_v41, %v5826_v3 }
0x666c   :  { %8507 = vtanh.f32 %v5836_v46 }
0x6679   :  { %v8508_v2 = vpop.eup %8507 }
0x667a   :  { %5839 = vrot.lane.b32.xlu0 %v8508_v2, %s8896_s25 }
0x66ec   :  { %v5840_v50 = vpop.permute.xlu0 %5839 }
0x66ed   :  { %v10449_v51 = vmul.f32 %v8506_v33, %v5840_v50 }
0x66ef   :  { %5844 = vrot.lane.b32.xlu1 %v10449_v51, %s8897_s26 }
0x6761   :  { %v5845_v22 = vpop.permute.xlu1 %5844 }
0x6762   :  { %8073 = vmatmul.mubr.msk.f32.vlgmr.msra.gmra.mxu0 %vm260_vm0, %v5845_v22 }
0x6763   :  { %8087 = vmatpush3.msra.mxu0 %v10324_v38  ;;  %8094 = vmatprep.mubr.msk.f32.mxu0 %vm8895_vm1, %v8894_v9 }
0x6764   :  { %8088 = vmatprep.subr.mxu0 %v8894_v9 }
0x6765   :  { %8089 = vmatpush3.msra.mxu0 %v10327_v16 }
0x6766   :  { %8090 = vmatprep.subr.mxu0 %v8894_v9 }
0x6767   :  { %8091 = vmatpush3.msra.mxu0 %v10333_v24 }
0x6768   :  { %8092 = vmatprep.subr.mxu0 %v8894_v9 }
0x6769   :  { %8093 = vmatpush3.msra.mxu0 %v10337_v29 }
0x676a   :  { %8108 = vmatprep.subr.mxu0 %v8894_v9 }
0x6822   :  { %v5914_v54 = vpop.f32.mrf.mxu0 }
0x6823   :  { %v5918_v14 = vadd.f32 %v5914_v54, %v10196_v6 }
0x6824   :  { %v8074_v8 = vpop.f32.mrf.mxu0 }
0x6825   :  { %8509 = vtanh.f32 %v5918_v14  ;;  %v6989_v30 = vmul.f32 -1.442695, %v5918_v14  ;;  %v6980_v8 = vmul.f32 -1.442695, %v10403_v48 }
0x6827   :  { %8511 = vpow2.f32 %v6989_v30 }
0x6832   :  { %v8510_v4 = vpop.eup %8509 }
0x6833   :  { %5928 = vrot.lane.b32.xlu0 %v8510_v4, %s8896_s25 }
0x6834   :  { %v8512_v61 = vpop.eup %8511 }
0x6835   :  { %v5922_v1 = vadd.f32 1.0, %v8512_v61 }
0x6837   :  { %8513 = vrcp.f32 %v5922_v1 }
0x6844   :  { %v8514_v45 = vpop.eup %8513 }
0x6845   :  { %v5926_v32 = vmul.f32 %v8514_v45, %v5836_v46 }
0x68a5   :  { %v5929_v27 = vpop.permute.xlu0 %5928 }
0x68a6   :  { %v5931_v15 = vmul.f32 %v8514_v45, %v5929_v27 }
0x68a8   :  { %5933 = vrot.lane.b32.xlu1 %v5931_v15, %s8897_s26  ;;  %v6996_v15 = vld [vmem:[#allocation18] ss:$0 sm:$0xff] }
0x691a   :  { %v5934_v44 = vpop.permute.xlu1 %5933 }
0x691b   :  { %v5936_v56 = vadd.f32 %v5934_v44, %v5926_v32 }
0x691d   :  { %8515 = vtanh.f32 %v5936_v56 }
0x692a   :  { %v8516_v6 = vpop.eup %8515 }
0x692b   :  { %5939 = vrot.lane.b32.xlu0 %v8516_v6, %s8896_s25 }
0x699d   :  { %v5940_v59 = vpop.permute.xlu0 %5939 }
0x699e   :  { %v10468_v40 = vmul.f32 %v8514_v45, %v5940_v59 }
0x69a0   :  { %5944 = vrot.lane.b32.xlu1 %v10468_v40, %s8897_s26 }
0x6a12   :  { %v5945_v19 = vpop.permute.xlu1 %5944 }
0x6a13   :  { %8084 = vmatmul.mubr.msk.f32.vlgmr.msra.gmra.mxu1 %vm260_vm0, %v5945_v19 }
0x6a14   :  { %8098 = vmatpush3.msra.mxu1 %v10324_v38  ;;  %8105 = vmatprep.mubr.msk.f32.mxu1 %vm8895_vm1, %v8894_v9 }
0x6a15   :  { %8099 = vmatprep.subr.mxu1 %v8894_v9 }
0x6a16   :  { %8100 = vmatpush3.msra.mxu1 %v10327_v16 }
0x6a17   :  { %8101 = vmatprep.subr.mxu1 %v8894_v9 }
0x6a18   :  { %8102 = vmatpush3.msra.mxu1 %v10333_v24 }
0x6a19   :  { %8103 = vmatprep.subr.mxu1 %v8894_v9 }
0x6a1a   :  { %8104 = vmatpush3.msra.mxu1 %v10337_v29 }
0x6a1b   :  { %8119 = vmatprep.subr.mxu1 %v8894_v9 }
0x6ad3   :  { %v6014_v18 = vpop.f32.mrf.mxu1 }
0x6ad4   :  { %v6018_v38 = vadd.f32 %v6014_v18, %v10199_v43 }
0x6ad5   :  { %v8085_v23 = vpop.f32.mrf.mxu1 }
0x6ad6   :  { %8517 = vtanh.f32 %v6018_v38  ;;  %v6991_v11 = vmul.f32 -1.442695, %v6018_v38 }
0x6ad8   :  { %8519 = vpow2.f32 %v6991_v11 }
0x6ae3   :  { %v8518_v26 = vpop.eup %8517 }
0x6ae4   :  { %6028 = vrot.lane.b32.xlu0 %v8518_v26, %s8896_s25 }
0x6ae5   :  { %v8520_v16 = vpop.eup %8519 }
0x6ae6   :  { %v6022_v55 = vadd.f32 1.0, %v8520_v16 }
0x6ae8   :  { %8521 = vrcp.f32 %v6022_v55 }
0x6af5   :  { %v8522_v24 = vpop.eup %8521 }
0x6af6   :  { %v6026_v29 = vmul.f32 %v8522_v24, %v5936_v56 }
0x6b56   :  { %v6029_v7 = vpop.permute.xlu0 %6028 }
0x6b57   :  { %v6031_v42 = vmul.f32 %v8522_v24, %v6029_v7 }
0x6b59   :  { %6033 = vrot.lane.b32.xlu1 %v6031_v42, %s8897_s26 }
0x6bcb   :  { %v6034_v28 = vpop.permute.xlu1 %6033 }
0x6bcc   :  { %v6036_v57 = vadd.f32 %v6034_v28, %v6026_v29 }
0x6bce   :  { %8523 = vtanh.f32 %v6036_v57 }
0x6bdb   :  { %v8524_v43 = vpop.eup %8523 }
0x6bdc   :  { %6039 = vrot.lane.b32.xlu0 %v8524_v43, %s8896_s25 }
0x6c4e   :  { %v6040_v5 = vpop.permute.xlu0 %6039 }
0x6c4f   :  { %v10487_v47 = vmul.f32 %v8522_v24, %v6040_v5 }
0x6c51   :  { %6044 = vrot.lane.b32.xlu1 %v10487_v47, %s8897_s26 }
0x6cc3   :  { %v6045_v63 = vpop.permute.xlu1 %6044 }
0x6cc4   :  { %8095 = vmatmul.mubr.msk.f32.vlgmr.msra.gmra.mxu0 %vm260_vm0, %v6045_v63 }
0x6cc5   :  { %8116 = vmatprep.mubr.msk.f32.mxu0 %vm8895_vm1, %v8894_v9 }
0x6d84   :  { %v6114_v10 = vpop.f32.mrf.mxu0 }
0x6d85   :  { %v6118_v34 = vadd.f32 %v6114_v10, %v10190_v39 }
0x6d86   :  { %v8096_v37 = vpop.f32.mrf.mxu0 }
0x6d87   :  { %8525 = vtanh.f32 %v6118_v34  ;;  %v6993_v53 = vmul.f32 -1.442695, %v6118_v34 }
0x6d89   :  { %8527 = vpow2.f32 %v6993_v53 }
0x6d94   :  { %v8526_v60 = vpop.eup %8525 }
0x6d95   :  { %6128 = vrot.lane.b32.xlu0 %v8526_v60, %s8896_s25 }
0x6d96   :  { %v8528_v33 = vpop.eup %8527 }
0x6d97   :  { %v6122_v62 = vadd.f32 1.0, %v8528_v33 }
0x6d99   :  { %8529 = vrcp.f32 %v6122_v62 }
0x6da6   :  { %v8530_v17 = vpop.eup %8529 }
0x6da7   :  { %v6126_v46 = vmul.f32 %v8530_v17, %v6036_v57 }
0x6e07   :  { %v6129_v3 = vpop.permute.xlu0 %6128 }
0x6e08   :  { %v6131_v41 = vmul.f32 %v8530_v17, %v6129_v3 }
0x6e0a   :  { %6133 = vrot.lane.b32.xlu1 %v6131_v41, %s8897_s26 }
0x6e7c   :  { %v6134_v2 = vpop.permute.xlu1 %6133 }
0x6e7d   :  { %v6136_v50 = vadd.f32 %v6134_v2, %v6126_v46 }
0x6e7f   :  { %8531 = vtanh.f32 %v6136_v50 }
0x6e80   :  { %8533 = vtanh.f32 %v10403_v48 }
0x6e81   :  { %8535 = vpow2.f32 %v6980_v8 }
0x6e8c   :  { %v8532_v39 = vpop.eup %8531 }
0x6e8d   :  { %6139 = vrot.lane.b32.xlu0 %v8532_v39, %s8896_s25  ;;  %v8534_v14 = vpop.eup %8533 }
0x6e8e   :  { %v8536_v4 = vpop.eup %8535 }
0x6e8f   :  { %v5427_v30 = vadd.f32 1.0, %v8536_v4 }
0x6e91   :  { %8537 = vrcp.f32 %v5427_v30 }
0x6e9e   :  { %v8538_v1 = vpop.eup %8537 }
0x6e9f   :  { %v5431_v48 = vmul.f32 %v8538_v1, %v10365_v36 }
0x6eff   :  { %v6140_v22 = vpop.permute.xlu0 %6139 }
0x6f00   :  { %v10499_v54 = vmul.f32 %v8530_v17, %v6140_v22 }
0x6f02   :  { %6144 = vrot.lane.b32.xlu1 %v10499_v54, %s8897_s26 }
0x6f06   :  { %5433 = vrot.lane.b32.xlu1 %v8534_v14, %s8896_s25 }
0x6f74   :  { %v6145_v61 = vpop.permute.xlu1 %6144 }
0x6f75   :  { %8106 = vmatmul.mubr.msk.f32.vlgmr.msra.gmra.mxu1 %vm260_vm0, %v6145_v61 }
0x6f76   :  { %8127 = vmatprep.mubr.msk.f32.mxu1 %vm8895_vm1, %v8894_v9 }
0x6f78   :  { %v5434_v45 = vpop.permute.xlu1 %5433 }
0x6f79   :  { %v5436_v27 = vmul.f32 %v8538_v1, %v5434_v45 }
0x6f7b   :  { %5438 = vrot.lane.b32.xlu1 %v5436_v27, %s8897_s26 }
0x6f7f   :  { %6249 = vrot.lane.b32.xlu1 %v6996_v15, %s8898_s7  ;;  %s8843_s7 = scalar_lea.vmem %s6806_s11, 128 }
0x6f80   :  { %p8844_p9 = scmp.ne.s32.totalorder %s6806_s11, %s8843_s7  ;;  %p8849_p11 = scmp.lt.s32.totalorder %s8843_s7, %s8843_s7 }
0x6f82   :  { %p8850_p12 = por %p8849_p11, %p8848_p10 }
0x6f84   :  { %p8851_p13 = pnand %p8850_p12, %p8844_p9 }
0x6fed   :  { %v5439_v32 = vpop.permute.xlu1 %5438 }
0x6fee   :  { %v5441_v44 = vadd.f32 %v5439_v32, %v5431_v48 }
0x6ff0   :  { %8539 = vtanh.f32 %v5441_v44 }
0x6ff1   :  { %v6250_v6 = vpop.permute.xlu1 %6249 }
0x6ff2   :  { %v6253_v59 = vmul.f32 %v6250_v6, %v10233_v52  ;;  %v6252_v28 = vmul.f32 %v6250_v6, %v10208_v58  ;;  %v6254_v57 = vmul.f32 %v6250_v6, %v10254_v0  ;;  %v6255_v43 = vmul.f32 %v6250_v6, %v10275_v25 }
0x6ff3   :  { %v6256_v5 = vmul.f32 %v6250_v6, %v10296_v31  ;;  %v6257_v33 = vmul.f32 %v6250_v6, %v10320_v49  ;;  %v6258_v41 = vmul.f32 %v6250_v6, %v10370_v12 }
0x6ffd   :  { %v8540_v56 = vpop.eup %8539 }
0x6ffe   :  { %5444 = vrot.lane.b32.xlu1 %v8540_v56, %s8896_s25 }
0x7002   :  { %6270 = vrot.lane.b32.xlu1 %v6253_v59, %s8897_s26 }
0x7035   :  { %v6214_v19 = vpop.f32.mrf.mxu1 }
0x7036   :  { %v6218_v18 = vadd.f32 %v6214_v19, %v10193_v35 }
0x7037   :  { %v8107_v38 = vpop.f32.mrf.mxu1 }
0x7038   :  { %8541 = vtanh.f32 %v6218_v18  ;;  %v6995_v36 = vmul.f32 -1.442695, %v6218_v18 }
0x703a   :  { %8543 = vpow2.f32 %v6995_v36 }
0x7045   :  { %v8542_v23 = vpop.eup %8541 }
0x7046   :  { %6228 = vrot.lane.b32.xlu0 %v8542_v23, %s8896_s25 }
0x7047   :  { %v8544_v26 = vpop.eup %8543 }
0x7048   :  { %v6222_v11 = vadd.f32 1.0, %v8544_v26 }
0x704a   :  { %8545 = vrcp.f32 %v6222_v11 }
0x7057   :  { %v8546_v16 = vpop.eup %8545 }
0x7058   :  { %v6226_v7 = vmul.f32 %v8546_v16, %v6136_v50 }
0x7070   :  { %v5445_v62 = vpop.permute.xlu1 %5444 }
0x7071   :  { %v10536_v17 = vmul.f32 %v8538_v1, %v5445_v62 }
0x7073   :  { %v6259_v46 = vmul.f32 %v6250_v6, %v10536_v17 }
0x7074   :  { %v6271_v4 = vpop.permute.xlu1 %6270 }
0x7075   :  { %v6295_v61 = vsel %vm260_vm0, %v6271_v4, 0.0 }
0x70b8   :  { %v6229_v55 = vpop.permute.xlu0 %6228 }
0x70b9   :  { %v6231_v24 = vmul.f32 %v8546_v16, %v6229_v55 }
0x70bb   :  { %6233 = vrot.lane.b32.xlu0 %v6231_v24, %s8897_s26 }
0x712d   :  { %v6234_v42 = vpop.permute.xlu0 %6233 }
0x712e   :  { %v6236_v29 = vadd.f32 %v6234_v42, %v6226_v7 }
0x7130   :  { %8547 = vtanh.f32 %v6236_v29 }
0x713d   :  { %v8548_v35 = vpop.eup %8547 }
0x713e   :  { %6239 = vrot.lane.b32.xlu0 %v8548_v35, %s8896_s25 }
0x7142   :  { %6316 = vrot.lane.b32.xlu0 %v6996_v15, %s8896_s25 }
0x7146   :  { %6268 = vrot.lane.b32.xlu0 %v6252_v28, %s8897_s26 }
0x714a   :  { %6272 = vrot.lane.b32.xlu0 %v6254_v57, %s8897_s26 }
0x714e   :  { %6274 = vrot.lane.b32.xlu0 %v6255_v43, %s8897_s26 }
0x7152   :  { %6276 = vrot.lane.b32.xlu0 %v6256_v5, %s8897_s26  ;;  %v8899_v5 = vmov 0  }
0x7153   :  { %8164 = vset.pattern.permute.xlu0 %v8899_v5  ;;  %8163 = vset.pattern.permute.xlu1 %v8899_v5 }
0x71b0   :  { %v6240_v63 = vpop.permute.xlu0 %6239 }
0x71b1   :  { %v10526_v10 = vmul.f32 %v8546_v16, %v6240_v63 }
0x71b4   :  { %v6317_v34 = vpop.permute.xlu0 %6316 }
0x71b5   :  { %v6320_v37 = vmul.f32 %v6317_v34, %v10499_v54  ;;  %v6319_v60 = vmul.f32 %v6317_v34, %v10526_v10  ;;  %v6321_v53 = vmul.f32 %v6317_v34, %v10487_v47  ;;  %v6322_v3 = vmul.f32 %v6317_v34, %v10468_v40 }
0x71b6   :  { %v6323_v2 = vmul.f32 %v6317_v34, %v10449_v51  ;;  %v6324_v50 = vmul.f32 %v6317_v34, %v10430_v13  ;;  %v6325_v39 = vmul.f32 %v6317_v34, %v10411_v20  ;;  %v6326_v22 = vmul.f32 %v6317_v34, %v10374_v21 }
0x71b7   :  { %6337 = vrot.lane.b32.xlu1 %v6320_v37, %s8897_s26  ;;  %6335 = vrot.lane.b32.xlu0 %v6319_v60, %s8897_s26 }
0x71b8   :  { %v6269_v14 = vpop.permute.xlu0 %6268 }
0x71b9   :  { %v6292_v8 = vsel %vm260_vm0, %v6269_v14, 0.0 }
0x71bb   :  { %6339 = vrot.lane.b32.xlu1 %v6321_v53, %s8897_s26  ;;  %6278 = vrot.lane.b32.xlu0 %v6257_v33, %s8897_s26 }
0x71bc   :  { %v6273_v30 = vpop.permute.xlu0 %6272 }
0x71bd   :  { %v6298_v45 = vsel %vm260_vm0, %v6273_v30, 0.0 }
0x71bf   :  { %6341 = vrot.lane.b32.xlu1 %v6322_v3, %s8897_s26  ;;  %6280 = vrot.lane.b32.xlu0 %v6258_v41, %s8897_s26 }
0x71c0   :  { %v6275_v1 = vpop.permute.xlu0 %6274 }
0x71c1   :  { %v6301_v27 = vsel %vm260_vm0, %v6275_v1, 0.0 }
0x71c3   :  { %6343 = vrot.lane.b32.xlu1 %v6323_v2, %s8897_s26  ;;  %6282 = vrot.lane.b32.xlu0 %v6259_v46, %s8897_s26  ;;  %v6997_v2 = vld [vmem:[#allocation2] ss:$0 sm:$0xff] }
0x71c4   :  { %v6277_v15 = vpop.permute.xlu0 %6276 }
0x71c5   :  { %v6304_v48 = vsel %vm260_vm0, %v6277_v15, 0.0 }
0x71c7   :  { %6345 = vrot.lane.b32.xlu1 %v6324_v50, %s8897_s26 }
0x71cb   :  { %6347 = vrot.lane.b32.xlu1 %v6325_v39, %s8897_s26 }
0x71cf   :  { %6349 = vrot.lane.b32.xlu1 %v6326_v22, %s8897_s26 }
0x71e2   :  { %6293 = vadd.xlane.f32.xlu0 %v6292_v8 }
0x71f3   :  { %6296 = vadd.xlane.f32.xlu1 %v6295_v61 }
0x71f7   :  { %6299 = vadd.xlane.f32.xlu1 %v6298_v45 }
0x71fb   :  { %6302 = vadd.xlane.f32.xlu1 %v6301_v27 }
0x71ff   :  { %6305 = vadd.xlane.f32.xlu1 %v6304_v48 }
0x7229   :  { %v6338_v32 = vpop.permute.xlu1 %6337  ;;  %v6336_v44 = vpop.permute.xlu0 %6335 }
0x722a   :  { %v6362_v56 = vsel %vm260_vm0, %v6338_v32, 0.0  ;;  %v6359_v42 = vsel %vm260_vm0, %v6336_v44, 0.0 }
0x722b   :  { %6363 = vadd.xlane.f32.xlu0 %v6362_v56 }
0x722d   :  { %v6340_v6 = vpop.permute.xlu1 %6339  ;;  %v6279_v59 = vpop.permute.xlu0 %6278 }
0x722e   :  { %v6365_v19 = vsel %vm260_vm0, %v6340_v6, 0.0  ;;  %v6307_v18 = vsel %vm260_vm0, %v6279_v59, 0.0 }
0x722f   :  { %6366 = vadd.xlane.f32.xlu0 %v6365_v19  ;;  %6308 = vadd.xlane.f32.xlu1 %v6307_v18 }
0x7231   :  { %v6342_v38 = vpop.permute.xlu1 %6341  ;;  %v6281_v23 = vpop.permute.xlu0 %6280 }
0x7232   :  { %v6368_v36 = vsel %vm260_vm0, %v6342_v38, 0.0  ;;  %v6310_v26 = vsel %vm260_vm0, %v6281_v23, 0.0 }
0x7233   :  { %6369 = vadd.xlane.f32.xlu0 %v6368_v36  ;;  %6311 = vadd.xlane.f32.xlu1 %v6310_v26 }
0x7235   :  { %v6344_v11 = vpop.permute.xlu1 %6343  ;;  %v6283_v16 = vpop.permute.xlu0 %6282 }
0x7236   :  { %v6371_v55 = vsel %vm260_vm0, %v6344_v11, 0.0  ;;  %v6313_v24 = vsel %vm260_vm0, %v6283_v16, 0.0 }
0x7237   :  { %6372 = vadd.xlane.f32.xlu0 %v6371_v55  ;;  %6314 = vadd.xlane.f32.xlu1 %v6313_v24 }
0x7239   :  { %v6346_v7 = vpop.permute.xlu1 %6345 }
0x723a   :  { %v6374_v35 = vsel %vm260_vm0, %v6346_v7, 0.0 }
0x723b   :  { %6360 = vadd.xlane.f32.xlu0 %v6359_v42 }
0x723d   :  { %v6348_v29 = vpop.permute.xlu1 %6347 }
0x723e   :  { %v6377_v28 = vsel %vm260_vm0, %v6348_v29, 0.0 }
0x723f   :  { %6375 = vadd.xlane.f32.xlu0 %v6374_v35 }
0x7241   :  { %v6350_v57 = vpop.permute.xlu1 %6349 }
0x7242   :  { %v6380_v43 = vsel %vm260_vm0, %v6350_v57, 0.0 }
0x7243   :  { %6378 = vadd.xlane.f32.xlu0 %v6377_v28 }
0x7247   :  { %6381 = vadd.xlane.f32.xlu0 %v6380_v43 }
0x726b   :  { %v6294_v34 = vpop.xlane.xlu0 %6293 }
0x727c   :  { %v6297_v63 = vpop.xlane.xlu1 %6296 }
0x7280   :  { %v6300_v37 = vpop.xlane.xlu1 %6299 }
0x7284   :  { %v6303_v33 = vpop.xlane.xlu1 %6302 }
0x7288   :  { %v6306_v3 = vpop.xlane.xlu1 %6305 }
0x72b4   :  { %v6364_v60 = vpop.xlane.xlu0 %6363 }
0x72b5   :  { %v6384_v41 = vadd.f32 %v6364_v60, %v6297_v63 }
0x72b7   :  { %v6399_v39 = vadd.f32 %v6997_v2, %v6384_v41 }
0x72b8   :  { %v6367_v53 = vpop.xlane.xlu0 %6366  ;;  %v6309_v22 = vpop.xlane.xlu1 %6308 }
0x72b9   :  { %v6385_v50 = vadd.f32 %v6367_v53, %v6300_v37  ;;  %8549 = vtanh.f32 %v6399_v39 }
0x72bb   :  { %v6400_v30 = vadd.f32 %v6997_v2, %v6385_v50 }
0x72bc   :  { %v6370_v62 = vpop.xlane.xlu0 %6369  ;;  %v6312_v48 = vpop.xlane.xlu1 %6311 }
0x72bd   :  { %v6386_v8 = vadd.f32 %v6370_v62, %v6303_v33 }
0x72bf   :  { %v6401_v27 = vadd.f32 %v6997_v2, %v6386_v8 }
0x72c0   :  { %v6373_v46 = vpop.xlane.xlu0 %6372  ;;  %v6315_v19 = vpop.xlane.xlu1 %6314 }
0x72c1   :  { %v6387_v61 = vadd.f32 %v6373_v46, %v6306_v3 }
0x72c3   :  { %v6402_v32 = vadd.f32 %v6997_v2, %v6387_v61 }
0x72c4   :  { %v6361_v14 = vpop.xlane.xlu0 %6360 }
0x72c5   :  { %v6383_v4 = vadd.f32 %v6361_v14, %v6294_v34 }
0x72c6   :  { %v8550_v36 = vpop.eup %8549 }
0x72c7   :  { %v6398_v1 = vadd.f32 %v6997_v2, %v6383_v4 }
0x72c8   :  { %v6376_v45 = vpop.xlane.xlu0 %6375 }
0x72c9   :  { %8551 = vtanh.f32 %v6398_v1  ;;  %v6388_v15 = vadd.f32 %v6376_v45, %v6309_v22 }
0x72ca   :  { %8553 = vtanh.f32 %v6400_v30 }
0x72cb   :  { %8555 = vtanh.f32 %v6401_v27  ;;  %v6403_v56 = vadd.f32 %v6997_v2, %v6388_v15 }
0x72cc   :  { %v6379_v44 = vpop.xlane.xlu0 %6378  ;;  %8557 = vtanh.f32 %v6402_v32 }
0x72cd   :  { %v6389_v6 = vadd.f32 %v6379_v44, %v6312_v48  ;;  %8559 = vtanh.f32 %v6403_v56 }
0x72cf   :  { %v6404_v59 = vadd.f32 %v6997_v2, %v6389_v6 }
0x72d0   :  { %v6382_v18 = vpop.xlane.xlu0 %6381 }
0x72d1   :  { %v6390_v38 = vadd.f32 %v6382_v18, %v6315_v19  ;;  %8561 = vtanh.f32 %v6404_v59 }
0x72d3   :  { %v6405_v23 = vadd.f32 %v6997_v2, %v6390_v38 }
0x72d5   :  { %8563 = vtanh.f32 %v6405_v23  ;;  %v6538_v23 = vld [vmem:[%s10658_s15 + $0x38] sm:$0xff] }
0x72d6   :  { %v8552_v26 = vpop.eup %8551  ;;  %8109 = vmatpush3.msra.mxu0 %v6538_v23  ;;  %v7001_v23 = vld [vmem:[#allocation21] ss:$0 sm:$0xff] }
0x72d7   :  { %v6414_v11 = vmax.f32 %v8552_v26, %v8550_v36  ;;  %v8554_v16 = vpop.eup %8553  ;;  %8110 = vmatprep.subr.mxu0 %v8894_v9 }
0x72d8   :  { %v8556_v24 = vpop.eup %8555 }
0x72d9   :  { %v6415_v55 = vmax.f32 %v6414_v11, %v8554_v16  ;;  %v8558_v42 = vpop.eup %8557 }
0x72da   :  { %v8560_v35 = vpop.eup %8559 }
0x72db   :  { %v6416_v7 = vmax.f32 %v6415_v55, %v8556_v24  ;;  %v6536_v55 = vld [vmem:[%s10658_s15 + $0x28] sm:$0xff] }
0x72dd   :  { %v6417_v29 = vmax.f32 %v6416_v7, %v8558_v42  ;;  %v6535_v7 = vld [vmem:[%s10658_s15 + $0x20] sm:$0xff] }
0x72de   :  { %v8562_v57 = vpop.eup %8561 }
0x72df   :  { %v6418_v28 = vmax.f32 %v6417_v29, %v8560_v35 }
0x72e1   :  { %v6419_v43 = vmax.f32 %v6418_v28, %v8562_v57 }
0x72e2   :  { %v8564_v5 = vpop.eup %8563 }
0x72e3   :  { %v6420_v63 = vmax.f32 %v6419_v43, %v8564_v5 }
0x72e5   :  { %v6421_v34 = vsub.f32 %v8552_v26, %v6420_v63  ;;  %v6424_v37 = vsub.f32 %v8550_v36, %v6420_v63  ;;  %v6427_v60 = vsub.f32 %v8554_v16, %v6420_v63  ;;  %v6430_v53 = vsub.f32 %v8556_v24, %v6420_v63  ;;  %v6534_v36 = vld [vmem:[%s10658_s15 + $0x18] sm:$0xff]  ;;  %v6537_v26 = vld [vmem:[%s10658_s15 + $0x30] sm:$0xff]  ;;  %v6532_v24 = vld [vmem:[%s10658_s15 + $0x8] sm:$0xff] }
0x72e6   :  { %v6433_v41 = vsub.f32 %v8558_v42, %v6420_v63  ;;  %v6436_v2 = vsub.f32 %v8560_v35, %v6420_v63  ;;  %v6439_v39 = vsub.f32 %v8562_v57, %v6420_v63  ;;  %v6442_v14 = vsub.f32 %v8564_v5, %v6420_v63  ;;  %8120 = vmatpush3.msra.mxu1 %v6534_v36  ;;  %v6533_v16 = vld [vmem:[%s10658_s15 + $0x10] sm:$0xff]  ;;  %v6531_v42 = vld [vmem:[%s10658_s15] sm:$0xff] }
0x72e7   :  { %v6422_v33 = vmul.f32 1.442695, %v6421_v34  ;;  %v6425_v62 = vmul.f32 1.442695, %v6424_v37  ;;  %v6428_v3 = vmul.f32 1.442695, %v6427_v60  ;;  %8121 = vmatprep.subr.mxu1 %v8894_v9  ;;  %8111 = vmatpush3.msra.mxu0 %v6537_v26 }
0x72e8   :  { %v6431_v46 = vmul.f32 1.442695, %v6430_v53  ;;  %v6434_v50 = vmul.f32 1.442695, %v6433_v41  ;;  %v6437_v22 = vmul.f32 1.442695, %v6436_v2  ;;  %8122 = vmatpush3.msra.mxu1 %v6533_v16  ;;  %8112 = vmatprep.subr.mxu0 %v8894_v9 }
0x72e9   :  { %8565 = vpow2.f32 %v6422_v33  ;;  %v6440_v8 = vmul.f32 1.442695, %v6439_v39  ;;  %v6443_v4 = vmul.f32 1.442695, %v6442_v14  ;;  %8123 = vmatprep.subr.mxu1 %v8894_v9  ;;  %8113 = vmatpush3.msra.mxu0 %v6536_v55  ;;  %v7002_v26 = vld [vmem:[#allocation23] ss:$0 sm:$0xff] }
0x72ea   :  { %8567 = vpow2.f32 %v6425_v62  ;;  %8124 = vmatpush3.msra.mxu1 %v6532_v24  ;;  %8114 = vmatprep.subr.mxu0 %v8894_v9  ;;  %v7003_v55 = vld [vmem:[%s10663_s20] ss:$0 sm:$0xff] }
0x72eb   :  { %8569 = vpow2.f32 %v6428_v3  ;;  %8125 = vmatprep.subr.mxu1 %v8894_v9  ;;  %8115 = vmatpush3.msra.mxu0 %v6535_v7 }
0x72ec   :  { %8571 = vpow2.f32 %v6431_v46  ;;  %8126 = vmatpush3.msra.mxu1 %v6531_v42  ;;  %8130 = vmatprep.subr.mxu0 %v8894_v9 }
0x72ed   :  { %8573 = vpow2.f32 %v6434_v50 }
0x72ee   :  { %8575 = vpow2.f32 %v6437_v22 }
0x72ef   :  { %8577 = vpow2.f32 %v6440_v8 }
0x72f0   :  { %8579 = vpow2.f32 %v6443_v4 }
0x72f6   :  { %v8566_v30 = vpop.eup %8565 }
0x72f7   :  { %v8568_v61 = vpop.eup %8567  ;;  %6454 = vperm.xlu1 %8163, %v8566_v30  }
0x72f8   :  { %v6445_v1 = vadd.f32 %v8568_v61, %v8566_v30  ;;  %6461 = vperm.xlu0 %8164, %v8568_v61   ;;  %v8570_v45 = vpop.eup %8569 }
0x72f9   :  { %v8572_v15 = vpop.eup %8571 }
0x72fa   :  { %v6446_v27 = vadd.f32 %v8570_v45, %v6445_v1  ;;  %v8574_v32 = vpop.eup %8573 }
0x72fb   :  { %6470 = vperm.xlu1 %8163, %v8570_v45   ;;  %v8576_v56 = vpop.eup %8575 }
0x72fc   :  { %v6447_v48 = vadd.f32 %v8572_v15, %v6446_v27  ;;  %v8578_v59 = vpop.eup %8577 }
0x72fd   :  { %v8580_v18 = vpop.eup %8579 }
0x72fe   :  { %v6448_v44 = vadd.f32 %v8574_v32, %v6447_v48  ;;  %v6715_v48 = vld [vmem:[%s10662_s19 + $0x8] sm:$0xff] }
0x72ff   :  { %6479 = vperm.xlu1 %8163, %v8572_v15  }
0x7300   :  { %v6449_v6 = vadd.f32 %v8576_v56, %v6448_v44 }
0x7302   :  { %v6450_v19 = vadd.f32 %v8578_v59, %v6449_v6  ;;  %v7000_v6 = vld [vmem:[#allocation20] ss:$0 sm:$0xff] }
0x7303   :  { %6488 = vperm.xlu1 %8163, %v8574_v32   ;;  %v6714_v32 = vld [vmem:[%s10662_s19] sm:$0xff] }
0x7304   :  { %v6451_v38 = vadd.f32 %v8580_v18, %v6450_v19 }
0x7306   :  { %8581 = vrcp.f32 %v6451_v38 }
0x7307   :  { %6497 = vperm.xlu1 %8163, %v8576_v56  }
0x730b   :  { %6506 = vperm.xlu1 %8163, %v8578_v59  }
0x730f   :  { %6515 = vperm.xlu1 %8163, %v8580_v18  }
0x7313   :  { %v8582_v11 = vpop.eup %8581 }
0x7314   :  { %6526 = vperm.xlu1 %8163, %v8582_v11  }
0x7372   :  { %v6455_v29 = vpop.permute.xlu1 %6454 }
0x7373   :  { %v6462_v28 = vpop.permute.xlu0 %6461  ;;  %v6457_v63 = vmul.f32 %v6455_v29, %v10208_v58  ;;  %v6458_v34 = vmul.f32 %v6455_v29, %v10526_v10 }
0x7374   :  { %v6464_v43 = vmul.f32 %v6462_v28, %v10233_v52  ;;  %v6466_v5 = vmul.f32 %v6462_v28, %v10499_v54 }
0x7376   :  { %v6471_v35 = vpop.permute.xlu1 %6470  ;;  %v6465_v33 = vadd.f32 %v6464_v43, %v6457_v63  ;;  %v6467_v62 = vadd.f32 %v6466_v5, %v6458_v34 }
0x7377   :  { %v6473_v60 = vmul.f32 %v6471_v35, %v10254_v0  ;;  %v6475_v53 = vmul.f32 %v6471_v35, %v10487_v47 }
0x7379   :  { %v6474_v2 = vadd.f32 %v6473_v60, %v6465_v33  ;;  %v6476_v52 = vadd.f32 %v6475_v53, %v6467_v62 }
0x737a   :  { %v6480_v57 = vpop.permute.xlu1 %6479 }
0x737b   :  { %v6482_v3 = vmul.f32 %v6480_v57, %v10275_v25  ;;  %v6484_v41 = vmul.f32 %v6480_v57, %v10468_v40 }
0x737d   :  { %v6483_v50 = vadd.f32 %v6482_v3, %v6474_v2  ;;  %v6485_v10 = vadd.f32 %v6484_v41, %v6476_v52 }
0x737e   :  { %v6489_v37 = vpop.permute.xlu1 %6488 }
0x737f   :  { %v6491_v54 = vmul.f32 %v6489_v37, %v10296_v31  ;;  %v6493_v58 = vmul.f32 %v6489_v37, %v10449_v51 }
0x7381   :  { %v6492_v22 = vadd.f32 %v6491_v54, %v6483_v50  ;;  %v6494_v14 = vadd.f32 %v6493_v58, %v6485_v10 }
0x7382   :  { %v6498_v46 = vpop.permute.xlu1 %6497 }
0x7383   :  { %v6500_v39 = vmul.f32 %v6498_v46, %v10320_v49  ;;  %v6502_v0 = vmul.f32 %v6498_v46, %v10430_v13 }
0x7385   :  { %v6501_v8 = vadd.f32 %v6500_v39, %v6492_v22  ;;  %v6503_v4 = vadd.f32 %v6502_v0, %v6494_v14 }
0x7386   :  { %v6507_v47 = vpop.permute.xlu1 %6506 }
0x7387   :  { %v6509_v25 = vmul.f32 %v6507_v47, %v10370_v12  ;;  %v6511_v40 = vmul.f32 %v6507_v47, %v10411_v20 }
0x7389   :  { %v6510_v61 = vadd.f32 %v6509_v25, %v6501_v8  ;;  %v6512_v31 = vadd.f32 %v6511_v40, %v6503_v4 }
0x738a   :  { %v6516_v30 = vpop.permute.xlu1 %6515 }
0x738b   :  { %v6518_v51 = vmul.f32 %v6516_v30, %v10536_v17  ;;  %v6520_v1 = vmul.f32 %v6516_v30, %v10374_v21  ;;  %v6717_v21 = vld [vmem:[%s10662_s19 + $0x18] sm:$0xff]  ;;  %v6716_v17 = vld [vmem:[%s10662_s19 + $0x10] sm:$0xff] }
0x738d   :  { %v6519_v45 = vadd.f32 %v6518_v51, %v6510_v61  ;;  %v6521_v49 = vadd.f32 %v6520_v1, %v6512_v31 }
0x738f   :  { %v6527_v27 = vpop.permute.xlu1 %6526 }
0x7390   :  { %v6529_v13 = vmul.f32 %v6527_v27, %v6519_v45  ;;  %v6530_v15 = vmul.f32 %v6527_v27, %v6521_v49 }
0x7392   :  { %6540 = vrot.lane.b32.xlu1 %v6530_v15, %s8897_s26  ;;  %6615 = vrot.lane.b32.xlu0 %v6529_v13, %s8897_s26 }
0x7404   :  { %v6541_v12 = vpop.permute.xlu1 %6540  ;;  %v6616_v20 = vpop.permute.xlu0 %6615 }
0x7405   :  { %8117 = vmatmul.mubr.msk.f32.vlgmr.msra.gmra.mxu0 %vm260_vm0, %v6541_v12  ;;  %8128 = vmatmul.mubr.msk.f32.vlgmr.msra.gmra.mxu1 %vm260_vm0, %v6616_v20 }
0x7406   :  { %8138 = vmatprep.mubr.msk.f32.mxu0 %vm8895_vm1, %v8894_v9  ;;  %8131 = vmatpush3.msra.mxu0 %v6717_v21 }
0x7407   :  { %8132 = vmatprep.subr.mxu0 %v8894_v9 }
0x7408   :  { %8133 = vmatpush3.msra.mxu0 %v6716_v17 }
0x7409   :  { %8134 = vmatprep.subr.mxu0 %v8894_v9 }
0x740a   :  { %8135 = vmatpush3.msra.mxu0 %v6715_v48 }
0x740b   :  { %8136 = vmatprep.subr.mxu0 %v8894_v9 }
0x740c   :  { %8137 = vmatpush3.msra.mxu0 %v6714_v32 }
0x74c5   :  { %v6610_v44 = vpop.f32.mrf.mxu0  ;;  %v6685_v56 = vpop.f32.mrf.mxu1 }
0x74c6   :  { %v6686_v59 = vadd.f32 %v6685_v56, %v6610_v44 }
0x74c7   :  { %v8118_v19 = vpop.f32.mrf.mxu0  ;;  %v8129_v18 = vpop.f32.mrf.mxu1 }
0x74c8   :  { %v6696_v38 = vadd.f32 %v7000_v6, %v6686_v59 }
0x74ca   :  { %v6697_v36 = vmax.f32 %v6696_v38, 0.0 }
0x74cc   :  { %v6705_v11 = vmul.f32 %v7001_v23, %v6697_v36 }
0x74ce   :  { %v6713_v16 = vadd.f32 %v7002_v26, %v6705_v11 }
0x74d0   :  { %8139 = vmatmul.mubr.msk.f32.vlgmr.msra.gmra.mxu0 %vm260_vm0, %v6713_v16 }
0x7590   :  { %v6794_v9 = vpop.f32.mrf.mxu0 }
0x7591   :  { %v6795_v24 = vadd.f32 %v7003_v55, %v6794_v9 }
0x7592   :  { %v8140_v7 = vpop.f32.mrf.mxu0 }
0x7593   :  { %6798 = vst [vmem:[#allocation24] sm:$0xff] %v6795_v24 }
0x7594   :  { %8854 = shalt.err (!%p8851_p13)
}
0x7595   :  { %6808 = dma.vmem_to_hbm [thread:$0]  %s6806_s11, 128, %s10664_s21, [#allocation5]  }
0x7596   :  { %8877 = dma.done.wait [#allocation5], 128  }
0x7597   :  { %8878 = vsyncadd [#allocation5], 4294967168 }
0x7598   :  { %6812 = vsyncpa [#allocation4], 1 }
0x7599   :  { %6813 = vsyncpa [#allocation7], 1 }
0x759a   :  { %6814 = vsyncpa [#allocation10], 1 }
0x759b   :  { %6815 = vsyncpa [#allocation13], 1 }
0x759c   :  { %6816 = vsyncpa [#allocation16], 1 }
0x759d   :  { %6817 = vsyncpa [#allocation19], 1 }
0x759e   :  { %6818 = vsyncpa [#allocation22], 1 }
0x759f   :  { %6819 = vsyncpa [#allocation5], 1 }

</bundles_post_ra>
